<compile_context>
chip_gen: v7x
topology: tpu7x:2x2x1
jax: 0.10.0
libtpu: 0.0.40
codegen_flags: <defaults>
</compile_context>

<pallas_src>
import functools

import jax
import jax.numpy as jnp
from jax.experimental import pallas as pl
from jax.experimental.pallas import tpu as pltpu

LANE = 128  # TPU lane width


def _round_up(n, m):
    return ((n + m - 1) // m) * m


def _linear(x, w_ref, b_ref, act=None):
    w = w_ref[...]
    # Cast the activation to the weight dtype at the MXU input; accumulate in f32.
    y = jnp.dot(x.astype(w.dtype), w, preferred_element_type=jnp.float32)
    y = y + b_ref[...]            # biases are kept f32
    if act == "relu":
        y = jnp.maximum(y, 0.0)
    elif act == "sigmoid":
        # sigmoid(x) = 1 / (1 + exp(-x)); exp and the approximate reciprocal both go to the
        # EUP slot, keeping the epilogue off the VALU.
        y = pl.reciprocal(1.0 + jnp.exp(-y), approx=True)
    return y


def vae_kernel(x_ref, eps_ref,
               w1, b1, w2, b2, w3, b3,
               wh, bh,                       # fused, lane-padded [mu | logvar | 0...] head
               wd1, bd1, wd2, bd2, wd3, bd3,  # wd3/bd3 lane-padded output columns
               recon_ref, heads_ref, *, latent_dim):
    L = latent_dim
    x = x_ref[...]                            # (TB, Dp) f32, zero-padded columns

    # ---- encoder
    h = _linear(x, w1, b1, "relu")
    h = _linear(h, w2, b2, "relu")
    h = _linear(h, w3, b3, "relu")

    # ---- fused heads: one (128, Hp=128) matmul; columns [0:L]=mu, [L:2L]=logvar, rest 0.
    heads = _linear(h, wh, bh, None)          # (TB, Hp) f32
    heads_ref[...] = heads.astype(heads_ref.dtype)   # lane-dense 128-wide store

    # ---- reparameterize: z = mu + eps * exp(0.5 * logvar)  (f32 element-wise)
    mu = heads[:, :L]
    logvar = heads[:, L:2 * L]
    z = mu + eps_ref[...] * jnp.exp(0.5 * logvar)     # (TB, L)

    # ---- decoder
    d = _linear(z, wd1, bd1, "relu")
    d = _linear(d, wd2, bd2, "relu")
    recon = _linear(d, wd3, bd3, "sigmoid")           # (TB, Dp) — padded cols sliced off outside
    recon_ref[...] = recon.astype(recon_ref.dtype)    # lane-dense 128-wide store


def init_vae_params(key, input_dim, latent_dim):
    """Deterministic init mimicking torch.nn.Linear default (uniform +/- 1/sqrt(fan_in))."""
    dims = [
        ("w1", input_dim, 512), ("w2", 512, 256), ("w3", 256, 128),
        ("wmu", 128, latent_dim), ("wlv", 128, latent_dim),
        ("wd1", latent_dim, 512), ("wd2", 512, 256), ("wd3", 256, input_dim),
    ]
    params = {}
    keys = jax.random.split(key, 2 * len(dims))
    for i, (name, fan_in, fan_out) in enumerate(dims):
        bound = 1.0 / jnp.sqrt(float(fan_in))
        params[name] = jax.random.uniform(
            keys[2 * i], (fan_in, fan_out), jnp.float32, -bound, bound)
        params["b" + name[1:]] = jax.random.uniform(
            keys[2 * i + 1], (1, fan_out), jnp.float32, -bound, bound)
    return params


def prepare_vae_params(params, input_dim, latent_dim, weight_dtype=jnp.bfloat16):
    """One-time weight prep: fuse the two heads, lane-pad to 128, cast weights to weight_dtype.

    Keeps biases in f32. All padding is with zeros, so the math is unchanged; the wrapper slices
    the padded output columns off.
    """
    f32 = jnp.float32
    Dp = _round_up(input_dim, LANE)             # padded input / recon feature dim
    Hp = _round_up(2 * latent_dim, LANE)        # padded fused-head width

    # Encoder first layer: zero-pad input rows (matches zero-padded x columns -> no-op).
    w1 = jnp.pad(params["w1"], ((0, Dp - input_dim), (0, 0)))
    # Fused [mu | logvar] head, zero-padded to Hp output columns for a lane-dense store.
    wh = jnp.pad(jnp.concatenate([params["wmu"], params["wlv"]], axis=1),
                 ((0, 0), (0, Hp - 2 * latent_dim)))
    bh = jnp.pad(jnp.concatenate([params["bmu"], params["blv"]], axis=1),
                 ((0, 0), (0, Hp - 2 * latent_dim)))
    # Decoder last layer: zero-pad output columns to Dp for a lane-dense recon store.
    wd3 = jnp.pad(params["wd3"], ((0, 0), (0, Dp - input_dim)))
    bd3 = jnp.pad(params["bd3"], ((0, 0), (0, Dp - input_dim)))

    wd = weight_dtype
    return (
        w1.astype(wd), params["b1"].astype(f32),
        params["w2"].astype(wd), params["b2"].astype(f32),
        params["w3"].astype(wd), params["b3"].astype(f32),
        wh.astype(wd), bh.astype(f32),
        params["wd1"].astype(wd), params["bd1"].astype(f32),
        params["wd2"].astype(wd), params["bd2"].astype(f32),
        wd3.astype(wd), bd3.astype(f32),
    )


@functools.partial(jax.jit, static_argnames=("tb",))
def vae_forward(x, eps, weights, *, tb=1024):
    """Runs the fused VAE forward Pallas kernel. Returns (recon, mu, logvar).

    `weights` is the tuple produced by prepare_vae_params(). Default TB=1024; capped so the grid
    keeps >= 2 steps for v7x megacore, and so small batches are not over-padded.
    """
    B, D = x.shape
    L = eps.shape[1]
    f32 = jnp.float32

    Dp = weights[0].shape[0]     # padded input / recon feature dim (w1 rows / wd3 cols)
    Hp = weights[6].shape[1]     # padded fused-head width (wh cols)

    # ---- batch tiling: large tile, but keep >= 2 grid steps when B allows (megacore on v7x).
    tb = max(8, _round_up(min(tb, 1024), 8))
    if B >= 16:
        half = _round_up(-(-B // 2), 8)        # ceil(B/2) rounded up to a sublane multiple
        tb = min(tb, half)
    else:
        tb = min(tb, _round_up(B, 8))
    Bp = _round_up(B, tb)
    num_blocks = Bp // tb

    # ---- pad activations: batch to Bp; input features to 128 lanes (zero columns are a no-op
    # against w1's zero rows). eps stays L lanes wide (tiny per-step DMA).
    x = jnp.pad(x.astype(f32), ((0, Bp - B), (0, Dp - D)))
    eps = jnp.pad(eps.astype(f32), ((0, Bp - B), (0, 0)))

    batch_spec = lambda cols: pl.BlockSpec((tb, cols), lambda i: (i, 0))
    resident_spec = lambda arr: pl.BlockSpec(arr.shape, lambda i: (0, 0))

    in_specs = [batch_spec(Dp), batch_spec(L)] + [resident_spec(w) for w in weights]
    out_specs = (batch_spec(Dp), batch_spec(Hp))
    out_shapes = (
        jax.ShapeDtypeStruct((Bp, Dp), f32),     # reconstruction (lane-padded)
        jax.ShapeDtypeStruct((Bp, Hp), f32),     # packed [mu | logvar | 0...] (lane-padded)
    )

    # ---- advisory cost estimate for XLA scheduling
    layer_dims = [(Dp, 512), (512, 256), (256, 128), (128, Hp),
                  (L, 512), (512, 256), (256, Dp)]
    flops = 2 * Bp * sum(k * n for k, n in layer_dims)
    transcendentals = Bp * (L + 2 * Dp)          # reparam exp + sigmoid exp/reciprocal
    bytes_accessed = (sum(int(w.size) * w.dtype.itemsize for w in weights)
                      + int(x.size) * 4 + int(eps.size) * 4
                      + Bp * Dp * 4 + Bp * Hp * 4)
    cost = pl.CostEstimate(flops=flops, transcendentals=transcendentals,
                           bytes_accessed=bytes_accessed)

    kernel = functools.partial(vae_kernel, latent_dim=L)
    recon_p, heads_p = pl.pallas_call(
        kernel,
        grid=(num_blocks,),
        in_specs=in_specs,
        out_specs=out_specs,
        out_shape=out_shapes,
        compiler_params=pltpu.CompilerParams(
            dimension_semantics=("parallel",),
            vmem_limit_bytes=48 * 1024 * 1024,   # headroom for TB=1024 on v5e's 16 MiB default
        ),
        cost_estimate=cost,
    )(x, eps, *weights)

    recon = recon_p[:B, :D]
    mu = heads_p[:B, :L]
    logvar = heads_p[:B, L:2 * L]
    return recon, mu, logvar


def vae_forward_ref(x, eps, params):
    """Plain-JAX reference for correctness checking."""
    def lin(h, w, b, act=None):
        y = h @ params[w] + params[b]
        if act == "relu":
            y = jnp.maximum(y, 0.0)
        elif act == "sigmoid":
            y = jax.nn.sigmoid(y)
        return y

    h = lin(x, "w1", "b1", "relu")
    h = lin(h, "w2", "b2", "relu")
    h = lin(h, "w3", "b3", "relu")
    mu = lin(h, "wmu", "bmu")
    logvar = lin(h, "wlv", "blv")
    z = mu + eps * jnp.exp(0.5 * logvar)
    d = lin(z, "wd1", "bd1", "relu")
    d = lin(d, "wd2", "bd2", "relu")
    recon = lin(d, "wd3", "bd3", "sigmoid")
    return recon, mu, logvar


if __name__ == "__main__":
    input_dim, latent_dim, batch = 64, 8, 256   # batch=256 -> TB capped to 128 -> 2 grid steps

    key = jax.random.PRNGKey(0)
    k_params, k_x, k_eps = jax.random.split(key, 3)

    params = init_vae_params(k_params, input_dim, latent_dim)
    x = jax.random.uniform(k_x, (batch, input_dim), jnp.float32)       # normalized data
    eps = jax.random.normal(k_eps, (batch, latent_dim), jnp.float32)   # reparameterization noise

    recon_r, mu_r, logvar_r = vae_forward_ref(x, eps, params)

    # f32 weights: mu/logvar exact; recon tolerance loosened for the approx-reciprocal sigmoid.
    w_f32 = prepare_vae_params(params, input_dim, latent_dim, weight_dtype=jnp.float32)
    recon, mu, logvar = jax.block_until_ready(vae_forward(x, eps, w_f32))
    assert recon.shape == (batch, input_dim)
    assert mu.shape == (batch, latent_dim) and logvar.shape == (batch, latent_dim)
    assert jnp.allclose(mu, mu_r, atol=1e-5)
    assert jnp.allclose(logvar, logvar_r, atol=1e-5)
    assert jnp.allclose(recon, recon_r, atol=5e-3)

    # bf16 weights (default MXU fast path on all generations), f32 accumulation: loose tolerance.
    w_bf16 = prepare_vae_params(params, input_dim, latent_dim, weight_dtype=jnp.bfloat16)
    recon_b, mu_b, logvar_b = jax.block_until_ready(vae_forward(x, eps, w_bf16))
    assert jnp.all(jnp.isfinite(recon_b))
    assert jnp.allclose(mu_b, mu_r, atol=1e-1)
    assert jnp.allclose(logvar_b, logvar_r, atol=1e-1)
    assert jnp.allclose(recon_b, recon_r, atol=1e-1)

    print("KERNEL_OK")
</pallas_src>

<mosaic_0001>
module attributes {stable_mosaic.version = 11 : i64} {
  func.func @vae_kernel(%arg0: i32, %arg1: memref<128x128xf32, #tpu.memory_space<vmem>>, %arg2: memref<128x8xf32, #tpu.memory_space<vmem>>, %arg3: memref<128x512xf32, #tpu.memory_space<vmem>>, %arg4: memref<1x512xf32, #tpu.memory_space<vmem>>, %arg5: memref<512x256xf32, #tpu.memory_space<vmem>>, %arg6: memref<1x256xf32, #tpu.memory_space<vmem>>, %arg7: memref<256x128xf32, #tpu.memory_space<vmem>>, %arg8: memref<1x128xf32, #tpu.memory_space<vmem>>, %arg9: memref<128x128xf32, #tpu.memory_space<vmem>>, %arg10: memref<1x128xf32, #tpu.memory_space<vmem>>, %arg11: memref<8x512xf32, #tpu.memory_space<vmem>>, %arg12: memref<1x512xf32, #tpu.memory_space<vmem>>, %arg13: memref<512x256xf32, #tpu.memory_space<vmem>>, %arg14: memref<1x256xf32, #tpu.memory_space<vmem>>, %arg15: memref<256x128xf32, #tpu.memory_space<vmem>>, %arg16: memref<1x128xf32, #tpu.memory_space<vmem>>, %arg17: memref<128x128xf32, #tpu.memory_space<vmem>>, %arg18: memref<128x128xf32, #tpu.memory_space<vmem>>) attributes {dimension_semantics = [#tpu.dimension_semantics<parallel>], iteration_bounds = array<i64: 2>, scalar_prefetch = 0 : i64, scratch_operands = 0 : i64, tpu.core_type = #tpu.core_type<tc>, window_params = [{transform_indices = @transform_0, window_bounds = array<i64: 128, 128>}, {transform_indices = @transform_1, window_bounds = array<i64: 128, 8>}, {pipeline_mode = #tpu.pipeline_mode<synchronous>, transform_indices = @transform_2, window_bounds = array<i64: 128, 512>}, {pipeline_mode = #tpu.pipeline_mode<synchronous>, transform_indices = @transform_3, window_bounds = array<i64: 1, 512>}, {pipeline_mode = #tpu.pipeline_mode<synchronous>, transform_indices = @transform_4, window_bounds = array<i64: 512, 256>}, {pipeline_mode = #tpu.pipeline_mode<synchronous>, transform_indices = @transform_5, window_bounds = array<i64: 1, 256>}, {pipeline_mode = #tpu.pipeline_mode<synchronous>, transform_indices = @transform_6, window_bounds = array<i64: 256, 128>}, {pipeline_mode = #tpu.pipeline_mode<synchronous>, transform_indices = @transform_7, window_bounds = array<i64: 1, 128>}, {pipeline_mode = #tpu.pipeline_mode<synchronous>, transform_indices = @transform_8, window_bounds = array<i64: 128, 128>}, {pipeline_mode = #tpu.pipeline_mode<synchronous>, transform_indices = @transform_9, window_bounds = array<i64: 1, 128>}, {pipeline_mode = #tpu.pipeline_mode<synchronous>, transform_indices = @transform_10, window_bounds = array<i64: 8, 512>}, {pipeline_mode = #tpu.pipeline_mode<synchronous>, transform_indices = @transform_11, window_bounds = array<i64: 1, 512>}, {pipeline_mode = #tpu.pipeline_mode<synchronous>, transform_indices = @transform_12, window_bounds = array<i64: 512, 256>}, {pipeline_mode = #tpu.pipeline_mode<synchronous>, transform_indices = @transform_13, window_bounds = array<i64: 1, 256>}, {pipeline_mode = #tpu.pipeline_mode<synchronous>, transform_indices = @transform_14, window_bounds = array<i64: 256, 128>}, {pipeline_mode = #tpu.pipeline_mode<synchronous>, transform_indices = @transform_15, window_bounds = array<i64: 1, 128>}, {transform_indices = @transform_16, window_bounds = array<i64: 128, 128>}, {transform_indices = @transform_17, window_bounds = array<i64: 128, 128>}]} {
    %c0 = arith.constant 0 : index
    %c0_0 = arith.constant 0 : index
    %0 = vector.load %arg1[%c0, %c0_0] : memref<128x128xf32, #tpu.memory_space<vmem>>, vector<128x128xf32>
    %c0_1 = arith.constant 0 : index
    %c0_2 = arith.constant 0 : index
    %1 = vector.load %arg3[%c0_1, %c0_2] : memref<128x512xf32, #tpu.memory_space<vmem>>, vector<128x512xf32>
    %cst = arith.constant dense<0.000000e+00> : vector<128x512xf32>
    %2 = tpu.matmul %0, %1, %cst {dimension_numbers = #tpu.dot_dimension_numbers<[1], [0], [0], [1], [0, 0, 1, 1], [], []>} : vector<128x128xf32>, vector<128x512xf32>, vector<128x512xf32> -> vector<128x512xf32>
    %c0_3 = arith.constant 0 : index
    %c0_4 = arith.constant 0 : index
    %3 = vector.load %arg4[%c0_3, %c0_4] : memref<1x512xf32, #tpu.memory_space<vmem>>, vector<1x512xf32>
    %4 = vector.broadcast %3 : vector<1x512xf32> to vector<128x512xf32>
    %5 = arith.addf %2, %4 : vector<128x512xf32>
    %cst_5 = arith.constant 0.000000e+00 : f32
    %6 = vector.broadcast %cst_5 : f32 to vector<128x512xf32>
    %7 = arith.maximumf %5, %6 : vector<128x512xf32>
    %c0_6 = arith.constant 0 : index
    %c0_7 = arith.constant 0 : index
    %8 = vector.load %arg5[%c0_6, %c0_7] : memref<512x256xf32, #tpu.memory_space<vmem>>, vector<512x256xf32>
    %cst_8 = arith.constant dense<0.000000e+00> : vector<128x256xf32>
    %9 = tpu.matmul %7, %8, %cst_8 {dimension_numbers = #tpu.dot_dimension_numbers<[1], [0], [0], [1], [0, 0, 1, 1], [], []>} : vector<128x512xf32>, vector<512x256xf32>, vector<128x256xf32> -> vector<128x256xf32>
    %c0_9 = arith.constant 0 : index
    %c0_10 = arith.constant 0 : index
    %10 = vector.load %arg6[%c0_9, %c0_10] : memref<1x256xf32, #tpu.memory_space<vmem>>, vector<1x256xf32>
    %11 = vector.broadcast %10 : vector<1x256xf32> to vector<128x256xf32>
    %12 = arith.addf %9, %11 : vector<128x256xf32>
    %cst_11 = arith.constant 0.000000e+00 : f32
    %13 = vector.broadcast %cst_11 : f32 to vector<128x256xf32>
    %14 = arith.maximumf %12, %13 : vector<128x256xf32>
    %c0_12 = arith.constant 0 : index
    %c0_13 = arith.constant 0 : index
    %15 = vector.load %arg7[%c0_12, %c0_13] : memref<256x128xf32, #tpu.memory_space<vmem>>, vector<256x128xf32>
    %cst_14 = arith.constant dense<0.000000e+00> : vector<128x128xf32>
    %16 = tpu.matmul %14, %15, %cst_14 {dimension_numbers = #tpu.dot_dimension_numbers<[1], [0], [0], [1], [0, 0, 1, 1], [], []>} : vector<128x256xf32>, vector<256x128xf32>, vector<128x128xf32> -> vector<128x128xf32>
    %c0_15 = arith.constant 0 : index
    %c0_16 = arith.constant 0 : index
    %17 = vector.load %arg8[%c0_15, %c0_16] : memref<1x128xf32, #tpu.memory_space<vmem>>, vector<1x128xf32>
    %18 = vector.broadcast %17 : vector<1x128xf32> to vector<128x128xf32>
    %19 = arith.addf %16, %18 : vector<128x128xf32>
    %cst_17 = arith.constant 0.000000e+00 : f32
    %20 = vector.broadcast %cst_17 : f32 to vector<128x128xf32>
    %21 = arith.maximumf %19, %20 : vector<128x128xf32>
    %c0_18 = arith.constant 0 : index
    %c0_19 = arith.constant 0 : index
    %22 = vector.load %arg9[%c0_18, %c0_19] : memref<128x128xf32, #tpu.memory_space<vmem>>, vector<128x128xf32>
    %cst_20 = arith.constant dense<0.000000e+00> : vector<128x128xf32>
    %23 = tpu.matmul %21, %22, %cst_20 {dimension_numbers = #tpu.dot_dimension_numbers<[1], [0], [0], [1], [0, 0, 1, 1], [], []>} : vector<128x128xf32>, vector<128x128xf32>, vector<128x128xf32> -> vector<128x128xf32>
    %c0_21 = arith.constant 0 : index
    %c0_22 = arith.constant 0 : index
    %24 = vector.load %arg10[%c0_21, %c0_22] : memref<1x128xf32, #tpu.memory_space<vmem>>, vector<1x128xf32>
    %25 = vector.broadcast %24 : vector<1x128xf32> to vector<128x128xf32>
    %26 = arith.addf %23, %25 : vector<128x128xf32>
    %c0_23 = arith.constant 0 : index
    %c0_24 = arith.constant 0 : index
    %27 = vector.load %arg18[%c0_23, %c0_24] : memref<128x128xf32, #tpu.memory_space<vmem>>, vector<128x128xf32>
    tpu.vector_store %arg18[%c0_23, %c0_24], %26 {strides = array<i32>} : memref<128x128xf32, #tpu.memory_space<vmem>>, vector<128x128xf32>,
    %28 = vector.extract_strided_slice %26 {offsets = [0, 0], sizes = [128, 8], strides = [1, 1]} : vector<128x128xf32> to vector<128x8xf32>
    %29 = vector.extract_strided_slice %26 {offsets = [0, 8], sizes = [128, 8], strides = [1, 1]} : vector<128x128xf32> to vector<128x8xf32>
    %c0_25 = arith.constant 0 : index
    %c0_26 = arith.constant 0 : index
    %30 = vector.load %arg2[%c0_25, %c0_26] : memref<128x8xf32, #tpu.memory_space<vmem>>, vector<128x8xf32>
    %cst_27 = arith.constant 5.000000e-01 : f32
    %31 = vector.broadcast %cst_27 : f32 to vector<128x8xf32>
    %32 = arith.mulf %31, %29 : vector<128x8xf32>
    %33 = math.exp %32 : vector<128x8xf32>
    %34 = arith.mulf %30, %33 : vector<128x8xf32>
    %35 = arith.addf %28, %34 : vector<128x8xf32>
    %c0_28 = arith.constant 0 : index
    %c0_29 = arith.constant 0 : index
    %36 = vector.load %arg11[%c0_28, %c0_29] : memref<8x512xf32, #tpu.memory_space<vmem>>, vector<8x512xf32>
    %cst_30 = arith.constant dense<0.000000e+00> : vector<128x512xf32>
    %37 = tpu.matmul %35, %36, %cst_30 {dimension_numbers = #tpu.dot_dimension_numbers<[1], [0], [0], [1], [0, 0, 1, 1], [], []>} : vector<128x8xf32>, vector<8x512xf32>, vector<128x512xf32> -> vector<128x512xf32>
    %c0_31 = arith.constant 0 : index
    %c0_32 = arith.constant 0 : index
    %38 = vector.load %arg12[%c0_31, %c0_32] : memref<1x512xf32, #tpu.memory_space<vmem>>, vector<1x512xf32>
    %39 = vector.broadcast %38 : vector<1x512xf32> to vector<128x512xf32>
    %40 = arith.addf %37, %39 : vector<128x512xf32>
    %cst_33 = arith.constant 0.000000e+00 : f32
    %41 = vector.broadcast %cst_33 : f32 to vector<128x512xf32>
    %42 = arith.maximumf %40, %41 : vector<128x512xf32>
    %c0_34 = arith.constant 0 : index
    %c0_35 = arith.constant 0 : index
    %43 = vector.load %arg13[%c0_34, %c0_35] : memref<512x256xf32, #tpu.memory_space<vmem>>, vector<512x256xf32>
    %cst_36 = arith.constant dense<0.000000e+00> : vector<128x256xf32>
    %44 = tpu.matmul %42, %43, %cst_36 {dimension_numbers = #tpu.dot_dimension_numbers<[1], [0], [0], [1], [0, 0, 1, 1], [], []>} : vector<128x512xf32>, vector<512x256xf32>, vector<128x256xf32> -> vector<128x256xf32>
    %c0_37 = arith.constant 0 : index
    %c0_38 = arith.constant 0 : index
    %45 = vector.load %arg14[%c0_37, %c0_38] : memref<1x256xf32, #tpu.memory_space<vmem>>, vector<1x256xf32>
    %46 = vector.broadcast %45 : vector<1x256xf32> to vector<128x256xf32>
    %47 = arith.addf %44, %46 : vector<128x256xf32>
    %cst_39 = arith.constant 0.000000e+00 : f32
    %48 = vector.broadcast %cst_39 : f32 to vector<128x256xf32>
    %49 = arith.maximumf %47, %48 : vector<128x256xf32>
    %c0_40 = arith.constant 0 : index
    %c0_41 = arith.constant 0 : index
    %50 = vector.load %arg15[%c0_40, %c0_41] : memref<256x128xf32, #tpu.memory_space<vmem>>, vector<256x128xf32>
    %cst_42 = arith.constant dense<0.000000e+00> : vector<128x128xf32>
    %51 = tpu.matmul %49, %50, %cst_42 {dimension_numbers = #tpu.dot_dimension_numbers<[1], [0], [0], [1], [0, 0, 1, 1], [], []>} : vector<128x256xf32>, vector<256x128xf32>, vector<128x128xf32> -> vector<128x128xf32>
    %c0_43 = arith.constant 0 : index
    %c0_44 = arith.constant 0 : index
    %52 = vector.load %arg16[%c0_43, %c0_44] : memref<1x128xf32, #tpu.memory_space<vmem>>, vector<1x128xf32>
    %53 = vector.broadcast %52 : vector<1x128xf32> to vector<128x128xf32>
    %54 = arith.addf %51, %53 : vector<128x128xf32>
    %cst_45 = arith.constant 0.000000e+00 : f32
    %55 = vector.broadcast %cst_45 : f32 to vector<128x128xf32>
    %56 = arith.subf %55, %54 : vector<128x128xf32>
    %57 = math.exp %56 : vector<128x128xf32>
    %cst_46 = arith.constant 1.000000e+00 : f32
    %58 = vector.broadcast %cst_46 : f32 to vector<128x128xf32>
    %59 = arith.addf %58, %57 : vector<128x128xf32>
    %60 = tpu.reciprocal %59 {approx = true} : vector<128x128xf32> -> vector<128x128xf32>
    %c0_47 = arith.constant 0 : index
    %c0_48 = arith.constant 0 : index
    %61 = vector.load %arg17[%c0_47, %c0_48] : memref<128x128xf32, #tpu.memory_space<vmem>>, vector<128x128xf32>
    tpu.vector_store %arg17[%c0_47, %c0_48], %60 {strides = array<i32>} : memref<128x128xf32, #tpu.memory_space<vmem>>, vector<128x128xf32>,
    return
  }
  func.func @transform_0(%arg0: i32) -> (i32, i32) {
    %c0_i32 = arith.constant 0 : i32
    %c0_i32_0 = arith.constant 0 : i32
    return %arg0, %c0_i32 : i32, i32
  }
  func.func @transform_1(%arg0: i32) -> (i32, i32) {
    %c0_i32 = arith.constant 0 : i32
    %c0_i32_0 = arith.constant 0 : i32
    return %arg0, %c0_i32 : i32, i32
  }
  func.func @transform_2(%arg0: i32) -> (i32, i32) {
    %c0_i32 = arith.constant 0 : i32
    %c0_i32_0 = arith.constant 0 : i32
    %c0_i32_1 = arith.constant 0 : i32
    return %c0_i32, %c0_i32_0 : i32, i32
  }
  func.func @transform_3(%arg0: i32) -> (i32, i32) {
    %c0_i32 = arith.constant 0 : i32
    %c0_i32_0 = arith.constant 0 : i32
    %c0_i32_1 = arith.constant 0 : i32
    return %c0_i32, %c0_i32_0 : i32, i32
  }
  func.func @transform_4(%arg0: i32) -> (i32, i32) {
    %c0_i32 = arith.constant 0 : i32
    %c0_i32_0 = arith.constant 0 : i32
    %c0_i32_1 = arith.constant 0 : i32
    return %c0_i32, %c0_i32_0 : i32, i32
  }
  func.func @transform_5(%arg0: i32) -> (i32, i32) {
    %c0_i32 = arith.constant 0 : i32
    %c0_i32_0 = arith.constant 0 : i32
    %c0_i32_1 = arith.constant 0 : i32
    return %c0_i32, %c0_i32_0 : i32, i32
  }
  func.func @transform_6(%arg0: i32) -> (i32, i32) {
    %c0_i32 = arith.constant 0 : i32
    %c0_i32_0 = arith.constant 0 : i32
    %c0_i32_1 = arith.constant 0 : i32
    return %c0_i32, %c0_i32_0 : i32, i32
  }
  func.func @transform_7(%arg0: i32) -> (i32, i32) {
    %c0_i32 = arith.constant 0 : i32
    %c0_i32_0 = arith.constant 0 : i32
    %c0_i32_1 = arith.constant 0 : i32
    return %c0_i32, %c0_i32_0 : i32, i32
  }
  func.func @transform_8(%arg0: i32) -> (i32, i32) {
    %c0_i32 = arith.constant 0 : i32
    %c0_i32_0 = arith.constant 0 : i32
    %c0_i32_1 = arith.constant 0 : i32
    return %c0_i32, %c0_i32_0 : i32, i32
  }
  func.func @transform_9(%arg0: i32) -> (i32, i32) {
    %c0_i32 = arith.constant 0 : i32
    %c0_i32_0 = arith.constant 0 : i32
    %c0_i32_1 = arith.constant 0 : i32
    return %c0_i32, %c0_i32_0 : i32, i32
  }
  func.func @transform_10(%arg0: i32) -> (i32, i32) {
    %c0_i32 = arith.constant 0 : i32
    %c0_i32_0 = arith.constant 0 : i32
    %c0_i32_1 = arith.constant 0 : i32
    return %c0_i32, %c0_i32_0 : i32, i32
  }
  func.func @transform_11(%arg0: i32) -> (i32, i32) {
    %c0_i32 = arith.constant 0 : i32
    %c0_i32_0 = arith.constant 0 : i32
    %c0_i32_1 = arith.constant 0 : i32
    return %c0_i32, %c0_i32_0 : i32, i32
  }
  func.func @transform_12(%arg0: i32) -> (i32, i32) {
    %c0_i32 = arith.constant 0 : i32
    %c0_i32_0 = arith.constant 0 : i32
    %c0_i32_1 = arith.constant 0 : i32
    return %c0_i32, %c0_i32_0 : i32, i32
  }
  func.func @transform_13(%arg0: i32) -> (i32, i32) {
    %c0_i32 = arith.constant 0 : i32
    %c0_i32_0 = arith.constant 0 : i32
    %c0_i32_1 = arith.constant 0 : i32
    return %c0_i32, %c0_i32_0 : i32, i32
  }
  func.func @transform_14(%arg0: i32) -> (i32, i32) {
    %c0_i32 = arith.constant 0 : i32
    %c0_i32_0 = arith.constant 0 : i32
    %c0_i32_1 = arith.constant 0 : i32
    return %c0_i32, %c0_i32_0 : i32, i32
  }
  func.func @transform_15(%arg0: i32) -> (i32, i32) {
    %c0_i32 = arith.constant 0 : i32
    %c0_i32_0 = arith.constant 0 : i32
    %c0_i32_1 = arith.constant 0 : i32
    return %c0_i32, %c0_i32_0 : i32, i32
  }
  func.func @transform_16(%arg0: i32) -> (i32, i32) {
    %c0_i32 = arith.constant 0 : i32
    %c0_i32_0 = arith.constant 0 : i32
    return %arg0, %c0_i32 : i32, i32
  }
  func.func @transform_17(%arg0: i32) -> (i32, i32) {
    %c0_i32 = arith.constant 0 : i32
    %c0_i32_0 = arith.constant 0 : i32
    return %arg0, %c0_i32 : i32, i32
  }
}

</mosaic_0001>

<bundles_post_ra>
// kernel: vae_forward.1
= control target key start
LH: loop header
LB: loop body
LE: loop exit
PB: predicated region body
PF: predicated region fallthrough
CT: control target
= control target key end

     0   :  { %s6508_s0 = inlined_call_operand.vmem [shape: f32[256,128], index: 0, kind: input, shape index: {}]   ;;  %s6509_s1 = inlined_call_operand.vmem [shape: f32[256,8], index: 1, kind: input, shape index: {}]   ;;  %s6510_s2 = inlined_call_operand.hbm [shape: f32[128,512], index: 2, kind: input, shape index: {}]   ;;  %s6511_s3 = inlined_call_operand.hbm [shape: f32[1,512], index: 3, kind: input, shape index: {}]   ;;  %s6512_s4 = inlined_call_operand.vmem [shape: f32[512,256], index: 4, kind: input, shape index: {}]   ;;  %s6513_s5 = inlined_call_operand.hbm [shape: f32[1,256], index: 5, kind: input, shape index: {}]   ;;  %s6514_s6 = inlined_call_operand.hbm [shape: f32[256,128], index: 6, kind: input, shape index: {}]   ;;  %s6515_s7 = inlined_call_operand.hbm [shape: f32[1,128], index: 7, kind: input, shape index: {}]   ;;  %s6516_s8 = inlined_call_operand.vmem [shape: f32[128,128], index: 8, kind: input, shape index: {}]   ;;  %s6517_s9 = inlined_call_operand.vmem [shape: f32[1,128], index: 9, kind: input, shape index: {}]   ;;  %s6518_s10 = inlined_call_operand.vmem [shape: f32[8,512], index: 10, kind: input, shape index: {}]   ;;  %s6519_s11 = inlined_call_operand.vmem [shape: f32[1,512], index: 11, kind: input, shape index: {}]   ;;  %s6520_s12 = inlined_call_operand.hbm [shape: f32[512,256], index: 12, kind: input, shape index: {}]   ;;  %s6521_s13 = inlined_call_operand.vmem [shape: f32[1,256], index: 13, kind: input, shape index: {}]   ;;  %s6522_s14 = inlined_call_operand.hbm [shape: f32[256,128], index: 14, kind: input, shape index: {}]   ;;  %s6523_s15 = inlined_call_operand.vmem [shape: f32[1,128], index: 15, kind: input, shape index: {}]   ;;  %s6524_s16 = inlined_call_operand.vmem [shape: f32[256,128], index: 16, kind: output, shape index: {0}]   ;;  %s6525_s17 = inlined_call_operand.vmem [shape: f32[256,128], index: 17, kind: output, shape index: {1}]  }
   0x1   :  { %6539 = sst [smem:[#allocation19_spill]] %s6508_s0 }
   0x2   :  { %6540 = sst [smem:[#allocation20_spill]] %s6509_s1 }
   0x3   :  { %6541 = sst [smem:[#allocation21_spill]] %s6511_s3 }
   0x4   :  { %6542 = sst [smem:[#allocation22_spill]] %s6514_s6 }
   0x5   :  { %6543 = sst [smem:[#allocation23_spill]] %s6520_s12 }
   0x6   :  { %6544 = sst [smem:[#allocation24_spill]] %s6521_s13 }
   0x7   :  { %6545 = sst [smem:[#allocation25_spill]] %s6523_s15 }
   0x8   :  { %6546 = sst [smem:[#allocation26_spill]] %s6524_s16 }
   0x9   :  { %23 = vsyncpa [#allocation3], 0 }
   0xa   :  { %24 = vsyncpa [#allocation5], 0 }
   0xb   :  { %25 = vsyncpa [#allocation8], 0 }
   0xc   :  { %26 = vsyncpa [#allocation11], 0  ;;  %s4996_s24 = smov 0  }
   0xd LB: > { %s4891_s25 = smov [#allocation4]   ;;  %s6526_s27 = sadd.s32 4294967295, %s4889_s24   ;;  %s4889_s24 = sphi %s4996_s24, %s32_s24  }
   0xe   : > { %s461_s26 = sshll.u32 %s4891_s25, 4  ;;  %p3618_p0 = scmp.ge.s32.totalorder %s4889_s24, 1  ;;  %s462_s26 = int_to_ptr.vmem [resolvable:$true] %s461_s26 }
   0xf   : > { %p435_p1 = scmp.lt.s32.totalorder %s4889_s24, 3  ;;  %p5006_p2 = scmp.eq.s32.totalorder %s6526_s27, 0 }
  0x10   : > { %s4892_s0 = smov [#allocation7]   ;;  %s4893_s19 = smov [#allocation10]  }
  0x11   : > { %s6547_s28 = scalar_select %p5006_p2, 1, 0 }
  0x12   : > { %p5010_p3 = pnand %p3618_p0, %p435_p1  ;;  %s485_s30 = sshll.u32 %s4892_s0, 4  ;;  %s5016_s30 = int_to_ptr.vmem [resolvable:$true] %s485_s30 }
  0x13   : > { %s521_s1 = sshll.u32 %s4893_s19, 4  ;;  %s6550_s3 = sld [smem:[#allocation21_spill]]  ;;  %s5024_s1 = int_to_ptr.vmem [resolvable:$true] %s521_s1 }
  0x14   : > { %s6548_s29 = scalar_select %p5010_p3, 1, 0 }
  0x15   : > { %p4516_p4 = pneg %p5010_p3 }
  0x17   : > { %p5020_p5 = pnand %p5006_p2, %p4516_p4 }
  0x19   : > { %s4671_s22 = scalar_lea.hbm %s6550_s3, 64  ;;  %p5034_p7 = pneg %p5020_p5 }
  0x1a   : > { %p4672_p6 = scmp.ne.s32.totalorder %s6550_s3, %s4671_s22  ;;  %p4678_p10 = scmp.lt.u32.totalorder %s4671_s22, %s6550_s3 }
  0x1c   : > { %p4674_p8 = pnand %p5034_p7, %p4672_p6 }
  0x1e   : > { %p4675_p9 = pneg %p4674_p8 }
  0x20   : > { %p4680_p11 = pnand %p4678_p10, %p4675_p9 }
  0x22   : > { %4683 = shalt.err (!%p4680_p11)
}
  0x23   : > { %s4684_s20 = scalar_lea.vmem %s462_s26, 64  ;;  %p4692_p1 = scmp.lt.s32.totalorder %s462_s26, %s462_s26 }
  0x24   : > { %p4685_p12 = scmp.ne.s32.totalorder %s462_s26, %s4684_s20  ;;  %p4693_p4 = scmp.lt.s32.totalorder %s4684_s20, %s4684_s20 }
  0x26   : > { %p4687_p13 = pnand %p4685_p12, %p5034_p7  ;;  %p4694_p2 = por %p4693_p4, %p4692_p1 }
  0x28   : > { %p4688_p0 = pneg %p4687_p13 }
  0x2a   : > { %p4695_p3 = pnand %p4694_p2, %p4688_p0 }
  0x2c   : > { %4698 = shalt.err (!%p4695_p3)
}
  0x2d   : > { %4522 = dma.hbm_to_vmem [thread:$0]  (!%p5020_p5), %s6550_s3, 64, %s462_s26, [#allocation5]  }
  0x2e   : > { %s6552_s6 = sld [smem:[#allocation22_spill]] }
  0x34   : > { %s4699_s25 = scalar_lea.hbm %s6552_s6, 4096 }
  0x35   : > { %p4700_p6 = scmp.ne.s32.totalorder %s6552_s6, %s4699_s25  ;;  %p4706_p2 = scmp.lt.u32.totalorder %s4699_s25, %s6552_s6 }
  0x37   : > { %p4702_p8 = pnand %p4700_p6, %p5034_p7 }
  0x39   : > { %p4703_p9 = pneg %p4702_p8 }
  0x3b   : > { %p4708_p3 = pnand %p4706_p2, %p4703_p9 }
  0x3d   : > { %4711 = shalt.err (!%p4708_p3)
}
  0x3e   : > { %s4712_s26 = scalar_lea.vmem %s5016_s30, 4096  ;;  %p4720_p13 = scmp.lt.s32.totalorder %s5016_s30, %s5016_s30 }
  0x3f   : > { %p4713_p10 = scmp.ne.s32.totalorder %s5016_s30, %s4712_s26  ;;  %p4721_p0 = scmp.lt.s32.totalorder %s4712_s26, %s4712_s26 }
  0x41   : > { %p4715_p11 = pnand %p4713_p10, %p5034_p7  ;;  %p4722_p1 = por %p4721_p0, %p4720_p13 }
  0x43   : > { %p4716_p12 = pneg %p4715_p11 }
  0x45   : > { %p4723_p4 = pnand %p4722_p1, %p4716_p12 }
  0x47   : > { %4726 = shalt.err (!%p4723_p4)
}
  0x48   : > { %s6530_s16 = smov 128   ;;  %s6531_s15 = smov 8  }
  0x49   : > { %4528 = dma.hbm_to_vmem [thread:$0]  (!%p5020_p5), %s6552_s6, 4096, %s5016_s30, [#allocation8], %s6530_s16, %s6530_s16, %s6531_s15  }
  0x4a   : > { %s6553_s12 = sld [smem:[#allocation23_spill]] }
  0x50   : > { %s4727_s25 = scalar_lea.hbm %s6553_s12, 16384 }
  0x51   : > { %p4728_p6 = scmp.ne.s32.totalorder %s6553_s12, %s4727_s25  ;;  %p4734_p2 = scmp.lt.u32.totalorder %s4727_s25, %s6553_s12 }
  0x53   : > { %p4730_p8 = pnand %p4728_p6, %p5034_p7 }
  0x55   : > { %p4731_p9 = pneg %p4730_p8 }
  0x57   : > { %p4736_p3 = pnand %p4734_p2, %p4731_p9 }
  0x59   : > { %4739 = shalt.err (!%p4736_p3)
}
  0x5a   : > { %s4740_s30 = scalar_lea.vmem %s5024_s1, 16384  ;;  %p4748_p13 = scmp.lt.s32.totalorder %s5024_s1, %s5024_s1 }
  0x5b   : > { %p4741_p10 = scmp.ne.s32.totalorder %s5024_s1, %s4740_s30  ;;  %p4749_p0 = scmp.lt.s32.totalorder %s4740_s30, %s4740_s30 }
  0x5d   : > { %p4743_p11 = pnand %p4741_p10, %p5034_p7  ;;  %p4750_p1 = por %p4749_p0, %p4748_p13 }
  0x5f   : > { %p4744_p12 = pneg %p4743_p11 }
  0x61   : > { %p4751_p4 = pnand %p4750_p1, %p4744_p12 }
  0x63   : > { %4754 = shalt.err (!%p4751_p4)
}
  0x64   : > { %s4896_s21 = smov 256   ;;  %s4897_s3 = smov 16  }
  0x65   : > { %4534 = dma.hbm_to_vmem [thread:$0]  (!%p5020_p5), %s6553_s12, 16384, %s5024_s1, [#allocation11], %s4896_s21, %s4896_s21, %s4897_s3  }
  0x66   : > { %s4898_s22 = smov [#allocation2]   ;;  %s4755_s26 = scalar_lea.hbm %s6510_s2, 8192 }
  0x67   : > { %s447_s25 = sshll.u32 %s4898_s22, 4  ;;  %p4756_p6 = scmp.ne.s32.totalorder %s6510_s2, %s4755_s26  ;;  %s448_s25 = int_to_ptr.vmem [resolvable:$true] %s447_s25 }
  0x68   : > { %p4762_p2 = scmp.lt.u32.totalorder %s4755_s26, %s6510_s2 }
  0x69   : > { %p4758_p8 = pnand %p4756_p6, %p5034_p7 }
  0x6b   : > { %p4759_p9 = pneg %p4758_p8 }
  0x6d   : > { %p4764_p3 = pnand %p4762_p2, %p4759_p9 }
  0x6f   : > { %4767 = shalt.err (!%p4764_p3)
}
  0x70   : > { %s4768_s1 = scalar_lea.vmem %s448_s25, 8192  ;;  %p4776_p13 = scmp.lt.s32.totalorder %s448_s25, %s448_s25 }
  0x71   : > { %p4769_p10 = scmp.ne.s32.totalorder %s448_s25, %s4768_s1  ;;  %p4777_p0 = scmp.lt.s32.totalorder %s4768_s1, %s4768_s1 }
  0x73   : > { %p4771_p11 = pnand %p4769_p10, %p5034_p7  ;;  %p4778_p1 = por %p4777_p0, %p4776_p13 }
  0x75   : > { %p4772_p12 = pneg %p4771_p11 }
  0x77   : > { %p4779_p4 = pnand %p4778_p1, %p4772_p12 }
  0x79   : > { %4782 = shalt.err (!%p4779_p4)
}
  0x7a   : > { %s4899_s16 = smov 512   ;;  %s4900_s21 = smov 32  }
  0x7b   : > { %4519 = dma.hbm_to_vmem [thread:$0]  (!%p5020_p5), %s6510_s2, 8192, %s448_s25, [#allocation3], %s4899_s16, %s4899_s16, %s4900_s21  }
  0x7c   : > { %s4901_s3 = smov [#allocation6]   ;;  %s4902_s27 = smov [#allocation9]  }
  0x7d   : > { %s475_s23 = sshll.u32 %s4901_s3, 4  ;;  %s499_s22 = sshll.u32 %s4902_s27, 4  ;;  %s476_s23 = int_to_ptr.vmem [resolvable:$true] %s475_s23  ;;  %s500_s22 = int_to_ptr.vmem [resolvable:$true] %s499_s22 }
  0x7e   : > { %s4783_s26 = scalar_lea.hbm %s6513_s5, 32 }
  0x7f   : > { %p4784_p6 = scmp.ne.s32.totalorder %s6513_s5, %s4783_s26  ;;  %p4790_p2 = scmp.lt.u32.totalorder %s4783_s26, %s6513_s5 }
  0x81   : > { %p4786_p8 = pnand %p4784_p6, %p5034_p7 }
  0x83   : > { %p4787_p9 = pneg %p4786_p8 }
  0x85   : > { %p4792_p3 = pnand %p4790_p2, %p4787_p9 }
  0x87   : > { %4795 = shalt.err (!%p4792_p3)
}
  0x88   : > { %s4796_s25 = scalar_lea.vmem %s476_s23, 32  ;;  %p4804_p13 = scmp.lt.s32.totalorder %s476_s23, %s476_s23 }
  0x89   : > { %p4797_p10 = scmp.ne.s32.totalorder %s476_s23, %s4796_s25  ;;  %p4805_p0 = scmp.lt.s32.totalorder %s4796_s25, %s4796_s25 }
  0x8b   : > { %p4799_p11 = pnand %p4797_p10, %p5034_p7  ;;  %p4806_p1 = por %p4805_p0, %p4804_p13 }
  0x8d   : > { %p4800_p12 = pneg %p4799_p11 }
  0x8f   : > { %p4807_p4 = pnand %p4806_p1, %p4800_p12 }
  0x91   : > { %4810 = shalt.err (!%p4807_p4)
}
  0x92   : > { %4525 = dma.hbm_to_vmem [thread:$0]  (!%p5020_p5), %s6513_s5, 32, %s476_s23, [#allocation5]  }
  0x93   : > { %s4811_s6 = scalar_lea.hbm %s6515_s7, 16 }
  0x94   : > { %p4812_p6 = scmp.ne.s32.totalorder %s6515_s7, %s4811_s6  ;;  %p4818_p2 = scmp.lt.u32.totalorder %s4811_s6, %s6515_s7 }
  0x96   : > { %p4814_p8 = pnand %p4812_p6, %p5034_p7 }
  0x98   : > { %p4815_p9 = pneg %p4814_p8 }
  0x9a   : > { %p4820_p3 = pnand %p4818_p2, %p4815_p9 }
  0x9c   : > { %4823 = shalt.err (!%p4820_p3)
}
  0x9d   : > { %s4824_s20 = scalar_lea.vmem %s500_s22, 16  ;;  %s4831_s23 = scalar_lea.vmem %s500_s22, 32 }
  0x9e   : > { %p4825_p10 = scmp.ne.s32.totalorder %s500_s22, %s4824_s20  ;;  %p4832_p13 = scmp.lt.s32.totalorder %s500_s22, %s500_s22 }
  0x9f   : > { %p4833_p0 = scmp.lt.s32.totalorder %s4831_s23, %s4824_s20 }
  0xa0   : > { %p4827_p11 = pnand %p4825_p10, %p5034_p7 }
  0xa1   : > { %p4834_p1 = por %p4833_p0, %p4832_p13 }
  0xa2   : > { %p4828_p12 = pneg %p4827_p11 }
  0xa4   : > { %p4835_p4 = pnand %p4834_p1, %p4828_p12 }
  0xa6   : > { %4838 = shalt.err (!%p4835_p4)
}
  0xa7   : > { %4531 = dma.hbm_to_vmem [thread:$0]  (!%p5020_p5), %s6515_s7, 16, %s500_s22, [#allocation8]  }
  0xa8   : > { %s4903_s1 = smov [#allocation12]   ;;  %s4839_s12 = scalar_lea.hbm %s6522_s14, 4096 }
  0xa9   : > { %s537_s25 = sshll.u32 %s4903_s1, 4  ;;  %p4840_p6 = scmp.ne.s32.totalorder %s6522_s14, %s4839_s12  ;;  %s538_s25 = int_to_ptr.vmem [resolvable:$true] %s537_s25 }
  0xaa   : > { %p4846_p2 = scmp.lt.u32.totalorder %s4839_s12, %s6522_s14 }
  0xab   : > { %p4842_p8 = pnand %p4840_p6, %p5034_p7 }
  0xad   : > { %p4843_p9 = pneg %p4842_p8 }
  0xaf   : > { %p4848_p3 = pnand %p4846_p2, %p4843_p9 }
  0xb1   : > { %4851 = shalt.err (!%p4848_p3)
}
  0xb2   : > { %s4852_s22 = scalar_lea.vmem %s538_s25, 4096  ;;  %p4860_p13 = scmp.lt.s32.totalorder %s538_s25, %s538_s25 }
  0xb3   : > { %p4853_p10 = scmp.ne.s32.totalorder %s538_s25, %s4852_s22  ;;  %p4861_p0 = scmp.lt.s32.totalorder %s4852_s22, %s4852_s22 }
  0xb5   : > { %p4855_p11 = pnand %p4853_p10, %p5034_p7  ;;  %p4862_p1 = por %p4861_p0, %p4860_p13 }
  0xb7   : > { %p4856_p12 = pneg %p4855_p11 }
  0xb9   : > { %p4863_p4 = pnand %p4862_p1, %p4856_p12 }
  0xbb   : > { %4866 = shalt.err (!%p4863_p4)
}
  0xbc   : > { %s6554_s27 = smov 8   ;;  %s6555_s19 = smov 128  }
  0xbd   : > { %4537 = dma.hbm_to_vmem [thread:$0]  (!%p5020_p5), %s6522_s14, 4096, %s538_s25, [#allocation11], %s6555_s19, %s6555_s19, %s6554_s27  }
  0xbe   : > { %p6556_p6 = scmp.ne.s32.totalorder %s6548_s29, 0 }
  0xc0   : > { %574 = sbr.rel (%p6556_p6) target bundleno = 2122 (0x84a), region = 84 }
  0xc7   : > { %p6557_p7 = scmp.ne.s32.totalorder %s6547_s28, 0 }
  0xc9   : > { %4872 = dma.done.wait (%p6557_p7), [#allocation3], 8192  }
  0xca   : > { %4874 = vsyncadd (%p6557_p7), [#allocation3], 4294959104 }
  0xcb   : > { %4876 = dma.done.wait (%p6557_p7), [#allocation5], 96  }
  0xcc   : > { %4878 = vsyncadd (%p6557_p7), [#allocation5], 4294967200 }
  0xcd   : > { %4880 = dma.done.wait (%p6557_p7), [#allocation8], 4112  }
  0xce   : > { %4882 = vsyncadd (%p6557_p7), [#allocation8], 4294963184 }
  0xcf   : > { %4884 = dma.done.wait (%p6557_p7), [#allocation11], 20480  }
  0xd0   : > { %4886 = vsyncadd (%p6557_p7), [#allocation11], 4294946816  ;;  %v6533_v0 = vmov 0.0   ;;  %v701_v1 = vld [vmem:[#allocation2 + $0x8] sm:$0xff]  ;;  %v700_v3 = vld [vmem:[#allocation2] sm:$0xff]  ;;  %s6558_s28 = sadd.s32 4294967295, %s4889_s24  }
  0xd1   : > { %850 = vmatprep.mubr.f32.mxu0 %v6533_v0  ;;  %1011 = vmatprep.mubr.f32.mxu1 %v6533_v0  ;;  %v705_v2 = vld [vmem:[#allocation2 + $0x28] sm:$0xff]  ;;  %v704_v5 = vld [vmem:[#allocation2 + $0x20] sm:$0xff]  ;;  %v703_v31 = vld [vmem:[#allocation2 + $0x18] sm:$0xff]  ;;  %s5196_s29 = sshll.u32 %s6558_s28, 4  ;;  %s6559_s21 = sld [smem:[#allocation19_spill]]  ;;  %vm2236_vm0 = vcmask 64512  }
  0xd2   : > { %v3928_v4 = vpack.c.bf16 %v705_v2, %v701_v1  ;;  %v709_v6 = vld [vmem:[#allocation2 + $0x48] sm:$0xff]  ;;  %v3930_v8 = vpack.c.bf16 %v704_v5, %v700_v3  ;;  %v708_v10 = vld [vmem:[#allocation2 + $0x40] sm:$0xff]  ;;  %v707_v32 = vld [vmem:[#allocation2 + $0x38] sm:$0xff]  ;;  %p661_p5 = scmp.lt.s32.totalorder %s5196_s29, 31  ;;  %s6565_s15 = sld [smem:[#allocation20_spill]] }
  0xd3   : > { %v713_v7 = vld [vmem:[#allocation2 + $0x68] sm:$0xff]  ;;  %v712_v11 = vld [vmem:[#allocation2 + $0x60] sm:$0xff]  ;;  %v3960_v34 = vpack.c.bf16 %v707_v32, %v703_v31  ;;  %v702_v35 = vld [vmem:[#allocation2 + $0x10] sm:$0xff]  ;;  %s6567_s23 = sld [smem:[#allocation24_spill]]  ;;  %s6569_s30 = sld [smem:[#allocation26_spill]] }
  0xd4   : > { %v3932_v9 = vpack.c.bf16 %v713_v7, %v709_v6  ;;  %v717_v12 = vld [vmem:[#allocation2 + $0x88] sm:$0xff]  ;;  %3929 = vmatprep.subr.bf16.mxu0 %v3928_v4  ;;  %v3934_v14 = vpack.c.bf16 %v712_v11, %v708_v10  ;;  %v716_v16 = vld [vmem:[#allocation2 + $0x80] sm:$0xff]  ;;  %v706_v36 = vld [vmem:[#allocation2 + $0x30] sm:$0xff]  ;;  %s6571_s29 = smov (!%p661_p5, %s5196_s29), 31 }
  0xd5   : > { %v721_v13 = vld [vmem:[#allocation2 + $0xa8] sm:$0xff]  ;;  %3931 = vmatpush1.bf16.msra.mxu0 %v3930_v8  ;;  %v720_v17 = vld [vmem:[#allocation2 + $0xa0] sm:$0xff]  ;;  %v3962_v38 = vpack.c.bf16 %v706_v36, %v702_v35  ;;  %v711_v39 = vld [vmem:[#allocation2 + $0x58] sm:$0xff]  ;;  %3961 = vmatprep.subr.bf16.mxu1 %v3960_v34  ;;  %s5202_s18 = sshll.u32 %s6571_s29, 3  ;;  %s6568_s29 = sld [smem:[#allocation25_spill]] }
  0xd6   : > { %3933 = vmatprep.subr.bf16.mxu0 %v3932_v9  ;;  %v3936_v15 = vpack.c.bf16 %v721_v13, %v717_v12  ;;  %v725_v18 = vld [vmem:[#allocation2 + $0xc8] sm:$0xff]  ;;  %v3938_v20 = vpack.c.bf16 %v720_v17, %v716_v16  ;;  %v724_v22 = vld [vmem:[#allocation2 + $0xc0] sm:$0xff]  ;;  %v715_v40 = vld [vmem:[#allocation2 + $0x78] sm:$0xff]  ;;  %s6015_s26 = scalar_lea.vmem %s6525_s17, %s5202_s18 }
  0xd7   : > { %v729_v19 = vld [vmem:[#allocation2 + $0xe8] sm:$0xff]  ;;  %v728_v23 = vld [vmem:[#allocation2 + $0xe0] sm:$0xff]  ;;  %v3964_v42 = vpack.c.bf16 %v715_v40, %v711_v39  ;;  %v710_v43 = vld [vmem:[#allocation2 + $0x50] sm:$0xff]  ;;  %3963 = vmatpush1.bf16.msra.mxu1 %v3962_v38  ;;  %s5214_s12 = scalar_lea.vmem %s6559_s21, %s5202_s18  ;;  %s4905_s21 = smov 120  }
  0xd8   : > { %v3940_v21 = vpack.c.bf16 %v729_v19, %v725_v18  ;;  %v733_v24 = vld [vmem:[#allocation2 + $0x108] sm:$0xff]  ;;  %v3942_v26 = vpack.c.bf16 %v728_v23, %v724_v22  ;;  %v732_v27 = vld [vmem:[#allocation2 + $0x100] sm:$0xff]  ;;  %v714_v44 = vld [vmem:[#allocation2 + $0x70] sm:$0xff]  ;;  %s6139_s3 = scalar_lea.vmem %s6565_s15, %s5202_s18 }
  0xd9   : > { %3935 = vmatpush1.bf16.msra.mxu0 %v3934_v14  ;;  %v737_v25 = vld [vmem:[#allocation2 + $0x128] sm:$0xff]  ;;  %v736_v28 = vld [vmem:[#allocation2 + $0x120] sm:$0xff]  ;;  %v719_v45 = vld [vmem:[#allocation2 + $0x98] sm:$0xff]  ;;  %v3966_v49 = vpack.c.bf16 %v714_v44, %v710_v43  ;;  %3965 = vmatprep.subr.bf16.mxu1 %v3964_v42  ;;  %s6478_s1 = scalar_lea.vmem %s6569_s30, %s5202_s18 }
  0xda   : > { %3937 = vmatprep.subr.bf16.mxu0 %v3936_v15  ;;  %v3944_v29 = vpack.c.bf16 %v737_v25, %v733_v24  ;;  %v741_v30 = vld [vmem:[#allocation2 + $0x148] sm:$0xff]  ;;  %v740_v37 = vld [vmem:[#allocation2 + $0x140] sm:$0xff]  ;;  %v3946_v41 = vpack.c.bf16 %v736_v28, %v732_v27  ;;  %v723_v50 = vld [vmem:[#allocation2 + $0xb8] sm:$0xff] }
  0xdb   : > { %v745_v33 = vld [vmem:[#allocation2 + $0x168] sm:$0xff]  ;;  %v744_v47 = vld [vmem:[#allocation2 + $0x160] sm:$0xff]  ;;  %v3968_v52 = vpack.c.bf16 %v723_v50, %v719_v45  ;;  %v718_v53 = vld [vmem:[#allocation2 + $0x90] sm:$0xff]  ;;  %3967 = vmatpush1.bf16.msra.mxu1 %v3966_v49 }
  0xdc   : > { %v3948_v46 = vpack.c.bf16 %v745_v33, %v741_v30  ;;  %v749_v48 = vld [vmem:[#allocation2 + $0x188] sm:$0xff]  ;;  %v722_v54 = vld [vmem:[#allocation2 + $0xb0] sm:$0xff]  ;;  %v727_v55 = vld [vmem:[#allocation2 + $0xd8] sm:$0xff]  ;;  %v3950_v57 = vpack.c.bf16 %v744_v47, %v740_v37 }
  0xdd   : > { %3939 = vmatpush1.bf16.msra.mxu0 %v3938_v20  ;;  %v753_v51 = vld [vmem:[#allocation2 + $0x1a8] sm:$0xff]  ;;  %v731_v56 = vld [vmem:[#allocation2 + $0xf8] sm:$0xff]  ;;  %v748_v59 = vld [vmem:[#allocation2 + $0x180] sm:$0xff]  ;;  %v3970_v62 = vpack.c.bf16 %v722_v54, %v718_v53  ;;  %3969 = vmatprep.subr.bf16.mxu1 %v3968_v52 }
  0xde   : > { %3941 = vmatprep.subr.bf16.mxu0 %v3940_v21  ;;  %v3952_v58 = vpack.c.bf16 %v753_v51, %v749_v48  ;;  %v752_v60 = vld [vmem:[#allocation2 + $0x1a0] sm:$0xff]  ;;  %v757_v61 = vld [vmem:[#allocation2 + $0x1c8] sm:$0xff]  ;;  %v3972_v1 = vpack.c.bf16 %v731_v56, %v727_v55  ;;  %v726_v2 = vld [vmem:[#allocation2 + $0xd0] sm:$0xff] }
  0xdf   : > { %v761_v63 = vld [vmem:[#allocation2 + $0x1e8] sm:$0xff]  ;;  %v730_v3 = vld [vmem:[#allocation2 + $0xf0] sm:$0xff]  ;;  %v735_v4 = vld [vmem:[#allocation2 + $0x118] sm:$0xff]  ;;  %v3954_v6 = vpack.c.bf16 %v752_v60, %v748_v59  ;;  %3971 = vmatpush1.bf16.msra.mxu1 %v3970_v62 }
  0xe0   : > { %v739_v5 = vld [vmem:[#allocation2 + $0x138] sm:$0xff]  ;;  %v3956_v7 = vpack.c.bf16 %v761_v63, %v757_v61  ;;  %v756_v8 = vld [vmem:[#allocation2 + $0x1c0] sm:$0xff]  ;;  %v3974_v10 = vpack.c.bf16 %v730_v3, %v726_v2  ;;  %3973 = vmatprep.subr.bf16.mxu1 %v3972_v1  ;;  %v734_v12 = vld [vmem:[#allocation2 + $0x110] sm:$0xff] }
  0xe1   : > { %3943 = vmatpush1.bf16.msra.mxu0 %v3942_v26  ;;  %v760_v9 = vld [vmem:[#allocation2 + $0x1e0] sm:$0xff]  ;;  %v3976_v11 = vpack.c.bf16 %v739_v5, %v735_v4  ;;  %v738_v13 = vld [vmem:[#allocation2 + $0x130] sm:$0xff]  ;;  %v1173_v14 = vld [vmem:[%s6512_s4 + $0x8] sm:$0xff] }
  0xe2   : > { %3945 = vmatprep.subr.bf16.mxu0 %v3944_v29  ;;  %v743_v15 = vld [vmem:[#allocation2 + $0x158] sm:$0xff]  ;;  %v3958_v18 = vpack.c.bf16 %v760_v9, %v756_v8  ;;  %v3978_v19 = vpack.c.bf16 %v738_v13, %v734_v12  ;;  %v742_v20 = vld [vmem:[#allocation2 + $0x150] sm:$0xff]  ;;  %v1172_v22 = vld [vmem:[%s6512_s4] sm:$0xff] }
  0xe3   : > { %v747_v16 = vld [vmem:[#allocation2 + $0x178] sm:$0xff]  ;;  %3975 = vmatpush1.bf16.msra.mxu1 %v3974_v10  ;;  %v1174_v23 = vld [vmem:[%s6512_s4 + $0x10] sm:$0xff]  ;;  %v1177_v26 = vld [vmem:[%s6512_s4 + $0x28] sm:$0xff] }
  0xe4   : > { %v1175_v17 = vld [vmem:[%s6512_s4 + $0x18] sm:$0xff]  ;;  %3977 = vmatprep.subr.bf16.mxu1 %v3976_v11  ;;  %v3980_v24 = vpack.c.bf16 %v747_v16, %v743_v15  ;;  %v746_v25 = vld [vmem:[#allocation2 + $0x170] sm:$0xff]  ;;  %v684_v30 = vld [vmem:[%s5214_s12] sm:$0xff]  ;;  %v3994_v31 = vpack.c.bf16 %v1174_v23, %v1172_v22 }
  0xe5   : > { %3947 = vmatpush1.bf16.msra.mxu0 %v3946_v41  ;;  %v3992_v21 = vpack.c.bf16 %v1175_v17, %v1173_v14  ;;  %v1179_v27 = vld [vmem:[%s6512_s4 + $0x38] sm:$0xff]  ;;  %v3982_v32 = vpack.c.bf16 %v746_v25, %v742_v20  ;;  %v750_v33 = vld [vmem:[#allocation2 + $0x190] sm:$0xff]  ;;  %v1176_v35 = vld [vmem:[%s6512_s4 + $0x20] sm:$0xff] }
  0xe6   : > { %3949 = vmatprep.subr.bf16.mxu0 %v3948_v46  ;;  %v751_v28 = vld [vmem:[#allocation2 + $0x198] sm:$0xff]  ;;  %v3996_v34 = vpack.c.bf16 %v1179_v27, %v1177_v26  ;;  %v1178_v36 = vld [vmem:[%s6512_s4 + $0x30] sm:$0xff]  ;;  %v1181_v39 = vld [vmem:[%s6512_s4 + $0x48] sm:$0xff] }
  0xe7   : > { %v755_v29 = vld [vmem:[#allocation2 + $0x1b8] sm:$0xff]  ;;  %3979 = vmatpush1.bf16.msra.mxu1 %v3978_v19  ;;  %v754_v38 = vld [vmem:[#allocation2 + $0x1b0] sm:$0xff]  ;;  %v685_v43 = vld [vmem:[%s5214_s12 + $0x8] sm:$0xff]  ;;  %v3998_v44 = vpack.c.bf16 %v1178_v36, %v1176_v35 }
  0xe8   : > { %3981 = vmatprep.subr.bf16.mxu1 %v3980_v24  ;;  %v3984_v37 = vpack.c.bf16 %v755_v29, %v751_v28  ;;  %v1183_v40 = vld [vmem:[%s6512_s4 + $0x58] sm:$0xff]  ;;  %v3986_v45 = vpack.c.bf16 %v754_v38, %v750_v33  ;;  %v758_v46 = vld [vmem:[#allocation2 + $0x1d0] sm:$0xff]  ;;  %v1180_v48 = vld [vmem:[%s6512_s4 + $0x40] sm:$0xff] }
  0xe9   : > { %3951 = vmatpush1.bf16.msra.mxu0 %v3950_v57  ;;  %v759_v41 = vld [vmem:[#allocation2 + $0x1d8] sm:$0xff]  ;;  %v4000_v47 = vpack.c.bf16 %v1183_v40, %v1181_v39  ;;  %v1182_v49 = vld [vmem:[%s6512_s4 + $0x50] sm:$0xff]  ;;  %v1185_v52 = vld [vmem:[%s6512_s4 + $0x68] sm:$0xff] }
  0xea   : > { %3953 = vmatprep.subr.bf16.mxu0 %v3952_v58  ;;  %v763_v42 = vld [vmem:[#allocation2 + $0x1f8] sm:$0xff]  ;;  %v762_v51 = vld [vmem:[#allocation2 + $0x1f0] sm:$0xff]  ;;  %v4002_v55 = vpack.c.bf16 %v1182_v49, %v1180_v48  ;;  %v1184_v58 = vld [vmem:[%s6512_s4 + $0x60] sm:$0xff] }
  0xeb   : > { %3983 = vmatpush1.bf16.msra.mxu1 %v3982_v32  ;;  %v3988_v50 = vpack.c.bf16 %v763_v42, %v759_v41  ;;  %v1187_v53 = vld [vmem:[%s6512_s4 + $0x78] sm:$0xff]  ;;  %v686_v54 = vld [vmem:[%s5214_s12 + $0x10] sm:$0xff]  ;;  %v3990_v56 = vpack.c.bf16 %v762_v51, %v758_v46  ;;  %v1189_v60 = vld [vmem:[%s6512_s4 + $0x88] sm:$0xff] }
  0xec   : > { %3985 = vmatprep.subr.bf16.mxu1 %v3984_v37  ;;  %v4004_v57 = vpack.c.bf16 %v1187_v53, %v1185_v52  ;;  %v1186_v59 = vld [vmem:[%s6512_s4 + $0x70] sm:$0xff]  ;;  %v1191_v61 = vld [vmem:[%s6512_s4 + $0x98] sm:$0xff]  ;;  %v1188_v2 = vld [vmem:[%s6512_s4 + $0x80] sm:$0xff] }
  0xed   : > { %3955 = vmatpush1.bf16.msra.mxu0 %v3954_v6  ;;  %v687_v62 = vld [vmem:[%s5214_s12 + $0x18] sm:$0xff]  ;;  %v4006_v63 = vpack.c.bf16 %v1186_v59, %v1184_v58  ;;  %v4008_v1 = vpack.c.bf16 %v1191_v61, %v1189_v60  ;;  %v1190_v3 = vld [vmem:[%s6512_s4 + $0x90] sm:$0xff]  ;;  %v1193_v4 = vld [vmem:[%s6512_s4 + $0xa8] sm:$0xff] }
  0xee   : > { %3957 = vmatprep.subr.bf16.mxu0 %v3956_v7  ;;  %v1195_v5 = vld [vmem:[%s6512_s4 + $0xb8] sm:$0xff]  ;;  %v688_v6 = vld [vmem:[%s5214_s12 + $0x20] sm:$0xff]  ;;  %v4010_v7 = vpack.c.bf16 %v1190_v3, %v1188_v2  ;;  %v1194_v10 = vld [vmem:[%s6512_s4 + $0xb0] sm:$0xff] }
  0xef   : > { %3987 = vmatpush1.bf16.msra.mxu1 %v3986_v45  ;;  %v4012_v8 = vpack.c.bf16 %v1195_v5, %v1193_v4  ;;  %v1192_v9 = vld [vmem:[%s6512_s4 + $0xa0] sm:$0xff]  ;;  %v1197_v11 = vld [vmem:[%s6512_s4 + $0xc8] sm:$0xff]  ;;  %v1199_v12 = vld [vmem:[%s6512_s4 + $0xd8] sm:$0xff] }
  0xf0   : > { %3989 = vmatprep.subr.bf16.mxu1 %v3988_v50  ;;  %v689_v13 = vld [vmem:[%s5214_s12 + $0x28] sm:$0xff]  ;;  %v4014_v14 = vpack.c.bf16 %v1194_v10, %v1192_v9  ;;  %v4016_v15 = vpack.c.bf16 %v1199_v12, %v1197_v11  ;;  %v1196_v16 = vld [vmem:[%s6512_s4 + $0xc0] sm:$0xff]  ;;  %v1198_v17 = vld [vmem:[%s6512_s4 + $0xd0] sm:$0xff] }
  0xf1   : > { %3959 = vmatpush1.bf16.msra.mxu0 %v3958_v18  ;;  %v1201_v18 = vld [vmem:[%s6512_s4 + $0xe8] sm:$0xff]  ;;  %v1203_v19 = vld [vmem:[%s6512_s4 + $0xf8] sm:$0xff]  ;;  %v690_v20 = vld [vmem:[%s5214_s12 + $0x30] sm:$0xff] }
  0xf2   : > { %3993 = vmatprep.subr.bf16.mxu0 %v3992_v21  ;;  %v4018_v21 = vpack.c.bf16 %v1198_v17, %v1196_v16  ;;  %v4020_v22 = vpack.c.bf16 %v1203_v19, %v1201_v18  ;;  %v1200_v23 = vld [vmem:[%s6512_s4 + $0xe0] sm:$0xff]  ;;  %v1202_v24 = vld [vmem:[%s6512_s4 + $0xf0] sm:$0xff]  ;;  %v1205_v25 = vld [vmem:[%s6512_s4 + $0x108] sm:$0xff] }
  0xf3   : > { %3991 = vmatpush1.bf16.msra.mxu1 %v3990_v56  ;;  %v1207_v26 = vld [vmem:[%s6512_s4 + $0x118] sm:$0xff]  ;;  %v4022_v28 = vpack.c.bf16 %v1202_v24, %v1200_v23  ;;  %v1209_v32 = vld [vmem:[%s6512_s4 + $0x128] sm:$0xff]  ;;  %v1208_v37 = vld [vmem:[%s6512_s4 + $0x120] sm:$0xff]  ;;  %v766_v23 = vlaneseq }
  0xf4   : > { %851 = vmatmul.mubr.f32.vlgmr.msra.gmra.mrb[0].mxu0 %v684_v30  ;;  %v691_v27 = vld [vmem:[%s5214_s12 + $0x38] sm:$0xff]  ;;  %v4024_v29 = vpack.c.bf16 %v1207_v26, %v1205_v25  ;;  %v1210_v38 = vld [vmem:[%s6512_s4 + $0x130] sm:$0xff]  ;;  %v1213_v39 = vld [vmem:[%s6512_s4 + $0x148] sm:$0xff] }
  0xf5   : > { %856 = vmatprep.mubr.f32.mxu0 %v6533_v0  ;;  %3995 = vmatpush1.bf16.msra.mxu0 %v3994_v31  ;;  %v1206_v31 = vld [vmem:[%s6512_s4 + $0x110] sm:$0xff]  ;;  %v1211_v33 = vld [vmem:[%s6512_s4 + $0x138] sm:$0xff]  ;;  %v693_v41 = vld [vmem:[%s5214_s12 + $0x48] sm:$0xff]  ;;  %v4030_v42 = vpack.c.bf16 %v1210_v38, %v1208_v37  ;;  %v5454_v24 = vshrl.u32 %v766_v23, 7 }
  0xf6   : > { %3997 = vmatprep.subr.bf16.mxu0 %v3996_v34  ;;  %1012 = vmatmul.mubr.f32.vlgmr.msra.gmra.mrb[0].mxu1 %v684_v30  ;;  %v1204_v30 = vld [vmem:[%s6512_s4 + $0x100] sm:$0xff]  ;;  %v4028_v36 = vpack.c.bf16 %v1211_v33, %v1209_v32  ;;  %v1215_v40 = vld [vmem:[%s6512_s4 + $0x158] sm:$0xff]  ;;  %v1214_v45 = vld [vmem:[%s6512_s4 + $0x150] sm:$0xff] }
  0xf7   : > { %1017 = vmatprep.mubr.f32.mxu1 %v6533_v0  ;;  %v692_v34 = vld [vmem:[%s5214_s12 + $0x40] sm:$0xff]  ;;  %v4026_v35 = vpack.c.bf16 %v1206_v31, %v1204_v30  ;;  %v1217_v46 = vld [vmem:[%s6512_s4 + $0x168] sm:$0xff]  ;;  %v694_v48 = vld [vmem:[%s5214_s12 + $0x50] sm:$0xff]  ;;  %v5457_v25 = vsub.s32 0, %v5454_v24 }
  0xf8   : > { %857 = vmatmul.mubr.f32.gmra.mrb[2].mxu0 %v685_v43  ;;  %v1216_v51 = vld [vmem:[%s6512_s4 + $0x160] sm:$0xff]  ;;  %v1218_v52 = vld [vmem:[%s6512_s4 + $0x170] sm:$0xff]  ;;  %v1221_v53 = vld [vmem:[%s6512_s4 + $0x188] sm:$0xff] }
  0xf9   : > { %862 = vmatprep.mubr.f32.mxu0 %v6533_v0  ;;  %3999 = vmatpush1.bf16.msra.mxu0 %v3998_v44  ;;  %v1212_v44 = vld [vmem:[%s6512_s4 + $0x140] sm:$0xff]  ;;  %v4038_v56 = vpack.c.bf16 %v1218_v52, %v1216_v51  ;;  %v1222_v59 = vld [vmem:[%s6512_s4 + $0x190] sm:$0xff]  ;;  %v1225_v60 = vld [vmem:[%s6512_s4 + $0x1a8] sm:$0xff]  ;;  %6560 = vst [vmem:[#allocation17_spill] sm:$0xff] %v5457_v25 }
  0xfa   : > { %4001 = vmatprep.subr.bf16.mxu0 %v4000_v47  ;;  %1018 = vmatmul.mubr.f32.gmra.mrb[2].mxu1 %v685_v43  ;;  %v4032_v43 = vpack.c.bf16 %v1215_v40, %v1213_v39  ;;  %v1219_v47 = vld [vmem:[%s6512_s4 + $0x178] sm:$0xff]  ;;  %v4034_v49 = vpack.c.bf16 %v1214_v45, %v1212_v44  ;;  %v1220_v58 = vld [vmem:[%s6512_s4 + $0x180] sm:$0xff]  ;;  %v1226_v3 = vld [vmem:[%s6512_s4 + $0x1b0] sm:$0xff] }
  0xfb   : > { %1023 = vmatprep.mubr.f32.mxu1 %v6533_v0  ;;  %v4036_v50 = vpack.c.bf16 %v1219_v47, %v1217_v46  ;;  %v1227_v61 = vld [vmem:[%s6512_s4 + $0x1b8] sm:$0xff]  ;;  %v1224_v2 = vld [vmem:[%s6512_s4 + $0x1a0] sm:$0xff]  ;;  %v1229_v4 = vld [vmem:[%s6512_s4 + $0x1c8] sm:$0xff] }
  0xfc   : > { %863 = vmatmul.mubr.f32.gmra.mrb[4].mxu0 %v686_v54  ;;  %v1231_v5 = vld [vmem:[%s6512_s4 + $0x1d8] sm:$0xff]  ;;  %v1228_v9 = vld [vmem:[%s6512_s4 + $0x1c0] sm:$0xff]  ;;  %v1230_v10 = vld [vmem:[%s6512_s4 + $0x1d0] sm:$0xff] }
  0xfd   : > { %868 = vmatprep.mubr.f32.mxu0 %v6533_v0  ;;  %4003 = vmatpush1.bf16.msra.mxu0 %v4002_v55  ;;  %v695_v55 = vld [vmem:[%s5214_s12 + $0x58] sm:$0xff]  ;;  %v698_v11 = vld [vmem:[%s5214_s12 + $0x70] sm:$0xff]  ;;  %v4050_v12 = vpack.c.bf16 %v1230_v10, %v1228_v9  ;;  %v1232_v17 = vld [vmem:[%s6512_s4 + $0x1e0] sm:$0xff] }
  0xfe   : > { %4005 = vmatprep.subr.bf16.mxu0 %v4004_v57  ;;  %1024 = vmatmul.mubr.f32.gmra.mrb[4].mxu1 %v686_v54  ;;  %v1223_v54 = vld [vmem:[%s6512_s4 + $0x198] sm:$0xff]  ;;  %v1234_v18 = vld [vmem:[%s6512_s4 + $0x1f0] sm:$0xff]  ;;  %v5459_v26 = vld [vmem:[#allocation4] sm:$0xf] }
  0xff   : > { %1029 = vmatprep.mubr.f32.mxu1 %v6533_v0  ;;  %v4040_v57 = vpack.c.bf16 %v1223_v54, %v1221_v53  ;;  %v4054_v19 = vpack.c.bf16 %v1234_v18, %v1232_v17  ;;  %v1236_v33 = vld [vmem:[%s6512_s4 + $0x200] sm:$0xff]  ;;  %v1243_v37 = vld [vmem:[%s6512_s4 + $0x238] sm:$0xff]  ;;  %v1683_v39 = vld [vmem:[#allocation7 + $0x88] sm:$0xff] }
 0x100   : > { %869 = vmatmul.mubr.f32.gmra.mrb[6].mxu0 %v687_v62  ;;  %v1682_v38 = vld [vmem:[#allocation7 + $0x80] sm:$0xff]  ;;  %v1667_v45 = vld [vmem:[#allocation7 + $0x8] sm:$0xff]  ;;  %v1684_v46 = vld [vmem:[#allocation7 + $0x90] sm:$0xff] }
 0x101   : > { %874 = vmatprep.mubr.f32.mxu0 %v6533_v0  ;;  %4007 = vmatpush1.bf16.msra.mxu0 %v4006_v63  ;;  %v4042_v63 = vpack.c.bf16 %v1222_v59, %v1220_v58  ;;  %v1666_v40 = vld [vmem:[#allocation7] sm:$0xff]  ;;  %v5486_v44 = vpack.c.bf16 %v1683_v39, %v1682_v38  ;;  %v1685_v47 = vld [vmem:[#allocation7 + $0x98] sm:$0xff]  ;;  %v1242_v53 = vld [vmem:[%s6512_s4 + $0x230] sm:$0xff] }
 0x102   : > { %4009 = vmatprep.subr.bf16.mxu0 %v4008_v1  ;;  %1030 = vmatmul.mubr.f32.gmra.mrb[6].mxu1 %v687_v62  ;;  %v696_v62 = vld [vmem:[%s5214_s12 + $0x60] sm:$0xff]  ;;  %v4044_v1 = vpack.c.bf16 %v1227_v61, %v1225_v60  ;;  %v1245_v54 = vld [vmem:[%s6512_s4 + $0x248] sm:$0xff]  ;;  %v5504_v58 = vpack.c.bf16 %v1685_v47, %v1684_v46  ;;  %v1668_v59 = vld [vmem:[#allocation7 + $0x10] sm:$0xff] }
 0x103   : > { %1035 = vmatprep.mubr.f32.mxu1 %v6533_v0  ;;  %v1240_v52 = vld [vmem:[%s6512_s4 + $0x220] sm:$0xff]  ;;  %4344 = vmatprep.subr.bf16.mxu1 %v5486_v44  ;;  %v1249_v9 = vld [vmem:[%s6512_s4 + $0x268] sm:$0xff] }
 0x104   : > { %875 = vmatmul.mubr.f32.gmra.mrb[8].mxu0 %v688_v6  ;;  %v1669_v60 = vld [vmem:[#allocation7 + $0x18] sm:$0xff]  ;;  %v1686_v61 = vld [vmem:[#allocation7 + $0xa0] sm:$0xff] }
 0x105   : > { %880 = vmatprep.mubr.f32.mxu0 %v6533_v0  ;;  %4011 = vmatpush1.bf16.msra.mxu0 %v4010_v7  ;;  %v4046_v7 = vpack.c.bf16 %v1226_v3, %v1224_v2  ;;  %v4062_v2 = vpack.c.bf16 %v1242_v53, %v1240_v52  ;;  %v5519_v10 = vpack.c.bf16 %v1669_v60, %v1668_v59  ;;  %v1689_v17 = vld [vmem:[#allocation7 + $0xb8] sm:$0xff]  ;;  %v1254_v53 = vld [vmem:[%s6512_s4 + $0x290] sm:$0xff] }
 0x106   : > { %4013 = vmatprep.subr.bf16.mxu0 %v4012_v8  ;;  %1036 = vmatmul.mubr.f32.gmra.mrb[8].mxu1 %v688_v6  ;;  %v697_v6 = vld [vmem:[%s5214_s12 + $0x68] sm:$0xff]  ;;  %v4048_v8 = vpack.c.bf16 %v1231_v5, %v1229_v4  ;;  %v1252_v52 = vld [vmem:[%s6512_s4 + $0x280] sm:$0xff]  ;;  %v1259_v60 = vld [vmem:[%s6512_s4 + $0x2b8] sm:$0xff] }
 0x107   : > { %1041 = vmatprep.mubr.f32.mxu1 %v6533_v0 }
 0x108   : > { %881 = vmatmul.mubr.f32.gmra.mrb[10].mxu0 %v689_v13 }
 0x109   : > { %886 = vmatprep.mubr.f32.mxu0 %v6533_v0  ;;  %4015 = vmatpush1.bf16.msra.mxu0 %v4014_v14  ;;  %v1233_v14 = vld [vmem:[%s6512_s4 + $0x1e8] sm:$0xff] }
 0x10a   : > { %4017 = vmatprep.subr.bf16.mxu0 %v4016_v15  ;;  %1042 = vmatmul.mubr.f32.gmra.mrb[10].mxu1 %v689_v13  ;;  %v699_v13 = vld [vmem:[%s5214_s12 + $0x78] sm:$0xff] }
 0x10b   : > { %1047 = vmatprep.mubr.f32.mxu1 %v6533_v0  ;;  %v1235_v15 = vld [vmem:[%s6512_s4 + $0x1f8] sm:$0xff] }
 0x10c   : > { %887 = vmatmul.mubr.f32.gmra.mrb[12].mxu0 %v690_v20  ;;  %v4052_v16 = vpack.c.bf16 %v1235_v15, %v1233_v14  ;;  %v1670_v14 = vld [vmem:[#allocation7 + $0x20] sm:$0xff]  ;;  %v1671_v15 = vld [vmem:[#allocation7 + $0x28] sm:$0xff] }
 0x10d   : > { %892 = vmatprep.mubr.f32.mxu0 %v6533_v0  ;;  %4019 = vmatpush1.bf16.msra.mxu0 %v4018_v21  ;;  %v1239_v21 = vld [vmem:[%s6512_s4 + $0x218] sm:$0xff] }
 0x10e   : > { %4021 = vmatprep.subr.bf16.mxu0 %v4020_v22  ;;  %1048 = vmatmul.mubr.f32.gmra.mrb[12].mxu1 %v690_v20  ;;  %v1237_v20 = vld [vmem:[%s6512_s4 + $0x208] sm:$0xff] }
 0x10f   : > { %1053 = vmatprep.mubr.f32.mxu1 %v6533_v0  ;;  %v4056_v22 = vpack.c.bf16 %v1239_v21, %v1237_v20 }
 0x110   : > { %893 = vmatmul.mubr.f32.gmra.mrb[14].mxu0 %v691_v27 }
 0x111   : > { %898 = vmatprep.mubr.f32.mxu0 %v6533_v0  ;;  %4023 = vmatpush1.bf16.msra.mxu0 %v4022_v28  ;;  %v5466_v28 = vrot.slane %v5459_v26, %v5457_v25 }
 0x112   : > { %4025 = vmatprep.subr.bf16.mxu0 %v4024_v29  ;;  %1054 = vmatmul.mubr.f32.gmra.mrb[14].mxu1 %v691_v27  ;;  %v5462_v27 = vsub.s32 1, %v5454_v24 }
 0x113   : > { %1059 = vmatprep.mubr.f32.mxu1 %v6533_v0 }
 0x114   : > { %899 = vmatmul.mubr.f32.gmra.mrb[16].mxu0 %v692_v34  ;;  %6561 = vst [vmem:[#allocation18_spill] sm:$0xff] %v5462_v27  ;;  %v5470_v29 = vrot.slane %v5459_v26, %v5462_v27 }
 0x115   : > { %904 = vmatprep.mubr.f32.mxu0 %v6533_v0  ;;  %4027 = vmatpush1.bf16.msra.mxu0 %v4026_v35 }
 0x116   : > { %4029 = vmatprep.subr.bf16.mxu0 %v4028_v36  ;;  %1060 = vmatmul.mubr.f32.gmra.mrb[16].mxu1 %v692_v34  ;;  %v1238_v34 = vld [vmem:[%s6512_s4 + $0x210] sm:$0xff]  ;;  %v1241_v36 = vld [vmem:[%s6512_s4 + $0x228] sm:$0xff] }
 0x117   : > { %1065 = vmatprep.mubr.f32.mxu1 %v6533_v0  ;;  %v4060_v51 = vpack.c.bf16 %v1243_v37, %v1241_v36  ;;  %v1255_v37 = vld [vmem:[%s6512_s4 + $0x298] sm:$0xff] }
 0x118   : > { %905 = vmatmul.mubr.f32.gmra.mrb[18].mxu0 %v693_v41 }
 0x119   : > { %910 = vmatprep.mubr.f32.mxu0 %v6533_v0  ;;  %4031 = vmatpush1.bf16.msra.mxu0 %v4030_v42 }
 0x11a   : > { %4033 = vmatprep.subr.bf16.mxu0 %v4032_v43  ;;  %1066 = vmatmul.mubr.f32.gmra.mrb[18].mxu1 %v693_v41  ;;  %v4058_v43 = vpack.c.bf16 %v1238_v34, %v1236_v33  ;;  %v1253_v33 = vld [vmem:[%s6512_s4 + $0x288] sm:$0xff] }
 0x11b   : > { %1071 = vmatprep.mubr.f32.mxu1 %v6533_v0 }
 0x11c   : > { %911 = vmatmul.mubr.f32.gmra.mrb[20].mxu0 %v694_v48 }
 0x11d   : > { %916 = vmatprep.mubr.f32.mxu0 %v6533_v0  ;;  %4035 = vmatpush1.bf16.msra.mxu0 %v4034_v49 }
 0x11e   : > { %4037 = vmatprep.subr.bf16.mxu0 %v4036_v50  ;;  %1072 = vmatmul.mubr.f32.gmra.mrb[20].mxu1 %v694_v48 }
 0x11f   : > { %1077 = vmatprep.mubr.f32.mxu1 %v6533_v0 }
 0x120   : > { %917 = vmatmul.mubr.f32.gmra.mrb[22].mxu0 %v695_v55 }
 0x121   : > { %922 = vmatprep.mubr.f32.mxu0 %v6533_v0  ;;  %4039 = vmatpush1.bf16.msra.mxu0 %v4038_v56 }
 0x122   : > { %4041 = vmatprep.subr.bf16.mxu0 %v4040_v57  ;;  %1078 = vmatmul.mubr.f32.gmra.mrb[22].mxu1 %v695_v55  ;;  %v5498_v55 = vpack.c.bf16 %v1667_v45, %v1666_v40  ;;  %v1247_v57 = vld [vmem:[%s6512_s4 + $0x258] sm:$0xff] }
 0x123   : > { %1083 = vmatprep.mubr.f32.mxu1 %v6533_v0  ;;  %v1672_v40 = vld [vmem:[#allocation7 + $0x30] sm:$0xff] }
 0x124   : > { %923 = vmatmul.mubr.f32.gmra.mrb[24].mxu0 %v696_v62  ;;  %4352 = vmatpush3.bf16.msra.mxu1 %v5498_v55 }
 0x125   : > { %928 = vmatprep.mubr.f32.mxu0 %v6533_v0  ;;  %4043 = vmatpush1.bf16.msra.mxu0 %v4042_v63 }
 0x126   : > { %4045 = vmatprep.subr.bf16.mxu0 %v4044_v1  ;;  %1084 = vmatmul.mubr.f32.gmra.mrb[24].mxu1 %v696_v62  ;;  %v1687_v62 = vld [vmem:[#allocation7 + $0xa8] sm:$0xff] }
 0x127   : > { %1089 = vmatprep.mubr.f32.mxu1 %v6533_v0  ;;  %4345 = vmatprep.subr.bf16.mxu1 %v5504_v58 }
 0x128   : > { %929 = vmatmul.mubr.f32.gmra.mrb[26].mxu0 %v697_v6  ;;  %4353 = vmatpush3.bf16.msra.mxu1 %v5519_v10 }
 0x129   : > { %934 = vmatprep.mubr.f32.mxu0 %v6533_v0  ;;  %4047 = vmatpush1.bf16.msra.mxu0 %v4046_v7  ;;  %v1244_v7 = vld [vmem:[%s6512_s4 + $0x240] sm:$0xff] }
 0x12a   : > { %4049 = vmatprep.subr.bf16.mxu0 %v4048_v8  ;;  %1090 = vmatmul.mubr.f32.gmra.mrb[26].mxu1 %v697_v6  ;;  %v4064_v6 = vpack.c.bf16 %v1247_v57, %v1245_v54  ;;  %v1246_v8 = vld [vmem:[%s6512_s4 + $0x250] sm:$0xff]  ;;  %v1257_v54 = vld [vmem:[%s6512_s4 + $0x2a8] sm:$0xff] }
 0x12b   : > { %1095 = vmatprep.mubr.f32.mxu1 %v6533_v0  ;;  %v4066_v20 = vpack.c.bf16 %v1246_v8, %v1244_v7 }
 0x12c   : > { %935 = vmatmul.mubr.f32.gmra.mrb[28].mxu0 %v698_v11 }
 0x12d   : > { %940 = vmatprep.mubr.f32.mxu0 %v6533_v0  ;;  %4051 = vmatpush1.bf16.msra.mxu0 %v4050_v12  ;;  %v1251_v12 = vld [vmem:[%s6512_s4 + $0x278] sm:$0xff] }
 0x12e   : > { %1096 = vmatmul.mubr.f32.gmra.mrb[28].mxu1 %v698_v11  ;;  %4053 = vmatprep.subr.bf16.mxu0 %v4052_v16  ;;  %v1688_v16 = vld [vmem:[#allocation7 + $0xb0] sm:$0xff] }
 0x12f   : > { %1101 = vmatprep.mubr.f32.mxu1 %v6533_v0  ;;  %v5549_v39 = vpack.c.bf16 %v1689_v17, %v1688_v16 }
 0x130   : > { %941 = vmatmul.mubr.f32.gmra.mrb[30].mxu0 %v699_v13 }
 0x131   : > { %4055 = vmatpush1.bf16.msra.mxu0 %v4054_v19 }
 0x132   : > { %1102 = vmatmul.mubr.f32.gmra.mrb[30].mxu1 %v699_v13  ;;  %4057 = vmatprep.subr.bf16.mxu0 %v4056_v22  ;;  %v5525_v13 = vpack.c.bf16 %v1687_v62, %v1686_v61 }
 0x134   : > { %4346 = vmatprep.subr.bf16.mxu1 %v5525_v13 }
 0x1c7   : > { %v852_v30 = vpop.f32.mrb[0].mxu0 }
 0x1c8   : > { %v853_v31 = vadd.f32 %v852_v30, %v5466_v28  ;;  %v854_v32 = vpop.f32.mrb[1].mxu0  ;;  %v4068_v30 = vpack.c.bf16 %v1251_v12, %v1249_v9  ;;  %v1256_v12 = vld [vmem:[%s6512_s4 + $0x2a0] sm:$0xff] }
 0x1c9   : > { %v855_v35 = vadd.f32 %v854_v32, %v5470_v29  ;;  %v1250_v32 = vld [vmem:[%s6512_s4 + $0x270] sm:$0xff]  ;;  %v5539_v34 = vpop.f32.mrb[0].mxu1 }
 0x1ca   : > { %v1108_v48 = vmax.f32 %v853_v31, 0.0  ;;  %v1248_v31 = vld [vmem:[%s6512_s4 + $0x260] sm:$0xff]  ;;  %v5547_v38 = vpop.f32.mrb[1].mxu1 }
 0x1cb   : > { %v1109_v41 = vmax.f32 %v855_v35, 0.0  ;;  %v858_v42 = vpop.f32.mrb[2].mxu0  ;;  %v5541_v35 = vpack.c.bf16 %v1671_v15, %v1670_v14  ;;  %v4070_v47 = vpack.c.bf16 %v1250_v32, %v1248_v31  ;;  %v1258_v14 = vld [vmem:[%s6512_s4 + $0x2b0] sm:$0xff]  ;;  %v1261_v15 = vld [vmem:[%s6512_s4 + $0x2c8] sm:$0xff] }
 0x1cc   : > { %v859_v49 = vadd.f32 %v858_v42, %v5466_v28  ;;  %v860_v50 = vpop.f32.mrb[3].mxu0  ;;  %v1690_v42 = vld [vmem:[#allocation7 + $0xc0] sm:$0xff]  ;;  %v1695_v31 = vld [vmem:[#allocation7 + $0xe8] sm:$0xff] }
 0x1cd   : > { %v861_v56 = vadd.f32 %v860_v50, %v5470_v29  ;;  %1376 = vmatprep.mubr.f32.mxu0 %v1109_v41  ;;  %v1673_v41 = vld [vmem:[#allocation7 + $0x38] sm:$0xff]  ;;  %4354 = vmatpush3.bf16.msra.mxu1 %v5541_v35 }
 0x1ce   : > { %1377 = vmatmul.mubr.f32.vlgmr.msra.gmra.mrb[32].mxu0 %v1108_v48  ;;  %v1112_v3 = vmax.f32 %v859_v49, 0.0  ;;  %4347 = vmatprep.subr.bf16.mxu1 %v5549_v39  ;;  %v5565_v57 = vpack.c.bf16 %v1673_v41, %v1672_v40 }
 0x1cf   : > { %v1113_v63 = vmax.f32 %v861_v56, 0.0  ;;  %4059 = vmatpush1.bf16.msra.mxu0 %v4058_v43  ;;  %v864_v1 = vpop.f32.mrb[4].mxu0  ;;  %v1691_v43 = vld [vmem:[#allocation7 + $0xc8] sm:$0xff]  ;;  %v5563_v56 = vpop.f32.mrb[2].mxu1 }
 0x1d0   : > { %v865_v4 = vadd.f32 %v864_v1, %v5466_v28  ;;  %v866_v5 = vpop.f32.mrb[5].mxu0  ;;  %4061 = vmatprep.subr.bf16.mxu0 %v4060_v51  ;;  %v4072_v51 = vpack.c.bf16 %v1255_v37, %v1253_v33  ;;  %v5571_v61 = vpop.f32.mrb[3].mxu1  ;;  %v5573_v62 = vpack.c.bf16 %v1691_v43, %v1690_v42  ;;  %v1675_v1 = vld [vmem:[#allocation7 + $0x48] sm:$0xff]  ;;  %v1260_v43 = vld [vmem:[%s6512_s4 + $0x2c0] sm:$0xff] }
 0x1d1   : > { %v867_v11 = vadd.f32 %v866_v5, %v5470_v29  ;;  %1382 = vmatprep.mubr.f32.mxu0 %v1113_v63  ;;  %v1674_v63 = vld [vmem:[#allocation7 + $0x40] sm:$0xff]  ;;  %4355 = vmatpush3.bf16.msra.mxu1 %v5565_v57  ;;  %v5587_v16 = vpop.f32.mrb[4].mxu1 }
 0x1d2   : > { %1383 = vmatmul.mubr.f32.gmra.mrb[34].mxu0 %v1112_v3  ;;  %v1116_v21 = vmax.f32 %v865_v4, 0.0  ;;  %v1693_v3 = vld [vmem:[#allocation7 + $0xd8] sm:$0xff]  ;;  %4348 = vmatprep.subr.bf16.mxu1 %v5573_v62  ;;  %v5589_v17 = vpack.c.bf16 %v1675_v1, %v1674_v63 }
 0x1d3   : > { %v1117_v18 = vmax.f32 %v867_v11, 0.0  ;;  %4063 = vmatpush1.bf16.msra.mxu0 %v4062_v2  ;;  %v870_v19 = vpop.f32.mrb[6].mxu0  ;;  %v1692_v2 = vld [vmem:[#allocation7 + $0xd0] sm:$0xff]  ;;  %v4076_v11 = vpack.c.bf16 %v1259_v60, %v1257_v54  ;;  %v1679_v54 = vld [vmem:[#allocation7 + $0x68] sm:$0xff]  ;;  %v1697_v60 = vld [vmem:[#allocation7 + $0xf8] sm:$0xff] }
 0x1d4   : > { %v871_v22 = vadd.f32 %v870_v19, %v5466_v28  ;;  %v872_v23 = vpop.f32.mrb[7].mxu0  ;;  %4065 = vmatprep.subr.bf16.mxu0 %v4064_v6  ;;  %v4074_v6 = vpack.c.bf16 %v1254_v53, %v1252_v52  ;;  %v1263_v19 = vld [vmem:[%s6512_s4 + $0x2d8] sm:$0xff]  ;;  %v1678_v53 = vld [vmem:[#allocation7 + $0x60] sm:$0xff] }
 0x1d5   : > { %v873_v36 = vadd.f32 %v872_v23, %v5470_v29  ;;  %1388 = vmatprep.mubr.f32.mxu0 %v1117_v18  ;;  %v1677_v23 = vld [vmem:[#allocation7 + $0x58] sm:$0xff]  ;;  %4356 = vmatpush3.bf16.msra.mxu1 %v5589_v17  ;;  %v4080_v42 = vpack.c.bf16 %v1263_v19, %v1261_v15 }
 0x1d6   : > { %1389 = vmatmul.mubr.f32.gmra.mrb[36].mxu0 %v1116_v21  ;;  %v1120_v48 = vmax.f32 %v871_v22, 0.0  ;;  %v5597_v21 = vpack.c.bf16 %v1693_v3, %v1692_v2  ;;  %v1676_v22 = vld [vmem:[#allocation7 + $0x50] sm:$0xff] }
 0x1d7   : > { %v1121_v45 = vmax.f32 %v873_v36, 0.0  ;;  %4067 = vmatpush1.bf16.msra.mxu0 %v4066_v20  ;;  %v876_v46 = vpop.f32.mrb[8].mxu0  ;;  %v5595_v20 = vpop.f32.mrb[5].mxu1  ;;  %v4078_v36 = vpack.c.bf16 %v1258_v14, %v1256_v12  ;;  %v5637_v12 = vpack.c.bf16 %v1679_v54, %v1678_v53  ;;  %v1271_v15 = vld [vmem:[%s6512_s4 + $0x318] sm:$0xff] }
 0x1d8   : > { %v877_v49 = vadd.f32 %v876_v46, %v5466_v28  ;;  %v878_v50 = vpop.f32.mrb[9].mxu0  ;;  %4069 = vmatprep.subr.bf16.mxu0 %v4068_v30  ;;  %v1694_v30 = vld [vmem:[#allocation7 + $0xe0] sm:$0xff]  ;;  %4349 = vmatprep.subr.bf16.mxu1 %v5597_v21 }
 0x1d9   : > { %v879_v59 = vadd.f32 %v878_v50, %v5470_v29  ;;  %1394 = vmatprep.mubr.f32.mxu0 %v1121_v45  ;;  %v1262_v45 = vld [vmem:[%s6512_s4 + $0x2d0] sm:$0xff]  ;;  %v1265_v46 = vld [vmem:[%s6512_s4 + $0x2e8] sm:$0xff]  ;;  %v1267_v50 = vld [vmem:[%s6512_s4 + $0x2f8] sm:$0xff]  ;;  %v5621_v52 = vpack.c.bf16 %v1695_v31, %v1694_v30 }
 0x1da   : > { %1395 = vmatmul.mubr.f32.gmra.mrb[38].mxu0 %v1120_v48  ;;  %v1124_v7 = vmax.f32 %v877_v49, 0.0  ;;  %v5613_v48 = vpack.c.bf16 %v1677_v23, %v1676_v22  ;;  %v4082_v2 = vpack.c.bf16 %v1262_v45, %v1260_v43  ;;  %v1680_v22 = vld [vmem:[#allocation7 + $0x70] sm:$0xff]  ;;  %v1681_v23 = vld [vmem:[#allocation7 + $0x78] sm:$0xff] }
 0x1db   : > { %v1125_v4 = vmax.f32 %v879_v59, 0.0  ;;  %4071 = vmatpush1.bf16.msra.mxu0 %v4070_v47  ;;  %v882_v5 = vpop.f32.mrb[10].mxu0  ;;  %v5611_v47 = vpop.f32.mrb[6].mxu1  ;;  %v1696_v59 = vld [vmem:[#allocation7 + $0xf0] sm:$0xff]  ;;  %v5658_v45 = vpack.c.bf16 %v1681_v23, %v1680_v22 }
 0x1dc   : > { %v883_v8 = vadd.f32 %v882_v5, %v5466_v28  ;;  %v884_v9 = vpop.f32.mrb[11].mxu0  ;;  %4073 = vmatprep.subr.bf16.mxu0 %v4072_v51  ;;  %v5619_v51 = vpop.f32.mrb[7].mxu1  ;;  %4357 = vmatpush3.bf16.msra.mxu1 %v5613_v48  ;;  %v5645_v19 = vpack.c.bf16 %v1697_v60, %v1696_v59 }
 0x1dd   : > { %v885_v18 = vadd.f32 %v884_v9, %v5470_v29  ;;  %1400 = vmatprep.mubr.f32.mxu0 %v1125_v4  ;;  %4350 = vmatprep.subr.bf16.mxu1 %v5621_v52  ;;  %v1269_v9 = vld [vmem:[%s6512_s4 + $0x308] sm:$0xff] }
 0x1de   : > { %1401 = vmatmul.mubr.f32.gmra.mrb[40].mxu0 %v1124_v7  ;;  %v1128_v37 = vmax.f32 %v883_v8, 0.0  ;;  %v1264_v7 = vld [vmem:[%s6512_s4 + $0x2e0] sm:$0xff]  ;;  %v1266_v8 = vld [vmem:[%s6512_s4 + $0x2f0] sm:$0xff] }
 0x1df   : > { %v1129_v32 = vmax.f32 %v885_v18, 0.0  ;;  %4075 = vmatpush1.bf16.msra.mxu0 %v4074_v6  ;;  %v888_v33 = vpop.f32.mrb[12].mxu0  ;;  %v4084_v6 = vpack.c.bf16 %v1267_v50, %v1265_v46  ;;  %v1275_v50 = vld [vmem:[%s6512_s4 + $0x338] sm:$0xff] }
 0x1e0   : > { %v889_v40 = vadd.f32 %v888_v33, %v5466_v28  ;;  %v890_v41 = vpop.f32.mrb[13].mxu0  ;;  %4077 = vmatprep.subr.bf16.mxu0 %v4076_v11  ;;  %v5635_v11 = vpop.f32.mrb[8].mxu1  ;;  %4358 = vmatpush3.bf16.msra.mxu1 %v5637_v12 }
 0x1e1   : > { %v891_v49 = vadd.f32 %v890_v41, %v5470_v29  ;;  %1406 = vmatprep.mubr.f32.mxu0 %v1129_v32  ;;  %v5643_v18 = vpop.f32.mrb[9].mxu1  ;;  %v4086_v32 = vpack.c.bf16 %v1266_v8, %v1264_v7  ;;  %4351 = vmatprep.subr.bf16.mxu1 %v5645_v19  ;;  %v1268_v41 = vld [vmem:[%s6512_s4 + $0x300] sm:$0xff]  ;;  %v1277_v8 = vld [vmem:[%s6512_s4 + $0x348] sm:$0xff] }
 0x1e2   : > { %1407 = vmatmul.mubr.f32.gmra.mrb[42].mxu0 %v1128_v37  ;;  %v1132_v3 = vmax.f32 %v889_v40, 0.0  ;;  %v4088_v40 = vpack.c.bf16 %v1271_v15, %v1269_v9  ;;  %v5656_v43 = vpop.f32.mrb[10].mxu1  ;;  %v1279_v9 = vld [vmem:[%s6512_s4 + $0x358] sm:$0xff] }
 0x1e3   : > { %v1133_v63 = vmax.f32 %v891_v49, 0.0  ;;  %4079 = vmatpush1.bf16.msra.mxu0 %v4078_v36  ;;  %v894_v1 = vpop.f32.mrb[14].mxu0  ;;  %v1273_v49 = vld [vmem:[%s6512_s4 + $0x328] sm:$0xff]  ;;  %v5667_v53 = vpop.f32.mrb[11].mxu1 }
 0x1e4   : > { %v895_v4 = vadd.f32 %v894_v1, %v5466_v28  ;;  %v896_v5 = vpop.f32.mrb[15].mxu0  ;;  %4081 = vmatprep.subr.bf16.mxu0 %v4080_v42  ;;  %v1270_v42 = vld [vmem:[%s6512_s4 + $0x310] sm:$0xff]  ;;  %4359 = vmatpush3.bf16.msra.mxu1 %v5658_v45 }
 0x1e5   : > { %v897_v14 = vadd.f32 %v896_v5, %v5470_v29  ;;  %1412 = vmatprep.mubr.f32.mxu0 %v1133_v63  ;;  %v4090_v60 = vpack.c.bf16 %v1270_v42, %v1268_v41  ;;  %v1274_v5 = vld [vmem:[%s6512_s4 + $0x330] sm:$0xff]  ;;  %v1281_v42 = vld [vmem:[%s6512_s4 + $0x368] sm:$0xff] }
 0x1e6   : > { %1413 = vmatmul.mubr.f32.gmra.mrb[44].mxu0 %v1132_v3  ;;  %v1136_v33 = vmax.f32 %v895_v4, 0.0  ;;  %v4092_v3 = vpack.c.bf16 %v1275_v50, %v1273_v49  ;;  %v1272_v4 = vld [vmem:[%s6512_s4 + $0x320] sm:$0xff] }
 0x1e7   : > { %v1137_v30 = vmax.f32 %v897_v14, 0.0  ;;  %4083 = vmatpush1.bf16.msra.mxu0 %v4082_v2  ;;  %v900_v31 = vpop.f32.mrb[16].mxu0  ;;  %v4094_v23 = vpack.c.bf16 %v1274_v5, %v1272_v4  ;;  %v1282_v4 = vld [vmem:[%s6512_s4 + $0x370] sm:$0xff] }
 0x1e8   : > { %v901_v36 = vadd.f32 %v900_v31, %v5466_v28  ;;  %v902_v37 = vpop.f32.mrb[17].mxu0  ;;  %4085 = vmatprep.subr.bf16.mxu0 %v4084_v6  ;;  %v5677_v6 = vpop.f32.mrb[12].mxu1 }
 0x1e9   : > { %v903_v46 = vadd.f32 %v902_v37, %v5470_v29  ;;  %1418 = vmatprep.mubr.f32.mxu0 %v1137_v30  ;;  %v5686_v14 = vpop.f32.mrb[13].mxu1  ;;  %v1278_v37 = vld [vmem:[%s6512_s4 + $0x350] sm:$0xff] }
 0x1ea   : > { %1419 = vmatmul.mubr.f32.gmra.mrb[46].mxu0 %v1136_v33  ;;  %v1140_v63 = vmax.f32 %v901_v36, 0.0  ;;  %v4096_v33 = vpack.c.bf16 %v1279_v9, %v1277_v8  ;;  %v1276_v36 = vld [vmem:[%s6512_s4 + $0x340] sm:$0xff]  ;;  %v1285_v8 = vld [vmem:[%s6512_s4 + $0x388] sm:$0xff]  ;;  %v1287_v9 = vld [vmem:[%s6512_s4 + $0x398] sm:$0xff] }
 0x1eb   : > { %v1141_v54 = vmax.f32 %v903_v46, 0.0  ;;  %4087 = vmatpush1.bf16.msra.mxu0 %v4086_v32  ;;  %v906_v59 = vpop.f32.mrb[18].mxu0  ;;  %v1283_v46 = vld [vmem:[%s6512_s4 + $0x378] sm:$0xff] }
 0x1ec   : > { %v907_v1 = vadd.f32 %v906_v59, %v5466_v28  ;;  %v908_v2 = vpop.f32.mrb[19].mxu0  ;;  %4089 = vmatprep.subr.bf16.mxu0 %v4088_v40  ;;  %v5695_v40 = vpop.f32.mrb[14].mxu1  ;;  %v4098_v59 = vpack.c.bf16 %v1278_v37, %v1276_v36  ;;  %v4104_v36 = vpack.c.bf16 %v1287_v9, %v1285_v8  ;;  %v1284_v37 = vld [vmem:[%s6512_s4 + $0x380] sm:$0xff] }
 0x1ed   : > { %v909_v7 = vadd.f32 %v908_v2, %v5470_v29  ;;  %1424 = vmatprep.mubr.f32.mxu0 %v1141_v54  ;;  %v5704_v49 = vpop.f32.mrb[15].mxu1  ;;  %v4100_v2 = vpack.c.bf16 %v1283_v46, %v1281_v42  ;;  %v1288_v9 = vld [vmem:[%s6512_s4 + $0x3a0] sm:$0xff] }
 0x1ee   : > { %1425 = vmatmul.mubr.f32.gmra.mrb[48].mxu0 %v1140_v63  ;;  %v1144_v30 = vmax.f32 %v907_v1, 0.0  ;;  %v5713_v5 = vpop.f32.mrb[16].mxu1 }
 0x1ef   : > { %v1145_v15 = vmax.f32 %v909_v7, 0.0  ;;  %4091 = vmatpush1.bf16.msra.mxu0 %v4090_v60  ;;  %v912_v22 = vpop.f32.mrb[20].mxu0 }
 0x1f0   : > { %v913_v31 = vadd.f32 %v912_v22, %v5466_v28  ;;  %v914_v32 = vpop.f32.mrb[21].mxu0  ;;  %4093 = vmatprep.subr.bf16.mxu0 %v4092_v3  ;;  %v1280_v3 = vld [vmem:[%s6512_s4 + $0x360] sm:$0xff] }
 0x1f1   : > { %v915_v41 = vadd.f32 %v914_v32, %v5470_v29  ;;  %1430 = vmatprep.mubr.f32.mxu0 %v1145_v15  ;;  %v5722_v15 = vpop.f32.mrb[17].mxu1 }
 0x1f2   : > { %1431 = vmatmul.mubr.f32.gmra.mrb[50].mxu0 %v1144_v30  ;;  %v1148_v60 = vmax.f32 %v913_v31, 0.0  ;;  %v4102_v30 = vpack.c.bf16 %v1282_v4, %v1280_v3  ;;  %v5731_v42 = vpop.f32.mrb[18].mxu1 }
 0x1f3   : > { %v1149_v50 = vmax.f32 %v915_v41, 0.0  ;;  %4095 = vmatpush1.bf16.msra.mxu0 %v4094_v23  ;;  %v918_v54 = vpop.f32.mrb[22].mxu0  ;;  %v1286_v41 = vld [vmem:[%s6512_s4 + $0x390] sm:$0xff] }
 0x1f4   : > { %v919_v63 = vadd.f32 %v918_v54, %v5466_v28  ;;  %v920_v1 = vpop.f32.mrb[23].mxu0  ;;  %4097 = vmatprep.subr.bf16.mxu0 %v4096_v33  ;;  %v1291_v54 = vld [vmem:[%s6512_s4 + $0x3b8] sm:$0xff] }
 0x1f5   : > { %v921_v7 = vadd.f32 %v920_v1, %v5470_v29  ;;  %1436 = vmatprep.mubr.f32.mxu0 %v1149_v50  ;;  %v1289_v50 = vld [vmem:[%s6512_s4 + $0x3a8] sm:$0xff]  ;;  %v4106_v1 = vpack.c.bf16 %v1286_v41, %v1284_v37 }
 0x1f6   : > { %1437 = vmatmul.mubr.f32.gmra.mrb[52].mxu0 %v1148_v60  ;;  %v1152_v31 = vmax.f32 %v919_v63, 0.0  ;;  %v4108_v8 = vpack.c.bf16 %v1291_v54, %v1289_v50 }
 0x1f7   : > { %v1153_v22 = vmax.f32 %v921_v7, 0.0  ;;  %4099 = vmatpush1.bf16.msra.mxu0 %v4098_v59  ;;  %v924_v23 = vpop.f32.mrb[24].mxu0  ;;  %v5740_v59 = vpop.f32.mrb[19].mxu1 }
 0x1f8   : > { %v925_v32 = vadd.f32 %v924_v23, %v5466_v28  ;;  %v926_v33 = vpop.f32.mrb[25].mxu0  ;;  %4101 = vmatprep.subr.bf16.mxu0 %v4100_v2  ;;  %v6532_v2 = vsub.s32 3, %v5454_v24  ;;  %v5750_v23 = vpop.f32.mrb[20].mxu1 }
 0x1f9   : > { %v927_v46 = vadd.f32 %v926_v33, %v5470_v29  ;;  %1442 = vmatprep.mubr.f32.mxu0 %v1153_v22  ;;  %v1290_v22 = vld [vmem:[%s6512_s4 + $0x3b0] sm:$0xff]  ;;  %v5759_v33 = vpop.f32.mrb[21].mxu1 }
 0x1fa   : > { %1443 = vmatmul.mubr.f32.gmra.mrb[54].mxu0 %v1152_v31  ;;  %v1156_v3 = vmax.f32 %v925_v32, 0.0  ;;  %v1293_v31 = vld [vmem:[%s6512_s4 + $0x3c8] sm:$0xff]  ;;  %v1295_v32 = vld [vmem:[%s6512_s4 + $0x3d8] sm:$0xff]  ;;  %v4110_v41 = vpack.c.bf16 %v1290_v22, %v1288_v9  ;;  %v5774_v9 = vpop.f32.mrb[22].mxu1 }
 0x1fb   : > { %v1157_v60 = vmax.f32 %v927_v46, 0.0  ;;  %4103 = vmatpush1.bf16.msra.mxu0 %v4102_v30  ;;  %v930_v63 = vpop.f32.mrb[26].mxu0  ;;  %v5764_v46 = vrot.slane %v5459_v26, %v6532_v2 }
 0x1fc   : > { %v931_v4 = vadd.f32 %v930_v63, %v5466_v28  ;;  %v932_v7 = vpop.f32.mrb[27].mxu0  ;;  %4105 = vmatprep.subr.bf16.mxu0 %v4104_v36  ;;  %v4112_v63 = vpack.c.bf16 %v1295_v32, %v1293_v31 }
 0x1fd   : > { %v933_v30 = vadd.f32 %v932_v7, %v5470_v29  ;;  %1448 = vmatprep.mubr.f32.mxu0 %v1157_v60  ;;  %v776_v7 = vsub.s32 2, %v5454_v24  ;;  %v1016_v2 = vadd.f32 %v5547_v38, %v5764_v46 }
 0x1fe   : > { %1449 = vmatmul.mubr.f32.gmra.mrb[56].mxu0 %v1156_v3  ;;  %v1160_v50 = vmax.f32 %v931_v4, 0.0  ;;  %v1292_v3 = vld [vmem:[%s6512_s4 + $0x3c0] sm:$0xff]  ;;  %v1297_v4 = vld [vmem:[%s6512_s4 + $0x3e8] sm:$0xff] }
 0x1ff   : > { %v1161_v36 = vmax.f32 %v933_v30, 0.0  ;;  %4107 = vmatpush1.bf16.msra.mxu0 %v4106_v1  ;;  %v936_v37 = vpop.f32.mrb[28].mxu0  ;;  %v1294_v1 = vld [vmem:[%s6512_s4 + $0x3d0] sm:$0xff]  ;;  %v5783_v30 = vpop.f32.mrb[23].mxu1  ;;  %v5791_v27 = vrot.slane %v5459_v26, %v776_v7  ;;  %v1111_v26 = vmax.f32 %v1016_v2, 0.0  ;;  %v1028_v2 = vadd.f32 %v5595_v20, %v5764_v46 }
 0x200   : > { %v937_v54 = vadd.f32 %v936_v37, %v5466_v28  ;;  %v938_v60 = vpop.f32.mrb[29].mxu0  ;;  %4109 = vmatprep.subr.bf16.mxu0 %v4108_v8  ;;  %v1299_v8 = vld [vmem:[%s6512_s4 + $0x3f8] sm:$0xff]  ;;  %v4114_v37 = vpack.c.bf16 %v1294_v1, %v1292_v3  ;;  %v5799_v38 = vpop.f32.mrb[24].mxu1  ;;  %v1022_v1 = vadd.f32 %v5571_v61, %v5764_v46 }
 0x201   : > { %v939_v22 = vadd.f32 %v938_v60, %v5470_v29  ;;  %1454 = vmatprep.mubr.f32.mxu0 %v1161_v36  ;;  %v4116_v25 = vpack.c.bf16 %v1299_v8, %v1297_v4  ;;  %v1014_v4 = vadd.f32 %v5539_v34, %v5791_v27  ;;  %v1020_v61 = vadd.f32 %v5563_v56, %v5791_v27 }
 0x202   : > { %1455 = vmatmul.mubr.f32.gmra.mrb[58].mxu0 %v1160_v50  ;;  %v1164_v60 = vmax.f32 %v937_v54, 0.0  ;;  %v1298_v50 = vld [vmem:[%s6512_s4 + $0x3f0] sm:$0xff]  ;;  %v5802_v54 = vpop.f32.mrb[25].mxu1  ;;  %v1119_v34 = vmax.f32 %v1028_v2, 0.0  ;;  %v1026_v20 = vadd.f32 %v5587_v16, %v5791_v27 }
 0x203   : > { %v1165_v31 = vmax.f32 %v939_v22, 0.0  ;;  %4111 = vmatpush1.bf16.msra.mxu0 %v4110_v41  ;;  %v942_v32 = vpop.f32.mrb[30].mxu0  ;;  %v1296_v41 = vld [vmem:[%s6512_s4 + $0x3e0] sm:$0xff]  ;;  %v5808_v8 = vpop.f32.mrb[26].mxu1 }
 0x204   : > { %v943_v36 = vadd.f32 %v942_v32, %v5466_v28  ;;  %v944_v0 = vpop.f32.mrb[31].mxu0  ;;  %4113 = vmatprep.subr.bf16.mxu0 %v4112_v63  ;;  %v4118_v3 = vpack.c.bf16 %v1298_v50, %v1296_v41  ;;  %v1040_v41 = vadd.f32 %v5643_v18, %v5764_v46  ;;  %v1038_v18 = vadd.f32 %v5635_v11, %v5791_v27 }
 0x205   : > { %v945_v28 = vadd.f32 %v944_v0, %v5470_v29  ;;  %1460 = vmatprep.mubr.f32.mxu0 %v1165_v31  ;;  %v5810_v0 = vpop.f32.mrb[27].mxu1  ;;  %v1115_v29 = vmax.f32 %v1022_v1, 0.0  ;;  %v1110_v31 = vmax.f32 %v1014_v4, 0.0 }
 0x206   : > { %1461 = vmatmul.mubr.f32.gmra.mrb[60].mxu0 %v1164_v60  ;;  %v1168_v22 = vmax.f32 %v943_v36, 0.0  ;;  %v5816_v32 = vpop.f32.mrb[28].mxu1  ;;  %v1114_v60 = vmax.f32 %v1020_v61, 0.0  ;;  %v1127_v16 = vmax.f32 %v1040_v41, 0.0 }
 0x207   : > { %v1169_v63 = vmax.f32 %v945_v28, 0.0  ;;  %4115 = vmatpush1.bf16.msra.mxu0 %v4114_v37  ;;  %v1034_v37 = vadd.f32 %v5619_v51, %v5764_v46  ;;  %v1118_v51 = vmax.f32 %v1026_v20, 0.0  ;;  %v6563_v20 = vld [vmem:[#allocation18_spill] sm:$0xff] }
 0x208   : > { %4117 = vmatprep.subr.bf16.mxu0 %v4116_v25  ;;  %v5819_v25 = vpop.f32.mrb[29].mxu1 }
 0x209   : > { %1466 = vmatprep.mubr.f32.mxu0 %v1169_v63  ;;  %v5826_v36 = vpop.f32.mrb[30].mxu1 }
 0x20a   : > { %1467 = vmatmul.mubr.f32.gmra.mrb[62].mxu0 %v1168_v22  ;;  %v5829_v56 = vpop.f32.mrb[31].mxu1  ;;  %v1104_v61 = vadd.f32 %v5826_v36, %v5791_v27 }
 0x20b   : > { %4119 = vmatpush1.bf16.msra.mxu0 %v4118_v3  ;;  %1537 = vmatprep.mubr.f32.mxu0 %v1111_v26 }
 0x20c   : > { %4121 = vmatprep.subr.bf16.mxu0 %v5486_v44  ;;  %v1123_v44 = vmax.f32 %v1034_v37, 0.0  ;;  %v6562_v37 = vld [vmem:[#allocation17_spill] sm:$0xff] }
 0x20e   : > { %1538 = vmatmul.mubr.f32.vlgmr.msra.gmra.mrb[32].mxu0 %v1110_v31 }
 0x20f   : > { %1543 = vmatprep.mubr.f32.mxu0 %v1115_v29  ;;  %4123 = vmatpush3.bf16.msra.mxu0 %v5498_v55  ;;  %v1032_v55 = vadd.f32 %v5611_v47, %v5791_v27  ;;  %v1126_v47 = vmax.f32 %v1038_v18, 0.0 }
 0x210   : > { %4125 = vmatprep.subr.bf16.mxu0 %v5504_v58  ;;  %v1046_v58 = vadd.f32 %v5667_v53, %v5764_v46  ;;  %v1044_v53 = vadd.f32 %v5656_v43, %v5791_v27 }
 0x211   : > { %v1122_v50 = vmax.f32 %v1032_v55, 0.0 }
 0x212   : > { %1544 = vmatmul.mubr.f32.gmra.mrb[34].mxu0 %v1114_v60  ;;  %v1130_v11 = vmax.f32 %v1044_v53, 0.0 }
 0x213   : > { %1549 = vmatprep.mubr.f32.mxu0 %v1119_v34  ;;  %4127 = vmatpush3.bf16.msra.mxu0 %v5519_v10  ;;  %v1131_v10 = vmax.f32 %v1046_v58, 0.0  ;;  %v1300_v34 = vld [vmem:[#allocation6] sm:$0x3] }
 0x214   : > { %4129 = vmatprep.subr.bf16.mxu0 %v5525_v13  ;;  %v1052_v13 = vadd.f32 %v5686_v14, %v5764_v46  ;;  %v1050_v14 = vadd.f32 %v5677_v6, %v5791_v27  ;;  %v5901_v60 = vrot.slane %v1300_v34, %v6562_v37 }
 0x216   : > { %1550 = vmatmul.mubr.f32.gmra.mrb[36].mxu0 %v1118_v51  ;;  %v1134_v43 = vmax.f32 %v1050_v14, 0.0 }
 0x217   : > { %1555 = vmatprep.mubr.f32.mxu0 %v1123_v44  ;;  %4131 = vmatpush3.bf16.msra.mxu0 %v5541_v35  ;;  %v1135_v35 = vmax.f32 %v1052_v13, 0.0 }
 0x218   : > { %4133 = vmatprep.subr.bf16.mxu0 %v5549_v39  ;;  %v1058_v39 = vadd.f32 %v5704_v49, %v5764_v46  ;;  %v1056_v49 = vadd.f32 %v5695_v40, %v5791_v27 }
 0x21a   : > { %1556 = vmatmul.mubr.f32.gmra.mrb[38].mxu0 %v1122_v50  ;;  %v1138_v6 = vmax.f32 %v1056_v49, 0.0 }
 0x21b   : > { %1561 = vmatprep.mubr.f32.mxu0 %v1127_v16  ;;  %4135 = vmatpush3.bf16.msra.mxu0 %v5565_v57  ;;  %v1139_v57 = vmax.f32 %v1058_v39, 0.0 }
 0x21c   : > { %4137 = vmatprep.subr.bf16.mxu0 %v5573_v62  ;;  %v1064_v62 = vadd.f32 %v5722_v15, %v5764_v46  ;;  %v1062_v15 = vadd.f32 %v5713_v5, %v5791_v27  ;;  %v1082_v5 = vadd.f32 %v5783_v30, %v5764_v46  ;;  %v1094_v30 = vadd.f32 %v5810_v0, %v5764_v46 }
 0x21d   : > { %v1106_v0 = vadd.f32 %v5829_v56, %v5764_v46 }
 0x21e   : > { %1562 = vmatmul.mubr.f32.gmra.mrb[40].mxu0 %v1126_v47  ;;  %v1142_v40 = vmax.f32 %v1062_v15, 0.0  ;;  %v1155_v63 = vmax.f32 %v1082_v5, 0.0  ;;  %v1163_v1 = vmax.f32 %v1094_v30, 0.0  ;;  %v1871_v30 = vld [vmem:[%s6516_s8 + $0x28] sm:$0xff] }
 0x21f   : > { %1567 = vmatprep.mubr.f32.mxu0 %v1131_v10  ;;  %4139 = vmatpush3.bf16.msra.mxu0 %v5589_v17  ;;  %v1143_v17 = vmax.f32 %v1064_v62, 0.0  ;;  %v1171_v2 = vmax.f32 %v1106_v0, 0.0  ;;  %v1872_v0 = vld [vmem:[%s6516_s8 + $0x30] sm:$0xff] }
 0x220   : > { %4141 = vmatprep.subr.bf16.mxu0 %v5597_v21  ;;  %v1070_v21 = vadd.f32 %v5740_v59, %v5764_v46  ;;  %v1068_v59 = vadd.f32 %v5731_v42, %v5791_v27  ;;  %v1080_v42 = vadd.f32 %v5774_v9, %v5791_v27  ;;  %v1092_v9 = vadd.f32 %v5808_v8, %v5791_v27 }
 0x221   : > { %v1170_v8 = vmax.f32 %v1104_v61, 0.0 }
 0x222   : > { %1568 = vmatmul.mubr.f32.gmra.mrb[42].mxu0 %v1130_v11  ;;  %v1146_v28 = vmax.f32 %v1068_v59, 0.0  ;;  %v1154_v3 = vmax.f32 %v1080_v42, 0.0  ;;  %v1162_v29 = vmax.f32 %v1092_v9, 0.0  ;;  %v1869_v59 = vld [vmem:[%s6516_s8 + $0x18] sm:$0xff] }
 0x223   : > { %1573 = vmatprep.mubr.f32.mxu0 %v1135_v35  ;;  %4143 = vmatpush3.bf16.msra.mxu0 %v5613_v48  ;;  %v1147_v48 = vmax.f32 %v1070_v21, 0.0 }
 0x224   : > { %4145 = vmatprep.subr.bf16.mxu0 %v5621_v52  ;;  %v1076_v52 = vadd.f32 %v5759_v33, %v5764_v46 }
 0x226   : > { %1574 = vmatmul.mubr.f32.gmra.mrb[44].mxu0 %v1134_v43 }
 0x227   : > { %1579 = vmatprep.mubr.f32.mxu0 %v1139_v57  ;;  %4147 = vmatpush3.bf16.msra.mxu0 %v5637_v12  ;;  %v1151_v12 = vmax.f32 %v1076_v52, 0.0 }
 0x228   : > { %4149 = vmatprep.subr.bf16.mxu0 %v5645_v19  ;;  %v1074_v19 = vadd.f32 %v5750_v23, %v5791_v27  ;;  %v1086_v23 = vadd.f32 %v5799_v38, %v5791_v27  ;;  %v1098_v38 = vadd.f32 %v5816_v32, %v5791_v27  ;;  %v5904_v27 = vrot.slane %v1300_v34, %v6563_v20  ;;  %v1875_v34 = vld [vmem:[%s6516_s8 + $0x48] sm:$0xff] }
 0x22a   : > { %1580 = vmatmul.mubr.f32.gmra.mrb[46].mxu0 %v1138_v6  ;;  %v1150_v33 = vmax.f32 %v1074_v19, 0.0  ;;  %v1158_v22 = vmax.f32 %v1086_v23, 0.0  ;;  %v1166_v31 = vmax.f32 %v1098_v38, 0.0 }
 0x22b   : > { %1585 = vmatprep.mubr.f32.mxu0 %v1143_v17  ;;  %4151 = vmatpush3.bf16.msra.mxu0 %v5658_v45  ;;  %v1088_v45 = vadd.f32 %v5802_v54, %v5764_v46  ;;  %v1100_v54 = vadd.f32 %v5819_v25, %v5764_v46  ;;  %v1866_v25 = vld [vmem:[%s6516_s8] sm:$0xff]  ;;  %v1867_v46 = vld [vmem:[%s6516_s8 + $0x8] sm:$0xff] }
 0x22c   : > { %v4152_v32 = vpack.c.bf16 %v1867_v46, %v1866_v25 }
 0x22d   : > { %v1159_v26 = vmax.f32 %v1088_v45, 0.0  ;;  %v1167_v4 = vmax.f32 %v1100_v54, 0.0 }
 0x22e   : > { %1586 = vmatmul.mubr.f32.gmra.mrb[48].mxu0 %v1142_v40  ;;  %4153 = vmatprep.subr.bf16.mxu1 %v4152_v32  ;;  %v1868_v40 = vld [vmem:[%s6516_s8 + $0x10] sm:$0xff] }
 0x22f   : > { %1591 = vmatprep.mubr.f32.mxu0 %v1147_v48 }
 0x232   : > { %1592 = vmatmul.mubr.f32.gmra.mrb[50].mxu0 %v1146_v28  ;;  %v6564_v28 = vmov 0.0  }
 0x233   : > { %1597 = vmatprep.mubr.f32.mxu0 %v1151_v12 }
 0x236   : > { %1598 = vmatmul.mubr.f32.gmra.mrb[52].mxu0 %v1150_v33  ;;  %v4156_v33 = vpack.c.bf16 %v1869_v59, %v1868_v40 }
 0x237   : > { %1603 = vmatprep.mubr.f32.mxu0 %v1155_v63 }
 0x23a   : > { %1604 = vmatmul.mubr.f32.gmra.mrb[54].mxu0 %v1154_v3 }
 0x23b   : > { %1609 = vmatprep.mubr.f32.mxu0 %v1159_v26  ;;  %v1870_v26 = vld [vmem:[%s6516_s8 + $0x20] sm:$0xff] }
 0x23c   : > { %v4160_v9 = vpack.c.bf16 %v1871_v30, %v1870_v26 }
 0x23e   : > { %1610 = vmatmul.mubr.f32.gmra.mrb[56].mxu0 %v1158_v22 }
 0x23f   : > { %1615 = vmatprep.mubr.f32.mxu0 %v1163_v1 }
 0x242   : > { %1616 = vmatmul.mubr.f32.gmra.mrb[58].mxu0 %v1162_v29  ;;  %v1873_v29 = vld [vmem:[%s6516_s8 + $0x38] sm:$0xff] }
 0x243   : > { %1621 = vmatprep.mubr.f32.mxu0 %v1167_v4  ;;  %v4164_v25 = vpack.c.bf16 %v1873_v29, %v1872_v0 }
 0x246   : > { %1622 = vmatmul.mubr.f32.gmra.mrb[60].mxu0 %v1166_v31 }
 0x247   : > { %1627 = vmatprep.mubr.f32.mxu0 %v1171_v2 }
 0x24a   : > { %1628 = vmatmul.mubr.f32.gmra.mrb[62].mxu0 %v1170_v8 }
 0x2e1   : > { %v1539_v36 = vpop.f32.mrb[32].mxu0 }
 0x2e2   : > { %v4360_v56 = vadd.f32 %v1539_v36, %v5901_v60  ;;  %v1541_v44 = vpop.f32.mrb[33].mxu0 }
 0x2e3   : > { %v4361_v41 = vadd.f32 %v1541_v44, %v5904_v27 }
 0x2e4   : > { %v1634_v16 = vmax.f32 %v4360_v56, 0.0 }
 0x2e5   : > { %v1635_v51 = vmax.f32 %v4361_v41, 0.0  ;;  %v1545_v55 = vpop.f32.mrb[34].mxu0 }
 0x2e6   : > { %v4362_v58 = vadd.f32 %v1545_v55, %v5901_v60  ;;  %v1547_v50 = vpop.f32.mrb[35].mxu0 }
 0x2e7   : > { %v4363_v18 = vadd.f32 %v1547_v50, %v5904_v27  ;;  %1769 = vmatprep.mubr.f32.mxu0 %v1635_v51  ;;  %v1877_v50 = vld [vmem:[%s6516_s8 + $0x58] sm:$0xff] }
 0x2e8   : > { %1770 = vmatmul.mubr.f32.vlgmr.msra.gmra.mrb[64].mxu0 %v1634_v16  ;;  %v1636_v47 = vmax.f32 %v4362_v58, 0.0  ;;  %v1876_v58 = vld [vmem:[%s6516_s8 + $0x50] sm:$0xff] }
 0x2e9   : > { %v1637_v10 = vmax.f32 %v4363_v18, 0.0  ;;  %v1551_v13 = vpop.f32.mrb[36].mxu0 }
 0x2ea   : > { %v4364_v53 = vadd.f32 %v1551_v13, %v5901_v60  ;;  %v1553_v35 = vpop.f32.mrb[37].mxu0 }
 0x2eb   : > { %v4365_v39 = vadd.f32 %v1553_v35, %v5904_v27  ;;  %1774 = vmatprep.mubr.f32.mxu0 %v1637_v10  ;;  %v4172_v35 = vpack.c.bf16 %v1877_v50, %v1876_v58 }
 0x2ec   : > { %1775 = vmatmul.mubr.f32.gmra.mrb[66].mxu0 %v1636_v47  ;;  %v1638_v57 = vmax.f32 %v4364_v53, 0.0 }
 0x2ed   : > { %v1639_v11 = vmax.f32 %v4365_v39, 0.0  ;;  %v1557_v14 = vpop.f32.mrb[38].mxu0 }
 0x2ee   : > { %v4366_v62 = vadd.f32 %v1557_v14, %v5901_v60  ;;  %v1559_v43 = vpop.f32.mrb[39].mxu0  ;;  %v1879_v14 = vld [vmem:[%s6516_s8 + $0x68] sm:$0xff] }
 0x2ef   : > { %v4367_v49 = vadd.f32 %v1559_v43, %v5904_v27  ;;  %1779 = vmatprep.mubr.f32.mxu0 %v1639_v11  ;;  %v1878_v11 = vld [vmem:[%s6516_s8 + $0x60] sm:$0xff] }
 0x2f0   : > { %1780 = vmatmul.mubr.f32.gmra.mrb[68].mxu0 %v1638_v57  ;;  %v1640_v6 = vmax.f32 %v4366_v62, 0.0 }
 0x2f1   : > { %v1641_v17 = vmax.f32 %v4367_v49, 0.0  ;;  %v1563_v21 = vpop.f32.mrb[40].mxu0 }
 0x2f2   : > { %v4368_v15 = vadd.f32 %v1563_v21, %v5901_v60  ;;  %v1565_v48 = vpop.f32.mrb[41].mxu0  ;;  %v4176_v21 = vpack.c.bf16 %v1879_v14, %v1878_v11 }
 0x2f3   : > { %v4369_v52 = vadd.f32 %v1565_v48, %v5904_v27  ;;  %1784 = vmatprep.mubr.f32.mxu0 %v1641_v17 }
 0x2f4   : > { %1785 = vmatmul.mubr.f32.gmra.mrb[70].mxu0 %v1640_v6  ;;  %v1642_v19 = vmax.f32 %v4368_v15, 0.0 }
 0x2f5   : > { %v1643_v12 = vmax.f32 %v4369_v52, 0.0  ;;  %v1569_v5 = vpop.f32.mrb[42].mxu0  ;;  %2510 = vmatprep.mubr.f32.mxu0 %v6564_v28 }
 0x2f6   : > { %v4370_v63 = vadd.f32 %v1569_v5, %v5901_v60  ;;  %v1571_v45 = vpop.f32.mrb[43].mxu0 }
 0x2f7   : > { %v4371_v42 = vadd.f32 %v1571_v45, %v5904_v27  ;;  %1789 = vmatprep.mubr.f32.mxu1 %v1643_v12 }
 0x2f8   : > { %1790 = vmatmul.mubr.f32.vlgmr.msra.gmra.mrb[32].mxu1 %v1642_v19  ;;  %v1644_v1 = vmax.f32 %v4370_v63, 0.0 }
 0x2f9   : > { %v1645_v3 = vmax.f32 %v4371_v42, 0.0  ;;  %v1575_v23 = vpop.f32.mrb[44].mxu0  ;;  %4155 = vmatpush3.bf16.msra.mxu1 %v4152_v32  ;;  %v1874_v32 = vld [vmem:[%s6516_s8 + $0x40] sm:$0xff] }
 0x2fa   : > { %v4372_v54 = vadd.f32 %v1575_v23, %v5901_v60  ;;  %v1577_v22 = vpop.f32.mrb[45].mxu0  ;;  %4157 = vmatprep.subr.bf16.mxu1 %v4156_v33  ;;  %v4168_v55 = vpack.c.bf16 %v1875_v34, %v1874_v32 }
 0x2fb   : > { %v4373_v4 = vadd.f32 %v1577_v22, %v5904_v27  ;;  %1794 = vmatprep.mubr.f32.mxu1 %v1645_v3 }
 0x2fc   : > { %1795 = vmatmul.mubr.f32.gmra.mrb[34].mxu1 %v1644_v1  ;;  %v1646_v31 = vmax.f32 %v4372_v54, 0.0 }
 0x2fd   : > { %v1647_v38 = vmax.f32 %v4373_v4, 0.0  ;;  %v1581_v2 = vpop.f32.mrb[46].mxu0  ;;  %4159 = vmatpush3.bf16.msra.mxu1 %v4156_v33 }
 0x2fe   : > { %v4374_v61 = vadd.f32 %v1581_v2, %v5901_v60  ;;  %v1583_v8 = vpop.f32.mrb[47].mxu0  ;;  %4161 = vmatprep.subr.bf16.mxu1 %v4160_v9 }
 0x2ff   : > { %v4375_v46 = vadd.f32 %v1583_v8, %v5904_v27  ;;  %1799 = vmatprep.mubr.f32.mxu1 %v1647_v38 }
 0x300   : > { %1800 = vmatmul.mubr.f32.gmra.mrb[36].mxu1 %v1646_v31  ;;  %v1648_v44 = vmax.f32 %v4374_v61, 0.0 }
 0x301   : > { %v1649_v36 = vmax.f32 %v4375_v46, 0.0  ;;  %v1587_v56 = vpop.f32.mrb[48].mxu0  ;;  %4163 = vmatpush3.bf16.msra.mxu1 %v4160_v9 }
 0x302   : > { %v4376_v41 = vadd.f32 %v1587_v56, %v5901_v60  ;;  %v1589_v51 = vpop.f32.mrb[49].mxu0  ;;  %4165 = vmatprep.subr.bf16.mxu1 %v4164_v25  ;;  %v1881_v56 = vld [vmem:[%s6516_s8 + $0x78] sm:$0xff] }
 0x303   : > { %v4377_v16 = vadd.f32 %v1589_v51, %v5904_v27  ;;  %1804 = vmatprep.mubr.f32.mxu1 %v1649_v36  ;;  %v1880_v36 = vld [vmem:[%s6516_s8 + $0x70] sm:$0xff] }
 0x304   : > { %1805 = vmatmul.mubr.f32.gmra.mrb[38].mxu1 %v1648_v44  ;;  %v1650_v13 = vmax.f32 %v4376_v41, 0.0  ;;  %v4180_v44 = vpack.c.bf16 %v1881_v56, %v1880_v36  ;;  %v5981_v41 = vld [vmem:[#allocation9] ss:$0 sm:$0xff] }
 0x305   : > { %v1651_v18 = vmax.f32 %v4377_v16, 0.0  ;;  %v1593_v10 = vpop.f32.mrb[50].mxu0  ;;  %4167 = vmatpush3.bf16.msra.mxu1 %v4164_v25 }
 0x306   : > { %v4378_v47 = vadd.f32 %v1593_v10, %v5901_v60  ;;  %v1595_v53 = vpop.f32.mrb[51].mxu0  ;;  %4169 = vmatprep.subr.bf16.mxu1 %v4168_v55 }
 0x307   : > { %v4379_v39 = vadd.f32 %v1595_v53, %v5904_v27  ;;  %1809 = vmatprep.mubr.f32.mxu1 %v1651_v18 }
 0x308   : > { %1810 = vmatmul.mubr.f32.gmra.mrb[40].mxu1 %v1650_v13  ;;  %v1652_v43 = vmax.f32 %v4378_v47, 0.0 }
 0x309   : > { %v1653_v57 = vmax.f32 %v4379_v39, 0.0  ;;  %v1599_v62 = vpop.f32.mrb[52].mxu0  ;;  %4171 = vmatpush3.bf16.msra.mxu1 %v4168_v55 }
 0x30a   : > { %v4380_v49 = vadd.f32 %v1599_v62, %v5901_v60  ;;  %v1601_v17 = vpop.f32.mrb[53].mxu0  ;;  %4173 = vmatprep.subr.bf16.mxu1 %v4172_v35 }
 0x30b   : > { %v4381_v6 = vadd.f32 %v1601_v17, %v5904_v27  ;;  %1814 = vmatprep.mubr.f32.mxu1 %v1653_v57 }
 0x30c   : > { %1815 = vmatmul.mubr.f32.gmra.mrb[42].mxu1 %v1652_v43  ;;  %v1654_v52 = vmax.f32 %v4380_v49, 0.0 }
 0x30d   : > { %v1655_v15 = vmax.f32 %v4381_v6, 0.0  ;;  %v1605_v48 = vpop.f32.mrb[54].mxu0  ;;  %4175 = vmatpush3.bf16.msra.mxu1 %v4172_v35 }
 0x30e   : > { %v4382_v40 = vadd.f32 %v1605_v48, %v5901_v60  ;;  %v1607_v59 = vpop.f32.mrb[55].mxu0  ;;  %4177 = vmatprep.subr.bf16.mxu1 %v4176_v21 }
 0x30f   : > { %v4383_v12 = vadd.f32 %v1607_v59, %v5904_v27  ;;  %1819 = vmatprep.mubr.f32.mxu1 %v1655_v15 }
 0x310   : > { %1820 = vmatmul.mubr.f32.gmra.mrb[44].mxu1 %v1654_v52  ;;  %v1656_v63 = vmax.f32 %v4382_v40, 0.0 }
 0x311   : > { %v1657_v5 = vmax.f32 %v4383_v12, 0.0  ;;  %v1611_v19 = vpop.f32.mrb[56].mxu0  ;;  %4179 = vmatpush3.bf16.msra.mxu1 %v4176_v21 }
 0x312   : > { %v4384_v45 = vadd.f32 %v1611_v19, %v5901_v60  ;;  %v1613_v33 = vpop.f32.mrb[57].mxu0  ;;  %4181 = vmatprep.subr.bf16.mxu1 %v4180_v44 }
 0x313   : > { %v4385_v42 = vadd.f32 %v1613_v33, %v5904_v27  ;;  %1824 = vmatprep.mubr.f32.mxu1 %v1657_v5 }
 0x314   : > { %1825 = vmatmul.mubr.f32.gmra.mrb[46].mxu1 %v1656_v63  ;;  %v1658_v3 = vmax.f32 %v4384_v45, 0.0 }
 0x315   : > { %v1659_v26 = vmax.f32 %v4385_v42, 0.0  ;;  %v1617_v30 = vpop.f32.mrb[58].mxu0  ;;  %4183 = vmatpush3.bf16.msra.mxu1 %v4180_v44 }
 0x316   : > { %v4386_v23 = vadd.f32 %v1617_v30, %v5901_v60  ;;  %v1619_v1 = vpop.f32.mrb[59].mxu0 }
 0x317   : > { %v4387_v54 = vadd.f32 %v1619_v1, %v5904_v27  ;;  %1829 = vmatprep.mubr.f32.mxu1 %v1659_v26 }
 0x318   : > { %1830 = vmatmul.mubr.f32.gmra.mrb[48].mxu1 %v1658_v3  ;;  %v1660_v4 = vmax.f32 %v4386_v23, 0.0 }
 0x319   : > { %v1661_v22 = vmax.f32 %v4387_v54, 0.0  ;;  %v1623_v9 = vpop.f32.mrb[60].mxu0 }
 0x31a   : > { %v4388_v0 = vadd.f32 %v1623_v9, %v5901_v60  ;;  %v1625_v29 = vpop.f32.mrb[61].mxu0 }
 0x31b   : > { %v4389_v38 = vadd.f32 %v1625_v29, %v5904_v27  ;;  %1834 = vmatprep.mubr.f32.mxu1 %v1661_v22 }
 0x31c   : > { %1835 = vmatmul.mubr.f32.gmra.mrb[50].mxu1 %v1660_v4  ;;  %v1662_v61 = vmax.f32 %v4388_v0, 0.0 }
 0x31d   : > { %v1663_v2 = vmax.f32 %v4389_v38, 0.0  ;;  %v1629_v31 = vpop.f32.mrb[62].mxu0 }
 0x31e   : > { %v4390_v8 = vadd.f32 %v1629_v31, %v5901_v60  ;;  %v1631_v25 = vpop.f32.mrb[63].mxu0 }
 0x31f   : > { %v4391_v46 = vadd.f32 %v1631_v25, %v5904_v27  ;;  %1839 = vmatprep.mubr.f32.mxu1 %v1663_v2 }
 0x320   : > { %1840 = vmatmul.mubr.f32.gmra.mrb[52].mxu1 %v1662_v61  ;;  %v1664_v34 = vmax.f32 %v4390_v8, 0.0 }
 0x321   : > { %v1665_v32 = vmax.f32 %v4391_v46, 0.0 }
 0x323   : > { %1844 = vmatprep.mubr.f32.mxu1 %v1665_v32 }
 0x324   : > { %1845 = vmatmul.mubr.f32.gmra.mrb[54].mxu1 %v1664_v34 }
 0x3bb   : > { %v3712_v60 = vpop.f32.mrb[64].mxu0 }
 0x3bc   : > { %v3713_v27 = vpop.f32.mrb[65].mxu0 }
 0x3bd   : > { %v3714_v51 = vadd.f32 %v3713_v27, %v3712_v60 }
 0x3bf   : > { %v1772_v55 = vadd.f32 %v3714_v51, %v5981_v41  ;;  %v3715_v16 = vpop.f32.mrb[66].mxu0 }
 0x3c0   : > { %v3716_v58 = vpop.f32.mrb[67].mxu0 }
 0x3c1   : > { %v1850_v50 = vmax.f32 %v1772_v55, 0.0  ;;  %v3717_v18 = vadd.f32 %v3716_v58, %v3715_v16 }
 0x3c3   : > { %v1777_v10 = vadd.f32 %v3717_v18, %v5981_v41  ;;  %v3718_v13 = vpop.f32.mrb[68].mxu0  ;;  %3904 = vmatprep.mubr.f32.mxu1 %v1850_v50 }
 0x3c4   : > { %v3719_v47 = vpop.f32.mrb[69].mxu0 }
 0x3c5   : > { %v1851_v53 = vmax.f32 %v1777_v10, 0.0  ;;  %v3720_v35 = vadd.f32 %v3719_v47, %v3718_v13 }
 0x3c7   : > { %v1782_v39 = vadd.f32 %v3720_v35, %v5981_v41  ;;  %v3721_v11 = vpop.f32.mrb[70].mxu0  ;;  %3905 = vmatmul.mubr.f32.vlgmr.msra.gmra.mrb[56].mxu1 %v1851_v53 }
 0x3c8   : > { %v3722_v14 = vpop.f32.mrb[71].mxu0 }
 0x3c9   : > { %v1852_v57 = vmax.f32 %v1782_v39, 0.0  ;;  %v3723_v62 = vadd.f32 %v3722_v14, %v3721_v11 }
 0x3cb   : > { %v1787_v43 = vadd.f32 %v3723_v62, %v5981_v41  ;;  %v3724_v49 = vpop.f32.mrb[32].mxu1  ;;  %3907 = vmatprep.mubr.f32.mxu1 %v1852_v57 }
 0x3cc   : > { %v3725_v17 = vpop.f32.mrb[33].mxu1 }
 0x3cd   : > { %v1853_v21 = vmax.f32 %v1787_v43, 0.0  ;;  %v3726_v6 = vadd.f32 %v3725_v17, %v3724_v49 }
 0x3cf   : > { %v1792_v15 = vadd.f32 %v3726_v6, %v5981_v41  ;;  %v3727_v48 = vpop.f32.mrb[34].mxu1  ;;  %3908 = vmatmul.mubr.f32.gmra.mrb[58].mxu1 %v1853_v21  ;;  %v2211_v6 = vld [vmem:[%s6518_s10 + $0x8] sm:$0xff] }
 0x3d0   : > { %v3728_v52 = vpop.f32.mrb[35].mxu1  ;;  %2285 = vmatprep.subr.mxu1 %v2211_v6 }
 0x3d1   : > { %v1854_v40 = vmax.f32 %v1792_v15, 0.0  ;;  %v3729_v59 = vadd.f32 %v3728_v52, %v3727_v48  ;;  %v2210_v15 = vld [vmem:[%s6518_s10] sm:$0xff] }
 0x3d2   : > { %2286 = vmatpush1.msra.mxu1 %v2210_v15  ;;  %v6009_v48 = vld [vmem:[%s6517_s9] ss:$0 sm:$0xff] }
 0x3d3   : > { %v1797_v12 = vadd.f32 %v3729_v59, %v5981_v41  ;;  %v3730_v5 = vpop.f32.mrb[36].mxu1  ;;  %3910 = vmatprep.mubr.f32.mxu1 %v1854_v40 }
 0x3d4   : > { %v3731_v19 = vpop.f32.mrb[37].mxu1 }
 0x3d5   : > { %v1855_v63 = vmax.f32 %v1797_v12, 0.0  ;;  %v3732_v45 = vadd.f32 %v3731_v19, %v3730_v5 }
 0x3d7   : > { %v1802_v33 = vadd.f32 %v3732_v45, %v5981_v41  ;;  %v3733_v42 = vpop.f32.mrb[38].mxu1  ;;  %3911 = vmatmul.mubr.f32.gmra.mrb[60].mxu1 %v1855_v63  ;;  %v2213_v63 = vld [vmem:[%s6518_s10 + $0x18] sm:$0xff] }
 0x3d8   : > { %v3734_v26 = vpop.f32.mrb[39].mxu1  ;;  %2446 = vmatprep.subr.mxu0 %v2213_v63 }
 0x3d9   : > { %v1856_v30 = vmax.f32 %v1802_v33, 0.0  ;;  %v3735_v3 = vadd.f32 %v3734_v26, %v3733_v42  ;;  %v2212_v42 = vld [vmem:[%s6518_s10 + $0x10] sm:$0xff] }
 0x3da   : > { %2447 = vmatpush1.msra.mxu0 %v2212_v42 }
 0x3db   : > { %v1807_v23 = vadd.f32 %v3735_v3, %v5981_v41  ;;  %v3736_v1 = vpop.f32.mrb[40].mxu1  ;;  %3913 = vmatprep.mubr.f32.mxu1 %v1856_v30 }
 0x3dc   : > { %v3737_v54 = vpop.f32.mrb[41].mxu1 }
 0x3dd   : > { %v1857_v22 = vmax.f32 %v1807_v23, 0.0  ;;  %v3738_v9 = vadd.f32 %v3737_v54, %v3736_v1 }
 0x3df   : > { %v1812_v4 = vadd.f32 %v3738_v9, %v5981_v41  ;;  %v3739_v0 = vpop.f32.mrb[42].mxu1  ;;  %3914 = vmatmul.mubr.f32.gmra.mrb[62].mxu1 %v1857_v22 }
 0x3e0   : > { %v3740_v29 = vpop.f32.mrb[43].mxu1 }
 0x3e1   : > { %v1858_v38 = vmax.f32 %v1812_v4, 0.0  ;;  %v3741_v2 = vadd.f32 %v3740_v29, %v3739_v0 }
 0x3e3   : > { %v1817_v31 = vadd.f32 %v3741_v2, %v5981_v41  ;;  %v3742_v61 = vpop.f32.mrb[44].mxu1  ;;  %3916 = vmatprep.mubr.f32.mxu1 %v1858_v38 }
 0x3e4   : > { %v3743_v8 = vpop.f32.mrb[45].mxu1 }
 0x3e5   : > { %v1859_v25 = vmax.f32 %v1817_v31, 0.0  ;;  %v3744_v46 = vadd.f32 %v3743_v8, %v3742_v61 }
 0x3e7   : > { %v1822_v32 = vadd.f32 %v3744_v46, %v5981_v41  ;;  %v3745_v34 = vpop.f32.mrb[46].mxu1  ;;  %3917 = vmatmul.mubr.f32.gmra.mrb[64].mxu1 %v1859_v25 }
 0x3e8   : > { %v3746_v36 = vpop.f32.mrb[47].mxu1 }
 0x3e9   : > { %v1860_v56 = vmax.f32 %v1822_v32, 0.0  ;;  %v3747_v44 = vadd.f32 %v3746_v36, %v3745_v34 }
 0x3eb   : > { %v1827_v60 = vadd.f32 %v3747_v44, %v5981_v41  ;;  %v3748_v27 = vpop.f32.mrb[48].mxu1  ;;  %3919 = vmatprep.mubr.f32.mxu1 %v1860_v56 }
 0x3ec   : > { %v3749_v51 = vpop.f32.mrb[49].mxu1 }
 0x3ed   : > { %v1861_v55 = vmax.f32 %v1827_v60, 0.0  ;;  %v3750_v16 = vadd.f32 %v3749_v51, %v3748_v27 }
 0x3ef   : > { %v1832_v58 = vadd.f32 %v3750_v16, %v5981_v41  ;;  %v3751_v50 = vpop.f32.mrb[50].mxu1  ;;  %3920 = vmatmul.mubr.f32.gmra.mrb[66].mxu1 %v1861_v55 }
 0x3f0   : > { %v3752_v18 = vpop.f32.mrb[51].mxu1 }
 0x3f1   : > { %v1862_v10 = vmax.f32 %v1832_v58, 0.0  ;;  %v3753_v13 = vadd.f32 %v3752_v18, %v3751_v50 }
 0x3f3   : > { %v1837_v47 = vadd.f32 %v3753_v13, %v5981_v41  ;;  %v3754_v53 = vpop.f32.mrb[52].mxu1  ;;  %3922 = vmatprep.mubr.f32.mxu1 %v1862_v10 }
 0x3f4   : > { %v3755_v35 = vpop.f32.mrb[53].mxu1 }
 0x3f5   : > { %v1863_v39 = vmax.f32 %v1837_v47, 0.0  ;;  %v3756_v11 = vadd.f32 %v3755_v35, %v3754_v53 }
 0x3f7   : > { %v1842_v14 = vadd.f32 %v3756_v11, %v5981_v41  ;;  %v3757_v57 = vpop.f32.mrb[54].mxu1  ;;  %3923 = vmatmul.mubr.f32.gmra.mrb[68].mxu1 %v1863_v39 }
 0x3f8   : > { %v3758_v62 = vpop.f32.mrb[55].mxu1 }
 0x3f9   : > { %v1864_v43 = vmax.f32 %v1842_v14, 0.0  ;;  %v3759_v49 = vadd.f32 %v3758_v62, %v3757_v57 }
 0x3fb   : > { %v1847_v17 = vadd.f32 %v3759_v49, %v5981_v41  ;;  %3925 = vmatprep.mubr.f32.mxu1 %v1864_v43 }
 0x3fd   : > { %v1865_v21 = vmax.f32 %v1847_v17, 0.0 }
 0x3ff   : > { %3926 = vmatmul.mubr.f32.gmra.mrb[70].mxu1 %v1865_v21 }
 0x400   : > { %2349 = vmatprep.mubr.f32.mxu1 %v6564_v28 }
 0x49a   : > { %v3906_v41 = vpop.f32.mrb[56].mxu1 }
 0x49b   : > { %v6018_v52 = vadd.f32 %v3906_v41, %v6009_v48  ;;  %v1955_v40 = vpop.f32.mrb[57].mxu1 }
 0x49c   : > { %v6021_v59 = vadd.f32 %v6009_v48, %v1955_v40 }
 0x49d   : > { %2035 = vst [vmem:[%s6015_s26 + $0x8] sm:$0xff] %v6018_v52  ;;  %v2067_v12 = vmul.f32 0.5, %v6018_v52 }
 0x49e   : > { %2034 = vst [vmem:[%s6015_s26] sm:$0xff] %v6021_v59  ;;  %v2066_v5 = vmul.f32 0.5, %v6021_v59 }
 0x49f   : > { %v2084_v45 = vmul.f32 1.442695, %v2067_v12 }
 0x4a0   : > { %v2082_v19 = vmul.f32 1.442695, %v2066_v5 }
 0x4a2   : > { %4575 = vpow2.f32 %v2082_v19  ;;  %v3909_v33 = vpop.f32.mrb[58].mxu1 }
 0x4a3   : > { %v6036_v26 = vadd.f32 %v3909_v33, %v6009_v48  ;;  %v1965_v30 = vpop.f32.mrb[59].mxu1  ;;  %4577 = vpow2.f32 %v2084_v45 }
 0x4a4   : > { %v6039_v3 = vadd.f32 %v6009_v48, %v1965_v30 }
 0x4a5   : > { %2037 = vst [vmem:[%s6015_s26 + $0x18] sm:$0xff] %v6036_v26  ;;  %v2069_v23 = vmul.f32 0.5, %v6036_v26 }
 0x4a6   : > { %2036 = vst [vmem:[%s6015_s26 + $0x10] sm:$0xff] %v6039_v3  ;;  %v2068_v1 = vmul.f32 0.5, %v6039_v3 }
 0x4a7   : > { %v2088_v22 = vmul.f32 1.442695, %v2069_v23 }
 0x4a8   : > { %v2086_v54 = vmul.f32 1.442695, %v2068_v1 }
 0x4aa   : > { %4579 = vpow2.f32 %v2086_v54  ;;  %v3912_v9 = vpop.f32.mrb[60].mxu1 }
 0x4ab   : > { %v6048_v4 = vadd.f32 %v3912_v9, %v6009_v48  ;;  %v1975_v0 = vpop.f32.mrb[61].mxu1  ;;  %4581 = vpow2.f32 %v2088_v22 }
 0x4ac   : > { %v4576_v29 = vpop.eup %4575  ;;  %v6051_v38 = vadd.f32 %v6009_v48, %v1975_v0 }
 0x4ad   : > { %2039 = vst [vmem:[%s6015_s26 + $0x28] sm:$0xff] %v6048_v4  ;;  %v2071_v2 = vmul.f32 0.5, %v6048_v4  ;;  %2130 = vrot.lane.b32.xlu0 %v4576_v29, %s4905_s21  ;;  %v4578_v8 = vpop.eup %4577 }
 0x4ae   : > { %2038 = vst [vmem:[%s6015_s26 + $0x20] sm:$0xff] %v6051_v38  ;;  %v2070_v31 = vmul.f32 0.5, %v6051_v38 }
 0x4af   : > { %v2092_v61 = vmul.f32 1.442695, %v2071_v2 }
 0x4b0   : > { %v2090_v25 = vmul.f32 1.442695, %v2070_v31 }
 0x4b1   : > { %4583 = vpow2.f32 %v2092_v61  ;;  %2132 = vrot.lane.b32.xlu0 %v4578_v8, %s4905_s21 }
 0x4b2   : > { %4585 = vpow2.f32 %v2090_v25  ;;  %v3915_v46 = vpop.f32.mrb[62].mxu1  ;;  %v2672_v25 = vld [vmem:[#allocation10 + $0x8] sm:$0xff] }
 0x4b3   : > { %v6062_v32 = vadd.f32 %v3915_v46, %v6009_v48  ;;  %v1985_v34 = vpop.f32.mrb[63].mxu1  ;;  %v2674_v46 = vld [vmem:[#allocation10 + $0x18] sm:$0xff] }
 0x4b4   : > { %v4580_v36 = vpop.eup %4579  ;;  %v6065_v56 = vadd.f32 %v6009_v48, %v1985_v34  ;;  %v4184_v34 = vpack.c.bf16 %v2674_v46, %v2672_v25 }
 0x4b5   : > { %2041 = vst [vmem:[%s6015_s26 + $0x38] sm:$0xff] %v6062_v32  ;;  %v2073_v44 = vmul.f32 0.5, %v6062_v32  ;;  %2134 = vrot.lane.b32.xlu1 %v4580_v36, %s4905_s21  ;;  %v4582_v51 = vpop.eup %4581 }
 0x4b6   : > { %2040 = vst [vmem:[%s6015_s26 + $0x30] sm:$0xff] %v6065_v56  ;;  %v2072_v60 = vmul.f32 0.5, %v6065_v56  ;;  %4185 = vmatprep.subr.bf16.mxu1 %v4184_v34 }
 0x4b7   : > { %v2096_v27 = vmul.f32 1.442695, %v2073_v44 }
 0x4b8   : > { %v2094_v55 = vmul.f32 1.442695, %v2072_v60  ;;  %v2050_v60 = vld [vmem:[%s6139_s3] sm:$0xff] }
 0x4b9   : > { %4587 = vpow2.f32 %v2096_v27  ;;  %2136 = vrot.lane.b32.xlu1 %v4582_v51, %s4905_s21  ;;  %v2671_v51 = vld [vmem:[#allocation10] sm:$0xff] }
 0x4ba   : > { %4589 = vpow2.f32 %v2094_v55  ;;  %v3918_v16 = vpop.f32.mrb[64].mxu1  ;;  %v2673_v55 = vld [vmem:[#allocation10 + $0x10] sm:$0xff] }
 0x4bb   : > { %v4584_v58 = vpop.eup %4583  ;;  %v6076_v50 = vadd.f32 %v3918_v16, %v6009_v48  ;;  %v1995_v18 = vpop.f32.mrb[65].mxu1 }
 0x4bc   : > { %v4586_v10 = vpop.eup %4585  ;;  %v6079_v13 = vadd.f32 %v6009_v48, %v1995_v18  ;;  %v2678_v18 = vld [vmem:[#allocation10 + $0x38] sm:$0xff] }
 0x4bd   : > { %2043 = vst [vmem:[%s6015_s26 + $0x48] sm:$0xff] %v6076_v50  ;;  %v2075_v47 = vmul.f32 0.5, %v6076_v50  ;;  %2140 = vrot.lane.b32.xlu1 %v4584_v58, %s4905_s21  ;;  %2138 = vrot.lane.b32.xlu0 %v4586_v10, %s4905_s21  ;;  %v2676_v58 = vld [vmem:[#allocation10 + $0x28] sm:$0xff]  ;;  %v2051_v10 = vld [vmem:[%s6139_s3 + $0x8] sm:$0xff] }
 0x4be   : > { %2042 = vst [vmem:[%s6015_s26 + $0x40] sm:$0xff] %v6079_v13  ;;  %v2074_v53 = vmul.f32 0.5, %v6079_v13 }
 0x4bf   : > { %v2100_v35 = vmul.f32 1.442695, %v2075_v47 }
 0x4c0   : > { %v2098_v39 = vmul.f32 1.442695, %v2074_v53  ;;  %v4186_v53 = vpack.c.bf16 %v2673_v55, %v2671_v51  ;;  %v2694_v51 = vld [vmem:[#allocation10 + $0xb8] sm:$0xff] }
 0x4c1   : > { %4591 = vpow2.f32 %v2100_v35 }
 0x4c2   : > { %4593 = vpow2.f32 %v2098_v39  ;;  %v3921_v11 = vpop.f32.mrb[66].mxu1  ;;  %v4188_v39 = vpack.c.bf16 %v2678_v18, %v2676_v58  ;;  %v2691_v18 = vld [vmem:[#allocation10 + $0xa0] sm:$0xff] }
 0x4c3   : > { %v4588_v14 = vpop.eup %4587  ;;  %v6090_v57 = vadd.f32 %v3921_v11, %v6009_v48  ;;  %v2005_v62 = vpop.f32.mrb[67].mxu1  ;;  %v2675_v11 = vld [vmem:[#allocation10 + $0x20] sm:$0xff] }
 0x4c4   : > { %v4590_v43 = vpop.eup %4589  ;;  %v6093_v49 = vadd.f32 %v6009_v48, %v2005_v62  ;;  %2144 = vrot.lane.b32.xlu1 %v4588_v14, %s4905_s21  ;;  %v2677_v14 = vld [vmem:[#allocation10 + $0x30] sm:$0xff] }
 0x4c5   : > { %2045 = vst [vmem:[%s6015_s26 + $0x58] sm:$0xff] %v6090_v57  ;;  %v2077_v17 = vmul.f32 0.5, %v6090_v57  ;;  %2142 = vrot.lane.b32.xlu0 %v4590_v43, %s4905_s21  ;;  %v2680_v43 = vld [vmem:[#allocation10 + $0x48] sm:$0xff] }
 0x4c6   : > { %2044 = vst [vmem:[%s6015_s26 + $0x50] sm:$0xff] %v6093_v49  ;;  %v2076_v21 = vmul.f32 0.5, %v6093_v49 }
 0x4c7   : > { %v2104_v6 = vmul.f32 1.442695, %v2077_v17  ;;  %v2682_v17 = vld [vmem:[#allocation10 + $0x58] sm:$0xff] }
 0x4c8   : > { %v2102_v15 = vmul.f32 1.442695, %v2076_v21  ;;  %v2052_v21 = vld [vmem:[%s6139_s3 + $0x10] sm:$0xff] }
 0x4c9   : > { %4595 = vpow2.f32 %v2104_v6  ;;  %v4190_v6 = vpack.c.bf16 %v2677_v14, %v2675_v11  ;;  %v2057_v11 = vld [vmem:[%s6139_s3 + $0x38] sm:$0xff] }
 0x4ca   : > { %4597 = vpow2.f32 %v2102_v15  ;;  %v3924_v41 = vpop.f32.mrb[68].mxu1 }
 0x4cb   : > { %v4592_v40 = vpop.eup %4591  ;;  %v6104_v12 = vadd.f32 %v3924_v41, %v6009_v48  ;;  %v2015_v5 = vpop.f32.mrb[69].mxu1  ;;  %v4192_v41 = vpack.c.bf16 %v2682_v17, %v2680_v43  ;;  %v2695_v17 = vld [vmem:[#allocation10 + $0xc0] sm:$0xff] }
 0x4cc   : > { %v4594_v19 = vpop.eup %4593  ;;  %v6107_v63 = vadd.f32 %v6009_v48, %v2015_v5  ;;  %2148 = vrot.lane.b32.xlu1 %v4592_v40, %s4905_s21  ;;  %v2679_v40 = vld [vmem:[#allocation10 + $0x40] sm:$0xff]  ;;  %v2681_v5 = vld [vmem:[#allocation10 + $0x50] sm:$0xff] }
 0x4cd   : > { %2047 = vst [vmem:[%s6015_s26 + $0x68] sm:$0xff] %v6104_v12  ;;  %v2079_v45 = vmul.f32 0.5, %v6104_v12  ;;  %2146 = vrot.lane.b32.xlu0 %v4594_v19, %s4905_s21 }
 0x4ce   : > { %2046 = vst [vmem:[%s6015_s26 + $0x60] sm:$0xff] %v6107_v63  ;;  %v2078_v33 = vmul.f32 0.5, %v6107_v63 }
 0x4cf   : > { %v2108_v42 = vmul.f32 1.442695, %v2079_v45  ;;  %v2684_v45 = vld [vmem:[#allocation10 + $0x68] sm:$0xff] }
 0x4d0   : > { %v2106_v30 = vmul.f32 1.442695, %v2078_v33  ;;  %v2686_v33 = vld [vmem:[#allocation10 + $0x78] sm:$0xff] }
 0x4d1   : > { %4599 = vpow2.f32 %v2108_v42  ;;  %v2053_v42 = vld [vmem:[%s6139_s3 + $0x18] sm:$0xff] }
 0x4d2   : > { %4601 = vpow2.f32 %v2106_v30  ;;  %v3927_v23 = vpop.f32.mrb[70].mxu1  ;;  %v4194_v30 = vpack.c.bf16 %v2681_v5, %v2679_v40 }
 0x4d3   : > { %v4596_v1 = vpop.eup %4595  ;;  %v6118_v54 = vadd.f32 %v3927_v23, %v6009_v48  ;;  %v2025_v22 = vpop.f32.mrb[71].mxu1 }
 0x4d4   : > { %v4598_v9 = vpop.eup %4597  ;;  %v6121_v0 = vadd.f32 %v6009_v48, %v2025_v22  ;;  %2152 = vrot.lane.b32.xlu1 %v4596_v1, %s4905_s21  ;;  %v4196_v1 = vpack.c.bf16 %v2686_v33, %v2684_v45  ;;  %v2683_v22 = vld [vmem:[#allocation10 + $0x60] sm:$0xff]  ;;  %v2701_v45 = vld [vmem:[#allocation10 + $0xf0] sm:$0xff]  ;;  %v2704_v33 = vld [vmem:[#allocation10 + $0x108] sm:$0xff] }
 0x4d5   : > { %2049 = vst [vmem:[%s6015_s26 + $0x78] sm:$0xff] %v6118_v54  ;;  %v2081_v29 = vmul.f32 0.5, %v6118_v54  ;;  %2150 = vrot.lane.b32.xlu0 %v4598_v9, %s4905_s21  ;;  %v2685_v9 = vld [vmem:[#allocation10 + $0x70] sm:$0xff] }
 0x4d6   : > { %2048 = vst [vmem:[%s6015_s26 + $0x70] sm:$0xff] %v6121_v0  ;;  %v2080_v2 = vmul.f32 0.5, %v6121_v0 }
 0x4d7   : > { %v2112_v31 = vmul.f32 1.442695, %v2081_v29 }
 0x4d8   : > { %v2110_v61 = vmul.f32 1.442695, %v2080_v2  ;;  %v2688_v2 = vld [vmem:[#allocation10 + $0x88] sm:$0xff] }
 0x4d9   : > { %4603 = vpow2.f32 %v2112_v31  ;;  %v2690_v31 = vld [vmem:[#allocation10 + $0x98] sm:$0xff] }
 0x4da   : > { %4605 = vpow2.f32 %v2110_v61  ;;  %v4200_v34 = vpack.c.bf16 %v2690_v31, %v2688_v2  ;;  %v2705_v2 = vld [vmem:[#allocation10 + $0x110] sm:$0xff] }
 0x4db   : > { %v4600_v8 = vpop.eup %4599 }
 0x4dc   : > { %v4602_v48 = vpop.eup %4601  ;;  %2156 = vrot.lane.b32.xlu1 %v4600_v8, %s4905_s21  ;;  %v4198_v8 = vpack.c.bf16 %v2685_v9, %v2683_v22 }
 0x4dd   : > { %2154 = vrot.lane.b32.xlu0 %v4602_v48, %s4905_s21  ;;  %v2055_v48 = vld [vmem:[%s6139_s3 + $0x28] sm:$0xff] }
 0x4e3   : > { %v4604_v36 = vpop.eup %4603 }
 0x4e4   : > { %v4606_v44 = vpop.eup %4605  ;;  %2160 = vrot.lane.b32.xlu1 %v4604_v36, %s4905_s21  ;;  %v2687_v36 = vld [vmem:[#allocation10 + $0x80] sm:$0xff] }
 0x4e5   : > { %2158 = vrot.lane.b32.xlu0 %v4606_v44, %s4905_s21  ;;  %v2689_v44 = vld [vmem:[#allocation10 + $0x90] sm:$0xff] }
 0x51f   : > { %v2131_v27 = vpop.permute.xlu0 %2130 }
 0x520   : > { %v2178_v16 = vmul.f32 %v2131_v27, %v2050_v60  ;;  %v2692_v27 = vld [vmem:[#allocation10 + $0xa8] sm:$0xff] }
 0x521   : > { %v4204_v58 = vpack.c.bf16 %v2694_v51, %v2692_v27  ;;  %v2061_v51 = vld [vmem:[%s6139_s3 + $0x58] sm:$0xff] }
 0x522   : > { %v2194_v47 = vadd.f32 %v2178_v16, %v6021_v59  ;;  %v4202_v16 = vpack.c.bf16 %v2689_v44, %v2687_v36  ;;  %v2712_v36 = vld [vmem:[#allocation10 + $0x148] sm:$0xff]  ;;  %v2714_v44 = vld [vmem:[#allocation10 + $0x158] sm:$0xff] }
 0x523   : > { %v2133_v35 = vpop.permute.xlu0 %2132 }
 0x524   : > { %v2179_v62 = vmul.f32 %v2133_v35, %v2051_v10  ;;  %3645 = vmatmul.mubr.msk.f32.vlgmr.msra.gmra.mrb[72].mxu1 %vm2236_vm0, %v2194_v47  ;;  %3661 = vmatmul.mubr.msk.f32.vlgmr.msra.gmra.mrb[72].mxu0 %vm2236_vm0, %v2194_v47  ;;  %v2693_v10 = vld [vmem:[#allocation10 + $0xb0] sm:$0xff]  ;;  %v2696_v47 = vld [vmem:[#allocation10 + $0xc8] sm:$0xff] }
 0x525   : > { %2355 = vmatprep.mubr.f32.mxu1 %v6564_v28  ;;  %2516 = vmatprep.mubr.f32.mxu0 %v6564_v28  ;;  %v2056_v35 = vld [vmem:[%s6139_s3 + $0x30] sm:$0xff] }
 0x526   : > { %v2195_v59 = vadd.f32 %v2179_v62, %v6018_v52  ;;  %4187 = vmatpush1.bf16.msra.mxu1 %v4186_v53  ;;  %v2698_v53 = vld [vmem:[#allocation10 + $0xd8] sm:$0xff] }
 0x527   : > { %v2135_v15 = vpop.permute.xlu1 %2134  ;;  %4189 = vmatprep.subr.bf16.mxu1 %v4188_v39  ;;  %v4206_v39 = vpack.c.bf16 %v2693_v10, %v2691_v18  ;;  %v4208_v43 = vpack.c.bf16 %v2698_v53, %v2696_v47  ;;  %v2713_v18 = vld [vmem:[#allocation10 + $0x150] sm:$0xff]  ;;  %v2716_v47 = vld [vmem:[#allocation10 + $0x168] sm:$0xff]  ;;  %v2718_v53 = vld [vmem:[#allocation10 + $0x178] sm:$0xff] }
 0x528   : > { %v2180_v19 = vmul.f32 %v2135_v15, %v2052_v21  ;;  %3646 = vmatmul.mubr.msk.f32.gmra.mrb[74].mxu1 %vm2236_vm0, %v2195_v59  ;;  %3662 = vmatmul.mubr.msk.f32.gmra.mrb[74].mxu0 %vm2236_vm0, %v2195_v59  ;;  %v2697_v21 = vld [vmem:[#allocation10 + $0xd0] sm:$0xff]  ;;  %v2702_v15 = vld [vmem:[#allocation10 + $0xf8] sm:$0xff] }
 0x529   : > { %2361 = vmatprep.mubr.f32.mxu1 %v6564_v28  ;;  %2522 = vmatprep.mubr.f32.mxu0 %v6564_v28  ;;  %v4210_v40 = vpack.c.bf16 %v2697_v21, %v2695_v17  ;;  %v2062_v17 = vld [vmem:[%s6139_s3 + $0x60] sm:$0xff] }
 0x52a   : > { %v2196_v52 = vadd.f32 %v2180_v19, %v6039_v3  ;;  %4191 = vmatpush1.bf16.msra.mxu1 %v4190_v6  ;;  %v2054_v3 = vld [vmem:[%s6139_s3 + $0x20] sm:$0xff]  ;;  %v2700_v6 = vld [vmem:[#allocation10 + $0xe8] sm:$0xff]  ;;  %v2699_v19 = vld [vmem:[#allocation10 + $0xe0] sm:$0xff] }
 0x52b   : > { %v2137_v23 = vpop.permute.xlu1 %2136  ;;  %4193 = vmatprep.subr.bf16.mxu1 %v4192_v41  ;;  %v4212_v5 = vpack.c.bf16 %v2702_v15, %v2700_v6 }
 0x52c   : > { %v2181_v29 = vmul.f32 %v2137_v23, %v2053_v42  ;;  %3647 = vmatmul.mubr.msk.f32.gmra.mrb[76].mxu1 %vm2236_vm0, %v2196_v52  ;;  %3663 = vmatmul.mubr.msk.f32.gmra.mrb[76].mxu0 %vm2236_vm0, %v2196_v52  ;;  %v2706_v42 = vld [vmem:[#allocation10 + $0x118] sm:$0xff]  ;;  %v2059_v23 = vld [vmem:[%s6139_s3 + $0x48] sm:$0xff] }
 0x52d   : > { %2367 = vmatprep.mubr.f32.mxu1 %v6564_v28  ;;  %2528 = vmatprep.mubr.f32.mxu0 %v6564_v28  ;;  %v2058_v52 = vld [vmem:[%s6139_s3 + $0x40] sm:$0xff]  ;;  %v4216_v9 = vpack.c.bf16 %v2706_v42, %v2704_v33 }
 0x52e   : > { %v2197_v61 = vadd.f32 %v2181_v29, %v6036_v26  ;;  %4195 = vmatpush1.bf16.msra.mxu1 %v4194_v30  ;;  %v4214_v30 = vpack.c.bf16 %v2701_v45, %v2699_v19  ;;  %v2703_v29 = vld [vmem:[#allocation10 + $0x100] sm:$0xff]  ;;  %v2724_v19 = vld [vmem:[#allocation10 + $0x1a8] sm:$0xff]  ;;  %v2726_v45 = vld [vmem:[#allocation10 + $0x1b8] sm:$0xff] }
 0x52f   : > { %v2141_v25 = vpop.permute.xlu1 %2140  ;;  %v2139_v46 = vpop.permute.xlu0 %2138  ;;  %4197 = vmatprep.subr.bf16.mxu1 %v4196_v1 }
 0x530   : > { %v2182_v60 = vmul.f32 %v2139_v46, %v2054_v3  ;;  %3648 = vmatmul.mubr.msk.f32.gmra.mrb[78].mxu1 %vm2236_vm0, %v2197_v61  ;;  %3664 = vmatmul.mubr.msk.f32.gmra.mrb[78].mxu0 %vm2236_vm0, %v2197_v61  ;;  %v2183_v26 = vmul.f32 %v2141_v25, %v2055_v48  ;;  %v2708_v3 = vld [vmem:[#allocation10 + $0x128] sm:$0xff]  ;;  %v2710_v61 = vld [vmem:[#allocation10 + $0x138] sm:$0xff]  ;;  %v4218_v48 = vpack.c.bf16 %v2705_v2, %v2703_v29  ;;  %v2707_v46 = vld [vmem:[#allocation10 + $0x120] sm:$0xff] }
 0x531   : > { %2373 = vmatprep.mubr.f32.mxu1 %v6564_v28  ;;  %2534 = vmatprep.mubr.f32.mxu0 %v6564_v28  ;;  %v4220_v25 = vpack.c.bf16 %v2710_v61, %v2708_v3  ;;  %v2065_v29 = vld [vmem:[%s6139_s3 + $0x78] sm:$0xff]  ;;  %v2727_v61 = vld [vmem:[#allocation10 + $0x1c0] sm:$0xff] }
 0x532   : > { %v2198_v55 = vadd.f32 %v2182_v60, %v6051_v38  ;;  %4199 = vmatpush1.bf16.msra.mxu1 %v4198_v8  ;;  %v2199_v38 = vadd.f32 %v2183_v26, %v6048_v4  ;;  %v2060_v60 = vld [vmem:[%s6139_s3 + $0x50] sm:$0xff] }
 0x533   : > { %4201 = vmatprep.subr.bf16.mxu1 %v4200_v34  ;;  %v2709_v34 = vld [vmem:[#allocation10 + $0x130] sm:$0xff] }
 0x534   : > { %3649 = vmatmul.mubr.msk.f32.gmra.mrb[80].mxu1 %vm2236_vm0, %v2198_v55  ;;  %3665 = vmatmul.mubr.msk.f32.gmra.mrb[80].mxu0 %vm2236_vm0, %v2198_v55  ;;  %v4222_v27 = vpack.c.bf16 %v2709_v34, %v2707_v46  ;;  %v2732_v34 = vld [vmem:[#allocation10 + $0x1e8] sm:$0xff] }
 0x535   : > { %2379 = vmatprep.mubr.f32.mxu1 %v6564_v28  ;;  %2540 = vmatprep.mubr.f32.mxu0 %v6564_v28 }
 0x536   : > { %4203 = vmatpush1.bf16.msra.mxu1 %v4202_v16  ;;  %v2145_v14 = vpop.permute.xlu1 %2144  ;;  %v4224_v16 = vpack.c.bf16 %v2714_v44, %v2712_v36  ;;  %v2731_v44 = vld [vmem:[#allocation10 + $0x1e0] sm:$0xff] }
 0x537   : > { %v2143_v62 = vpop.permute.xlu0 %2142  ;;  %4205 = vmatprep.subr.bf16.mxu1 %v4204_v58  ;;  %v2185_v4 = vmul.f32 %v2145_v14, %v2057_v11  ;;  %v2711_v58 = vld [vmem:[#allocation10 + $0x140] sm:$0xff]  ;;  %v2717_v14 = vld [vmem:[#allocation10 + $0x170] sm:$0xff] }
 0x538   : > { %v2184_v59 = vmul.f32 %v2143_v62, %v2056_v35  ;;  %3650 = vmatmul.mubr.msk.f32.gmra.mrb[82].mxu1 %vm2236_vm0, %v2199_v38  ;;  %3666 = vmatmul.mubr.msk.f32.gmra.mrb[82].mxu0 %vm2236_vm0, %v2199_v38  ;;  %v4226_v38 = vpack.c.bf16 %v2713_v18, %v2711_v58  ;;  %v2715_v11 = vld [vmem:[#allocation10 + $0x160] sm:$0xff]  ;;  %v2720_v62 = vld [vmem:[#allocation10 + $0x188] sm:$0xff] }
 0x539   : > { %2385 = vmatprep.mubr.f32.mxu1 %v6564_v28  ;;  %2546 = vmatprep.mubr.f32.mxu0 %v6564_v28  ;;  %v4230_v21 = vpack.c.bf16 %v2717_v14, %v2715_v11  ;;  %v2739_v11 = vld [vmem:[#allocation10 + $0x220] sm:$0xff]  ;;  %v2741_v14 = vld [vmem:[#allocation10 + $0x230] sm:$0xff] }
 0x53a   : > { %v2200_v41 = vadd.f32 %v2184_v59, %v6065_v56  ;;  %4207 = vmatpush1.bf16.msra.mxu1 %v4206_v39  ;;  %v2201_v56 = vadd.f32 %v2185_v4, %v6062_v32  ;;  %v4228_v39 = vpack.c.bf16 %v2718_v53, %v2716_v47  ;;  %v2063_v59 = vld [vmem:[%s6139_s3 + $0x68] sm:$0xff] }
 0x53b   : > { %4209 = vmatprep.subr.bf16.mxu1 %v4208_v43  ;;  %v2722_v43 = vld [vmem:[#allocation10 + $0x198] sm:$0xff]  ;;  %v2735_v53 = vld [vmem:[#allocation10 + $0x200] sm:$0xff] }
 0x53c   : > { %3651 = vmatmul.mubr.msk.f32.gmra.mrb[84].mxu1 %vm2236_vm0, %v2200_v41  ;;  %3667 = vmatmul.mubr.msk.f32.gmra.mrb[84].mxu0 %vm2236_vm0, %v2200_v41  ;;  %v4232_v4 = vpack.c.bf16 %v2722_v43, %v2720_v62  ;;  %v2719_v41 = vld [vmem:[#allocation10 + $0x180] sm:$0xff]  ;;  %v3182_v43 = vld [vmem:[#allocation12 + $0x88] sm:$0xff] }
 0x53d   : > { %2391 = vmatprep.mubr.f32.mxu1 %v6564_v28  ;;  %2552 = vmatprep.mubr.f32.mxu0 %v6564_v28  ;;  %v3181_v62 = vld [vmem:[#allocation12 + $0x80] sm:$0xff] }
 0x53e   : > { %4211 = vmatpush1.bf16.msra.mxu1 %v4210_v40  ;;  %v2149_v1 = vpop.permute.xlu1 %2148  ;;  %v2721_v40 = vld [vmem:[#allocation10 + $0x190] sm:$0xff] }
 0x53f   : > { %v2147_v22 = vpop.permute.xlu0 %2146  ;;  %4213 = vmatprep.subr.bf16.mxu1 %v4212_v5  ;;  %v2187_v32 = vmul.f32 %v2149_v1, %v2059_v23  ;;  %v4234_v42 = vpack.c.bf16 %v2721_v40, %v2719_v41  ;;  %v2728_v23 = vld [vmem:[#allocation10 + $0x1c8] sm:$0xff]  ;;  %v2730_v1 = vld [vmem:[#allocation10 + $0x1d8] sm:$0xff]  ;;  %v3183_v40 = vld [vmem:[#allocation12 + $0x90] sm:$0xff] }
 0x540   : > { %v2186_v31 = vmul.f32 %v2147_v22, %v2058_v52  ;;  %3652 = vmatmul.mubr.msk.f32.gmra.mrb[86].mxu1 %vm2236_vm0, %v2201_v56  ;;  %3668 = vmatmul.mubr.msk.f32.gmra.mrb[86].mxu0 %vm2236_vm0, %v2201_v56  ;;  %v4236_v52 = vpack.c.bf16 %v2726_v45, %v2724_v19  ;;  %v2723_v56 = vld [vmem:[#allocation10 + $0x1a0] sm:$0xff]  ;;  %v2064_v22 = vld [vmem:[%s6139_s3 + $0x70] sm:$0xff]  ;;  %v4240_v3 = vpack.c.bf16 %v2730_v1, %v2728_v23  ;;  %v2746_v1 = vld [vmem:[#allocation10 + $0x258] sm:$0xff] }
 0x541   : > { %2397 = vmatprep.mubr.f32.mxu1 %v6564_v28  ;;  %2558 = vmatprep.mubr.f32.mxu0 %v6564_v28  ;;  %v3166_v41 = vld [vmem:[#allocation12 + $0x8] sm:$0xff] }
 0x542   : > { %v2202_v8 = vadd.f32 %v2186_v31, %v6079_v13  ;;  %4215 = vmatpush1.bf16.msra.mxu1 %v4214_v30  ;;  %v2203_v13 = vadd.f32 %v2187_v32, %v6076_v50  ;;  %v2725_v30 = vld [vmem:[#allocation10 + $0x1b0] sm:$0xff] }
 0x543   : > { %4217 = vmatprep.subr.bf16.mxu1 %v4216_v9  ;;  %v4238_v9 = vpack.c.bf16 %v2725_v30, %v2723_v56  ;;  %v2729_v32 = vld [vmem:[#allocation10 + $0x1d0] sm:$0xff]  ;;  %v3168_v30 = vld [vmem:[#allocation12 + $0x18] sm:$0xff] }
 0x544   : > { %3653 = vmatmul.mubr.msk.f32.gmra.mrb[88].mxu1 %vm2236_vm0, %v2202_v8  ;;  %3669 = vmatmul.mubr.msk.f32.gmra.mrb[88].mxu0 %vm2236_vm0, %v2202_v8  ;;  %v3167_v56 = vld [vmem:[#allocation12 + $0x10] sm:$0xff] }
 0x545   : > { %2403 = vmatprep.mubr.f32.mxu1 %v6564_v28  ;;  %2564 = vmatprep.mubr.f32.mxu0 %v6564_v28 }
 0x546   : > { %4219 = vmatpush1.bf16.msra.mxu1 %v4218_v48  ;;  %v2153_v26 = vpop.permute.xlu1 %2152 }
 0x547   : > { %v2151_v55 = vpop.permute.xlu0 %2150  ;;  %4221 = vmatprep.subr.bf16.mxu1 %v4220_v25  ;;  %v2189_v50 = vmul.f32 %v2153_v26, %v2061_v51  ;;  %v4242_v25 = vpack.c.bf16 %v2729_v32, %v2727_v61  ;;  %v2738_v51 = vld [vmem:[#allocation10 + $0x218] sm:$0xff]  ;;  %v4254_v61 = vpack.c.bf16 %v2741_v14, %v2739_v11  ;;  %v2743_v32 = vld [vmem:[#allocation10 + $0x240] sm:$0xff] }
 0x548   : > { %v2188_v10 = vmul.f32 %v2151_v55, %v2060_v60  ;;  %3654 = vmatmul.mubr.msk.f32.gmra.mrb[90].mxu1 %vm2236_vm0, %v2203_v13  ;;  %3670 = vmatmul.mubr.msk.f32.gmra.mrb[90].mxu0 %vm2236_vm0, %v2203_v13  ;;  %v2733_v60 = vld [vmem:[#allocation10 + $0x1f0] sm:$0xff]  ;;  %v3172_v11 = vld [vmem:[#allocation12 + $0x38] sm:$0xff] }
 0x549   : > { %2409 = vmatprep.mubr.f32.mxu1 %v6564_v28  ;;  %2570 = vmatprep.mubr.f32.mxu0 %v6564_v28  ;;  %v4246_v13 = vpack.c.bf16 %v2733_v60, %v2731_v44  ;;  %v2745_v44 = vld [vmem:[#allocation10 + $0x250] sm:$0xff] }
 0x54a   : > { %v2204_v35 = vadd.f32 %v2188_v10, %v6093_v49  ;;  %4223 = vmatpush1.bf16.msra.mxu1 %v4222_v27  ;;  %v2205_v49 = vadd.f32 %v2189_v50, %v6090_v57  ;;  %v2736_v27 = vld [vmem:[#allocation10 + $0x208] sm:$0xff]  ;;  %v2737_v50 = vld [vmem:[#allocation10 + $0x210] sm:$0xff] }
 0x54b   : > { %4225 = vmatprep.subr.bf16.mxu1 %v4224_v16  ;;  %v4248_v26 = vpack.c.bf16 %v2738_v51, %v2736_v27  ;;  %v3187_v60 = vld [vmem:[#allocation12 + $0xb0] sm:$0xff]  ;;  %v2748_v51 = vld [vmem:[#allocation10 + $0x268] sm:$0xff] }
 0x54c   : > { %3655 = vmatmul.mubr.msk.f32.gmra.mrb[92].mxu1 %vm2236_vm0, %v2204_v35  ;;  %3671 = vmatmul.mubr.msk.f32.gmra.mrb[92].mxu0 %vm2236_vm0, %v2204_v35 }
 0x54d   : > { %2415 = vmatprep.mubr.f32.mxu1 %v6564_v28  ;;  %2576 = vmatprep.mubr.f32.mxu0 %v6564_v28 }
 0x54e   : > { %4227 = vmatpush1.bf16.msra.mxu1 %v4226_v38  ;;  %v2157_v6 = vpop.permute.xlu1 %2156  ;;  %v2740_v38 = vld [vmem:[#allocation10 + $0x228] sm:$0xff] }
 0x54f   : > { %v2155_v15 = vpop.permute.xlu0 %2154  ;;  %4229 = vmatprep.subr.bf16.mxu1 %v4228_v39  ;;  %v2191_v57 = vmul.f32 %v2157_v6, %v2063_v59  ;;  %v2742_v39 = vld [vmem:[#allocation10 + $0x238] sm:$0xff]  ;;  %v4250_v6 = vpack.c.bf16 %v2737_v50, %v2735_v53  ;;  %v4258_v50 = vpack.c.bf16 %v2745_v44, %v2743_v32  ;;  %v2755_v44 = vld [vmem:[#allocation10 + $0x2a0] sm:$0xff] }
 0x550   : > { %v2190_v5 = vmul.f32 %v2155_v15, %v2062_v17  ;;  %3656 = vmatmul.mubr.msk.f32.gmra.mrb[94].mxu1 %vm2236_vm0, %v2205_v49  ;;  %3672 = vmatmul.mubr.msk.f32.gmra.mrb[94].mxu0 %vm2236_vm0, %v2205_v49  ;;  %v3165_v17 = vld [vmem:[#allocation12] sm:$0xff]  ;;  %v6256_v15 = vld [vmem:[#allocation10 + $0x248] sm:$0xff] }
 0x551   : > { %2421 = vmatprep.mubr.f32.mxu1 %v6564_v28  ;;  %2582 = vmatprep.mubr.f32.mxu0 %v6564_v28 }
 0x552   : > { %v2206_v33 = vadd.f32 %v2190_v5, %v6107_v63  ;;  %4231 = vmatpush1.bf16.msra.mxu1 %v4230_v21  ;;  %v2207_v63 = vadd.f32 %v2191_v57, %v6104_v12 }
 0x553   : > { %4233 = vmatprep.subr.bf16.mxu1 %v4232_v4  ;;  %v4312_v4 = vpack.c.bf16 %v3182_v43, %v3181_v62 }
 0x554   : > { %3657 = vmatmul.mubr.msk.f32.gmra.mrb[96].mxu1 %vm2236_vm0, %v2206_v33  ;;  %3673 = vmatmul.mubr.msk.f32.gmra.mrb[96].mxu0 %vm2236_vm0, %v2206_v33  ;;  %v4252_v33 = vpack.c.bf16 %v2742_v39, %v2740_v38  ;;  %v3171_v39 = vld [vmem:[#allocation12 + $0x30] sm:$0xff] }
 0x555   : > { %2427 = vmatprep.mubr.f32.mxu1 %v6564_v28  ;;  %2588 = vmatprep.mubr.f32.mxu0 %v6564_v28 }
 0x556   : > { %4235 = vmatpush1.bf16.msra.mxu1 %v4234_v42  ;;  %v2161_v2 = vpop.permute.xlu1 %2160  ;;  %v4314_v42 = vpack.c.bf16 %v3166_v41, %v3165_v17  ;;  %4313 = vmatprep.subr.bf16.mxu0 %v4312_v4  ;;  %v2752_v41 = vld [vmem:[#allocation10 + $0x288] sm:$0xff] }
 0x557   : > { %v2159_v31 = vpop.permute.xlu0 %2158  ;;  %4237 = vmatprep.subr.bf16.mxu1 %v4236_v52  ;;  %v2193_v48 = vmul.f32 %v2161_v2, %v2065_v29  ;;  %v3184_v52 = vld [vmem:[#allocation12 + $0x98] sm:$0xff]  ;;  %v4318_v29 = vpack.c.bf16 %v3168_v30, %v3167_v56  ;;  %v3173_v30 = vld [vmem:[#allocation12 + $0x40] sm:$0xff] }
 0x558   : > { %v2192_v8 = vmul.f32 %v2159_v31, %v2064_v22  ;;  %3658 = vmatmul.mubr.msk.f32.gmra.mrb[98].mxu1 %vm2236_vm0, %v2207_v63  ;;  %3674 = vmatmul.mubr.msk.f32.gmra.mrb[98].mxu0 %vm2236_vm0, %v2207_v63  ;;  %v4316_v22 = vpack.c.bf16 %v3184_v52, %v3183_v40  ;;  %v3185_v63 = vld [vmem:[#allocation12 + $0xa0] sm:$0xff]  ;;  %v2754_v40 = vld [vmem:[#allocation10 + $0x298] sm:$0xff] }
 0x559   : > { %2433 = vmatprep.mubr.f32.mxu1 %v6564_v28  ;;  %2594 = vmatprep.mubr.f32.mxu0 %v6564_v28  ;;  %v2209_v46 = vadd.f32 %v2193_v48, %v6118_v54  ;;  %v3169_v48 = vld [vmem:[#allocation12 + $0x20] sm:$0xff] }
 0x55a   : > { %v2208_v12 = vadd.f32 %v2192_v8, %v6121_v0  ;;  %4239 = vmatpush1.bf16.msra.mxu1 %v4238_v9  ;;  %v2734_v0 = vld [vmem:[#allocation10 + $0x1f8] sm:$0xff]  ;;  %v3186_v9 = vld [vmem:[#allocation12 + $0xa8] sm:$0xff]  ;;  %4315 = vmatpush3.bf16.msra.mxu0 %v4314_v42  ;;  %v2751_v52 = vld [vmem:[#allocation10 + $0x280] sm:$0xff] }
 0x55b   : > { %4241 = vmatprep.subr.bf16.mxu1 %v4240_v3  ;;  %v4244_v36 = vpack.c.bf16 %v2734_v0, %v2732_v34  ;;  %4317 = vmatprep.subr.bf16.mxu0 %v4316_v22  ;;  %v4320_v8 = vpack.c.bf16 %v3186_v9, %v3185_v63 }
 0x55c   : > { %3659 = vmatmul.mubr.msk.f32.gmra.mrb[100].mxu1 %vm2236_vm0, %v2208_v12  ;;  %3675 = vmatmul.mubr.msk.f32.gmra.mrb[100].mxu0 %vm2236_vm0, %v2208_v12  ;;  %v3170_v12 = vld [vmem:[#allocation12 + $0x28] sm:$0xff] }
 0x55d   : > { %2439 = vmatprep.mubr.f32.mxu1 %v6564_v28  ;;  %2600 = vmatprep.mubr.f32.mxu0 %v6564_v28  ;;  %v6238_v28 = vld [vmem:[%s6519_s11] sm:$0xf] }
 0x55e   : > { %4243 = vmatpush1.bf16.msra.mxu1 %v4242_v25  ;;  %v6242_v54 = vrot.slane %v6238_v28, %v6562_v37  ;;  %v6246_v55 = vrot.slane %v6238_v28, %v6563_v20  ;;  %4319 = vmatpush3.bf16.msra.mxu0 %v4318_v29  ;;  %v4264_v29 = vpack.c.bf16 %v2754_v40, %v2752_v41  ;;  %v3177_v41 = vld [vmem:[#allocation12 + $0x60] sm:$0xff]  ;;  %v3178_v40 = vld [vmem:[#allocation12 + $0x68] sm:$0xff] }
 0x55f   : > { %4245 = vmatprep.subr.bf16.mxu1 %v4244_v36  ;;  %v4256_v36 = vpack.c.bf16 %v2746_v1, %v6256_v15  ;;  %4321 = vmatprep.subr.bf16.mxu0 %v4320_v8  ;;  %v3190_v15 = vld [vmem:[#allocation12 + $0xc8] sm:$0xff] }
 0x560   : > { %3660 = vmatmul.mubr.msk.f32.gmra.mrb[102].mxu1 %vm2236_vm0, %v2209_v46  ;;  %3676 = vmatmul.mubr.msk.f32.gmra.mrb[102].mxu0 %vm2236_vm0, %v2209_v46  ;;  %v2756_v8 = vld [vmem:[#allocation10 + $0x2a8] sm:$0xff] }
 0x562   : > { %4247 = vmatpush1.bf16.msra.mxu1 %v4246_v13  ;;  %v3188_v13 = vld [vmem:[#allocation12 + $0xb8] sm:$0xff] }
 0x563   : > { %4249 = vmatprep.subr.bf16.mxu1 %v4248_v26  ;;  %v2750_v26 = vld [vmem:[#allocation10 + $0x278] sm:$0xff]  ;;  %v4324_v38 = vpack.c.bf16 %v3188_v13, %v3187_v60  ;;  %v3175_v13 = vld [vmem:[#allocation12 + $0x50] sm:$0xff] }
 0x5f7   : > { %v2351_v16 = vpop.f32.mrb[72].mxu1  ;;  %v6248_v58 = vpop.f32.mrb[72].mxu0 }
 0x5f8   : > { %v2352_v18 = vadd.f32 %v2351_v16, %v6242_v54  ;;  %v2353_v10 = vpop.f32.mrb[73].mxu1  ;;  %v6251_v47 = vpop.f32.mrb[73].mxu0  ;;  %v4322_v16 = vpack.c.bf16 %v3170_v12, %v3169_v48  ;;  %v2758_v48 = vld [vmem:[#allocation10 + $0x2b8] sm:$0xff] }
 0x5f9   : > { %v2354_v35 = vadd.f32 %v2353_v10, %v6246_v55 }
 0x5fa   : > { %v2607_v5 = vmax.f32 %v2352_v18, 0.0  ;;  %4323 = vmatpush3.bf16.msra.mxu0 %v4322_v16 }
 0x5fb   : > { %v2608_v49 = vmax.f32 %v2354_v35, 0.0  ;;  %v2357_v21 = vpop.f32.mrb[74].mxu1  ;;  %v6254_v59 = vpop.f32.mrb[74].mxu0  ;;  %v2747_v35 = vld [vmem:[#allocation10 + $0x260] sm:$0xff]  ;;  %4325 = vmatprep.subr.bf16.mxu0 %v4324_v38  ;;  %v3194_v38 = vld [vmem:[#allocation12 + $0xe8] sm:$0xff] }
 0x5fc   : > { %v2358_v19 = vadd.f32 %v2357_v21, %v6242_v54  ;;  %v2359_v45 = vpop.f32.mrb[75].mxu1  ;;  %v6259_v57 = vpop.f32.mrb[75].mxu0  ;;  %v2749_v21 = vld [vmem:[#allocation10 + $0x270] sm:$0xff] }
 0x5fd   : > { %v2360_v23 = vadd.f32 %v2359_v45, %v6246_v55  ;;  %2875 = vmatprep.mubr.f32.mxu1 %v2608_v49  ;;  %v4260_v49 = vpack.c.bf16 %v2750_v26, %v2748_v51  ;;  %v4262_v42 = vpack.c.bf16 %v2749_v21, %v2747_v35  ;;  %v3193_v35 = vld [vmem:[#allocation12 + $0xe0] sm:$0xff] }
 0x5fe   : > { %2876 = vmatmul.mubr.f32.vlgmr.msra.gmra.mrb[104].mxu1 %v2607_v5  ;;  %v2611_v25 = vmax.f32 %v2358_v19, 0.0  ;;  %v4326_v5 = vpack.c.bf16 %v3172_v11, %v3171_v39  ;;  %v2760_v11 = vld [vmem:[#allocation10 + $0x2c8] sm:$0xff] }
 0x5ff   : > { %v2612_v2 = vmax.f32 %v2360_v23, 0.0  ;;  %4251 = vmatpush1.bf16.msra.mxu1 %v4250_v6  ;;  %v2363_v31 = vpop.f32.mrb[76].mxu1  ;;  %v6262_v3 = vpop.f32.mrb[76].mxu0  ;;  %v3189_v6 = vld [vmem:[#allocation12 + $0xc0] sm:$0xff]  ;;  %v3174_v23 = vld [vmem:[#allocation12 + $0x48] sm:$0xff] }
 0x600   : > { %v2364_v46 = vadd.f32 %v2363_v31, %v6242_v54  ;;  %v2365_v34 = vpop.f32.mrb[77].mxu1  ;;  %v6265_v0 = vpop.f32.mrb[77].mxu0  ;;  %4253 = vmatprep.subr.bf16.mxu1 %v4252_v33  ;;  %v4328_v56 = vpack.c.bf16 %v3190_v15, %v3189_v6  ;;  %v3191_v31 = vld [vmem:[#allocation12 + $0xd0] sm:$0xff]  ;;  %4327 = vmatpush3.bf16.msra.mxu0 %v4326_v5  ;;  %v4330_v12 = vpack.c.bf16 %v3174_v23, %v3173_v30  ;;  %v2759_v15 = vld [vmem:[#allocation10 + $0x2c0] sm:$0xff]  ;;  %v3196_v23 = vld [vmem:[#allocation12 + $0xf8] sm:$0xff] }
 0x601   : > { %v2366_v27 = vadd.f32 %v2365_v34, %v6246_v55  ;;  %2881 = vmatprep.mubr.f32.mxu1 %v2612_v2  ;;  %v2753_v2 = vld [vmem:[#allocation10 + $0x290] sm:$0xff] }
 0x602   : > { %2882 = vmatmul.mubr.f32.gmra.mrb[106].mxu1 %v2611_v25  ;;  %v2615_v14 = vmax.f32 %v2364_v46, 0.0  ;;  %4329 = vmatprep.subr.bf16.mxu0 %v4328_v56  ;;  %v2761_v56 = vld [vmem:[#allocation10 + $0x2d0] sm:$0xff] }
 0x603   : > { %v2616_v18 = vmax.f32 %v2366_v27, 0.0  ;;  %4255 = vmatpush1.bf16.msra.mxu1 %v4254_v61  ;;  %v2369_v10 = vpop.f32.mrb[78].mxu1  ;;  %v6269_v53 = vpop.f32.mrb[78].mxu0  ;;  %v3192_v61 = vld [vmem:[#allocation12 + $0xd8] sm:$0xff]  ;;  %v3195_v30 = vld [vmem:[#allocation12 + $0xf0] sm:$0xff] }
 0x604   : > { %v2370_v62 = vadd.f32 %v2369_v10, %v6242_v54  ;;  %v2371_v43 = vpop.f32.mrb[79].mxu1  ;;  %v6272_v17 = vpop.f32.mrb[79].mxu0  ;;  %4257 = vmatprep.subr.bf16.mxu1 %v4256_v36  ;;  %v4266_v36 = vpack.c.bf16 %v2753_v2, %v2751_v52  ;;  %v4332_v60 = vpack.c.bf16 %v3192_v61, %v3191_v31  ;;  %v3176_v27 = vld [vmem:[#allocation12 + $0x58] sm:$0xff]  ;;  %v4268_v10 = vpack.c.bf16 %v2758_v48, %v2756_v8  ;;  %v3179_v48 = vld [vmem:[#allocation12 + $0x70] sm:$0xff] }
 0x605   : > { %v2372_v4 = vadd.f32 %v2371_v43, %v6246_v55  ;;  %2887 = vmatprep.mubr.f32.mxu1 %v2616_v18  ;;  %4331 = vmatpush3.bf16.msra.mxu0 %v4330_v12  ;;  %v4340_v8 = vpack.c.bf16 %v3196_v23, %v3195_v30  ;;  %v3180_v12 = vld [vmem:[#allocation12 + $0x78] sm:$0xff] }
 0x606   : > { %2888 = vmatmul.mubr.f32.gmra.mrb[108].mxu1 %v2615_v14  ;;  %v2619_v1 = vmax.f32 %v2370_v62, 0.0  ;;  %v2762_v14 = vld [vmem:[#allocation10 + $0x2d8] sm:$0xff]  ;;  %v4334_v62 = vpack.c.bf16 %v3176_v27, %v3175_v13  ;;  %4333 = vmatprep.subr.bf16.mxu0 %v4332_v60  ;;  %v2763_v13 = vld [vmem:[#allocation10 + $0x2e0] sm:$0xff]  ;;  %v2765_v27 = vld [vmem:[#allocation10 + $0x2f0] sm:$0xff] }
 0x607   : > { %v2620_v19 = vmax.f32 %v2372_v4, 0.0  ;;  %4259 = vmatpush1.bf16.msra.mxu1 %v4258_v50  ;;  %v2375_v45 = vpop.f32.mrb[80].mxu1  ;;  %v6275_v33 = vpop.f32.mrb[80].mxu0  ;;  %v2757_v50 = vld [vmem:[#allocation10 + $0x2b0] sm:$0xff]  ;;  %v4336_v4 = vpack.c.bf16 %v3194_v38, %v3193_v35  ;;  %v4272_v52 = vpack.c.bf16 %v2762_v14, %v2760_v11 }
 0x608   : > { %v2376_v22 = vadd.f32 %v2375_v45, %v6242_v54  ;;  %v2377_v63 = vpop.f32.mrb[81].mxu1  ;;  %v6278_v9 = vpop.f32.mrb[81].mxu0  ;;  %4261 = vmatprep.subr.bf16.mxu1 %v4260_v49  ;;  %v4270_v6 = vpack.c.bf16 %v2757_v50, %v2755_v44 }
 0x609   : > { %v2378_v32 = vadd.f32 %v2377_v63, %v6246_v55  ;;  %2893 = vmatprep.mubr.f32.mxu1 %v2620_v19  ;;  %v2766_v63 = vld [vmem:[#allocation10 + $0x2f8] sm:$0xff]  ;;  %4335 = vmatpush3.bf16.msra.mxu0 %v4334_v62 }
 0x60a   : > { %2894 = vmatmul.mubr.f32.gmra.mrb[110].mxu1 %v2619_v1  ;;  %v2623_v51 = vmax.f32 %v2376_v22, 0.0  ;;  %v2764_v22 = vld [vmem:[#allocation10 + $0x2e8] sm:$0xff]  ;;  %4337 = vmatprep.subr.bf16.mxu0 %v4336_v4 }
 0x60b   : > { %v2624_v25 = vmax.f32 %v2378_v32, 0.0  ;;  %4263 = vmatpush1.bf16.msra.mxu1 %v4262_v42  ;;  %v2381_v46 = vpop.f32.mrb[82].mxu1  ;;  %v6281_v34 = vpop.f32.mrb[82].mxu0  ;;  %v4274_v32 = vpack.c.bf16 %v2761_v56, %v2759_v15  ;;  %v4276_v60 = vpack.c.bf16 %v2766_v63, %v2764_v22  ;;  %v2769_v15 = vld [vmem:[#allocation10 + $0x310] sm:$0xff]  ;;  %v2771_v63 = vld [vmem:[#allocation10 + $0x320] sm:$0xff] }
 0x60c   : > { %v2382_v26 = vadd.f32 %v2381_v46, %v6242_v54  ;;  %v2383_v16 = vpop.f32.mrb[83].mxu1  ;;  %v6284_v18 = vpop.f32.mrb[83].mxu0  ;;  %4265 = vmatprep.subr.bf16.mxu1 %v4264_v29  ;;  %v4338_v29 = vpack.c.bf16 %v3178_v40, %v3177_v41  ;;  %v2772_v41 = vld [vmem:[#allocation10 + $0x328] sm:$0xff]  ;;  %v2774_v40 = vld [vmem:[#allocation10 + $0x338] sm:$0xff] }
 0x60d   : > { %v2384_v39 = vadd.f32 %v2383_v16, %v6246_v55  ;;  %2899 = vmatprep.mubr.f32.mxu1 %v2624_v25  ;;  %v2770_v16 = vld [vmem:[#allocation10 + $0x318] sm:$0xff]  ;;  %v4284_v22 = vpack.c.bf16 %v2774_v40, %v2772_v41  ;;  %v2779_v41 = vld [vmem:[#allocation10 + $0x360] sm:$0xff]  ;;  %v2781_v40 = vld [vmem:[#allocation10 + $0x370] sm:$0xff] }
 0x60e   : > { %2900 = vmatmul.mubr.f32.gmra.mrb[112].mxu1 %v2623_v51  ;;  %v2627_v5 = vmax.f32 %v2382_v26, 0.0  ;;  %v2768_v26 = vld [vmem:[#allocation10 + $0x308] sm:$0xff]  ;;  %4339 = vmatpush3.bf16.msra.mxu0 %v4338_v29  ;;  %v2773_v29 = vld [vmem:[#allocation10 + $0x330] sm:$0xff] }
 0x60f   : > { %v2628_v43 = vmax.f32 %v2384_v39, 0.0  ;;  %4267 = vmatpush1.bf16.msra.mxu1 %v4266_v36  ;;  %v2387_v49 = vpop.f32.mrb[84].mxu1  ;;  %v6287_v21 = vpop.f32.mrb[84].mxu0  ;;  %v4278_v39 = vpack.c.bf16 %v2765_v27, %v2763_v13  ;;  %4341 = vmatprep.subr.bf16.mxu0 %v4340_v8 }
 0x610   : > { %v2388_v19 = vadd.f32 %v2387_v49, %v6242_v54  ;;  %v2389_v45 = vpop.f32.mrb[85].mxu1  ;;  %v6290_v42 = vpop.f32.mrb[85].mxu0  ;;  %4269 = vmatprep.subr.bf16.mxu1 %v4268_v10  ;;  %v4342_v10 = vpack.c.bf16 %v3180_v12, %v3179_v48  ;;  %v4280_v49 = vpack.c.bf16 %v2770_v16, %v2768_v26  ;;  %v2777_v26 = vld [vmem:[#allocation10 + $0x350] sm:$0xff] }
 0x611   : > { %v2390_v1 = vadd.f32 %v2389_v45, %v6246_v55  ;;  %2905 = vmatprep.mubr.f32.mxu1 %v2628_v43 }
 0x612   : > { %2906 = vmatmul.mubr.f32.gmra.mrb[114].mxu1 %v2627_v5  ;;  %v2631_v25 = vmax.f32 %v2388_v19, 0.0  ;;  %4343 = vmatpush3.bf16.msra.mxu0 %v4342_v10  ;;  %v2780_v10 = vld [vmem:[#allocation10 + $0x368] sm:$0xff] }
 0x613   : > { %v2632_v2 = vmax.f32 %v2390_v1, 0.0  ;;  %4271 = vmatpush1.bf16.msra.mxu1 %v4270_v6  ;;  %v2393_v31 = vpop.f32.mrb[86].mxu1  ;;  %v6293_v61 = vpop.f32.mrb[86].mxu0  ;;  %v2767_v6 = vld [vmem:[#allocation10 + $0x300] sm:$0xff] }
 0x614   : > { %v2394_v46 = vadd.f32 %v2393_v31, %v6242_v54  ;;  %v2395_v36 = vpop.f32.mrb[87].mxu1  ;;  %v6296_v44 = vpop.f32.mrb[87].mxu0  ;;  %4273 = vmatprep.subr.bf16.mxu1 %v4272_v52  ;;  %v4282_v52 = vpack.c.bf16 %v2769_v15, %v2767_v6  ;;  %v2776_v31 = vld [vmem:[#allocation10 + $0x348] sm:$0xff] }
 0x615   : > { %v2396_v51 = vadd.f32 %v2395_v36, %v6246_v55  ;;  %2911 = vmatprep.mubr.f32.mxu1 %v2632_v2 }
 0x616   : > { %2912 = vmatmul.mubr.f32.gmra.mrb[116].mxu1 %v2631_v25  ;;  %v2635_v11 = vmax.f32 %v2394_v46, 0.0  ;;  %v4286_v25 = vpack.c.bf16 %v2773_v29, %v2771_v63 }
 0x617   : > { %v2636_v50 = vmax.f32 %v2396_v51, 0.0  ;;  %4275 = vmatpush1.bf16.msra.mxu1 %v4274_v32  ;;  %v2399_v35 = vpop.f32.mrb[88].mxu1  ;;  %v6299_v38 = vpop.f32.mrb[88].mxu0  ;;  %v2778_v32 = vld [vmem:[#allocation10 + $0x358] sm:$0xff]  ;;  %v2775_v51 = vld [vmem:[#allocation10 + $0x340] sm:$0xff] }
 0x618   : > { %v2400_v14 = vadd.f32 %v2399_v35, %v6242_v54  ;;  %v2401_v62 = vpop.f32.mrb[89].mxu1  ;;  %v6302_v43 = vpop.f32.mrb[89].mxu0  ;;  %4277 = vmatprep.subr.bf16.mxu1 %v4276_v60  ;;  %v4288_v27 = vpack.c.bf16 %v2778_v32, %v2776_v31 }
 0x619   : > { %v2402_v4 = vadd.f32 %v2401_v62, %v6246_v55  ;;  %2917 = vmatprep.mubr.f32.mxu1 %v2636_v50  ;;  %v2782_v50 = vld [vmem:[#allocation10 + $0x378] sm:$0xff] }
 0x61a   : > { %2918 = vmatmul.mubr.f32.gmra.mrb[118].mxu1 %v2635_v11  ;;  %v2639_v56 = vmax.f32 %v2400_v14, 0.0  ;;  %v4290_v14 = vpack.c.bf16 %v2777_v26, %v2775_v51 }
 0x61b   : > { %v2640_v5 = vmax.f32 %v2402_v4, 0.0  ;;  %4279 = vmatpush1.bf16.msra.mxu1 %v4278_v39  ;;  %v2405_v19 = vpop.f32.mrb[90].mxu1  ;;  %v6305_v45 = vpop.f32.mrb[90].mxu0  ;;  %v4292_v4 = vpack.c.bf16 %v2782_v50, %v2780_v10 }
 0x61c   : > { %v2406_v30 = vadd.f32 %v2405_v19, %v6242_v54  ;;  %v2407_v23 = vpop.f32.mrb[91].mxu1  ;;  %v6308_v1 = vpop.f32.mrb[91].mxu0  ;;  %4281 = vmatprep.subr.bf16.mxu1 %v4280_v49  ;;  %v2784_v19 = vld [vmem:[#allocation10 + $0x388] sm:$0xff] }
 0x61d   : > { %v2408_v2 = vadd.f32 %v2407_v23, %v6246_v55  ;;  %2923 = vmatprep.mubr.f32.mxu1 %v2640_v5 }
 0x61e   : > { %2924 = vmatmul.mubr.f32.gmra.mrb[120].mxu1 %v2639_v56  ;;  %v2643_v46 = vmax.f32 %v2406_v30, 0.0 }
 0x61f   : > { %v2644_v8 = vmax.f32 %v2408_v2, 0.0  ;;  %4283 = vmatpush1.bf16.msra.mxu1 %v4282_v52  ;;  %v2411_v48 = vpop.f32.mrb[92].mxu1  ;;  %v6311_v12 = vpop.f32.mrb[92].mxu0  ;;  %v2786_v52 = vld [vmem:[#allocation10 + $0x398] sm:$0xff] }
 0x620   : > { %v2412_v36 = vadd.f32 %v2411_v48, %v6242_v54  ;;  %v2413_v60 = vpop.f32.mrb[93].mxu1  ;;  %v6314_v13 = vpop.f32.mrb[93].mxu0  ;;  %4285 = vmatprep.subr.bf16.mxu1 %v4284_v22  ;;  %v4294_v22 = vpack.c.bf16 %v2781_v40, %v2779_v41  ;;  %v4296_v32 = vpack.c.bf16 %v2786_v52, %v2784_v19  ;;  %v2785_v48 = vld [vmem:[#allocation10 + $0x390] sm:$0xff] }
 0x621   : > { %v2414_v16 = vadd.f32 %v2413_v60, %v6246_v55  ;;  %2929 = vmatprep.mubr.f32.mxu1 %v2644_v8  ;;  %v2783_v8 = vld [vmem:[#allocation10 + $0x380] sm:$0xff] }
 0x622   : > { %2930 = vmatmul.mubr.f32.gmra.mrb[122].mxu1 %v2643_v46  ;;  %v2647_v62 = vmax.f32 %v2412_v36, 0.0  ;;  %v2788_v46 = vld [vmem:[#allocation10 + $0x3a8] sm:$0xff]  ;;  %v2790_v36 = vld [vmem:[#allocation10 + $0x3b8] sm:$0xff]  ;;  %v4298_v26 = vpack.c.bf16 %v2785_v48, %v2783_v8 }
 0x623   : > { %v2648_v35 = vmax.f32 %v2414_v16, 0.0  ;;  %4287 = vmatpush1.bf16.msra.mxu1 %v4286_v25  ;;  %v2417_v39 = vpop.f32.mrb[94].mxu1  ;;  %v6317_v11 = vpop.f32.mrb[94].mxu0 }
 0x624   : > { %v2418_v49 = vadd.f32 %v2417_v39, %v6242_v54  ;;  %v2419_v6 = vpop.f32.mrb[95].mxu1  ;;  %v6320_v15 = vpop.f32.mrb[95].mxu0  ;;  %4289 = vmatprep.subr.bf16.mxu1 %v4288_v27  ;;  %v4300_v39 = vpack.c.bf16 %v2790_v36, %v2788_v46  ;;  %v2798_v46 = vld [vmem:[#allocation10 + $0x3f8] sm:$0xff] }
 0x625   : > { %v2420_v5 = vadd.f32 %v2419_v6, %v6246_v55  ;;  %2935 = vmatprep.mubr.f32.mxu1 %v2648_v35  ;;  %v2792_v6 = vld [vmem:[#allocation10 + $0x3c8] sm:$0xff] }
 0x626   : > { %2936 = vmatmul.mubr.f32.gmra.mrb[124].mxu1 %v2647_v62  ;;  %v2651_v63 = vmax.f32 %v2418_v49, 0.0  ;;  %v2789_v62 = vld [vmem:[#allocation10 + $0x3b0] sm:$0xff] }
 0x627   : > { %v2652_v56 = vmax.f32 %v2420_v5, 0.0  ;;  %4291 = vmatpush1.bf16.msra.mxu1 %v4290_v14  ;;  %v2423_v30 = vpop.f32.mrb[96].mxu1  ;;  %v6323_v23 = vpop.f32.mrb[96].mxu0  ;;  %v2787_v14 = vld [vmem:[#allocation10 + $0x3a0] sm:$0xff] }
 0x628   : > { %v2424_v29 = vadd.f32 %v2423_v30, %v6242_v54  ;;  %v2425_v2 = vpop.f32.mrb[97].mxu1  ;;  %v6326_v31 = vpop.f32.mrb[97].mxu0  ;;  %4293 = vmatprep.subr.bf16.mxu1 %v4292_v4  ;;  %v2794_v4 = vld [vmem:[#allocation10 + $0x3d8] sm:$0xff]  ;;  %v4302_v19 = vpack.c.bf16 %v2789_v62, %v2787_v14 }
 0x629   : > { %v2426_v25 = vadd.f32 %v2425_v2, %v6246_v55  ;;  %2941 = vmatprep.mubr.f32.mxu1 %v2652_v56  ;;  %v2793_v2 = vld [vmem:[#allocation10 + $0x3d0] sm:$0xff] }
 0x62a   : > { %2942 = vmatmul.mubr.f32.gmra.mrb[126].mxu1 %v2651_v63  ;;  %v2655_v16 = vmax.f32 %v2424_v29, 0.0  ;;  %v4304_v63 = vpack.c.bf16 %v2794_v4, %v2792_v6  ;;  %v2791_v29 = vld [vmem:[#allocation10 + $0x3c0] sm:$0xff]  ;;  %v2797_v6 = vld [vmem:[#allocation10 + $0x3f0] sm:$0xff] }
 0x62b   : > { %v2656_v60 = vmax.f32 %v2426_v25, 0.0  ;;  %4295 = vmatpush1.bf16.msra.mxu1 %v4294_v22  ;;  %v2429_v27 = vpop.f32.mrb[98].mxu1  ;;  %v6329_v51 = vpop.f32.mrb[98].mxu0  ;;  %v2796_v25 = vld [vmem:[#allocation10 + $0x3e8] sm:$0xff] }
 0x62c   : > { %v2430_v10 = vadd.f32 %v2429_v27, %v6242_v54  ;;  %v2431_v50 = vpop.f32.mrb[99].mxu1  ;;  %v6332_v35 = vpop.f32.mrb[99].mxu0  ;;  %4297 = vmatprep.subr.bf16.mxu1 %v4296_v32  ;;  %v6566_v32 = vsub.s32 3, %v5454_v24  ;;  %v4308_v62 = vpack.c.bf16 %v2798_v46, %v2796_v25 }
 0x62d   : > { %v2432_v49 = vadd.f32 %v2431_v50, %v6246_v55  ;;  %2947 = vmatprep.mubr.f32.mxu1 %v2656_v60 }
 0x62e   : > { %2948 = vmatmul.mubr.f32.gmra.mrb[128].mxu1 %v2655_v16  ;;  %v2659_v52 = vmax.f32 %v2430_v10, 0.0  ;;  %v6343_v8 = vrot.slane %v6238_v28, %v6566_v32  ;;  %v6351_v16 = vrot.slane %v6238_v28, %v776_v7 }
 0x62f   : > { %v2660_v41 = vmax.f32 %v2432_v49, 0.0  ;;  %4299 = vmatpush1.bf16.msra.mxu1 %v4298_v26  ;;  %v2435_v40 = vpop.f32.mrb[100].mxu1  ;;  %v6335_v5 = vpop.f32.mrb[100].mxu0  ;;  %v4306_v26 = vpack.c.bf16 %v2793_v2, %v2791_v29  ;;  %v2795_v49 = vld [vmem:[#allocation10 + $0x3e0] sm:$0xff] }
 0x630   : > { %v2436_v56 = vadd.f32 %v2435_v40, %v6242_v54  ;;  %v2437_v30 = vpop.f32.mrb[101].mxu1  ;;  %v6338_v22 = vpop.f32.mrb[101].mxu0  ;;  %4301 = vmatprep.subr.bf16.mxu1 %v4300_v39  ;;  %v2515_v4 = vadd.f32 %v6251_v47, %v6343_v8  ;;  %v4310_v7 = vpack.c.bf16 %v2797_v6, %v2795_v49  ;;  %v2513_v28 = vadd.f32 %v6248_v58, %v6351_v16 }
 0x631   : > { %v2438_v48 = vadd.f32 %v2437_v30, %v6246_v55  ;;  %2953 = vmatprep.mubr.f32.mxu1 %v2660_v41  ;;  %v2525_v30 = vadd.f32 %v6262_v3, %v6351_v16  ;;  %v2537_v3 = vadd.f32 %v6275_v33, %v6351_v16  ;;  %v2549_v33 = vadd.f32 %v6287_v21, %v6351_v16 }
 0x632   : > { %2954 = vmatmul.mubr.f32.gmra.mrb[130].mxu1 %v2659_v52  ;;  %v2663_v10 = vmax.f32 %v2436_v56, 0.0  ;;  %v2610_v40 = vmax.f32 %v2515_v4, 0.0  ;;  %v2609_v47 = vmax.f32 %v2513_v28, 0.0  ;;  %v2527_v56 = vadd.f32 %v6265_v0, %v6343_v8 }
 0x633   : > { %v2664_v36 = vmax.f32 %v2438_v48, 0.0  ;;  %4303 = vmatpush1.bf16.msra.mxu1 %v4302_v19  ;;  %v2441_v60 = vpop.f32.mrb[102].mxu1  ;;  %v6346_v27 = vpop.f32.mrb[102].mxu0  ;;  %v2521_v19 = vadd.f32 %v6259_v57, %v6343_v8  ;;  %v2533_v57 = vadd.f32 %v6272_v17, %v6343_v8  ;;  %v2617_v29 = vmax.f32 %v2525_v30, 0.0 }
 0x634   : > { %v2442_v50 = vadd.f32 %v2441_v60, %v6242_v54  ;;  %v2443_v39 = vpop.f32.mrb[103].mxu1  ;;  %v6354_v14 = vpop.f32.mrb[103].mxu0  ;;  %4305 = vmatprep.subr.bf16.mxu1 %v4304_v63  ;;  %v2618_v63 = vmax.f32 %v2527_v56, 0.0  ;;  %v2539_v0 = vadd.f32 %v6278_v9, %v6343_v8  ;;  %v2545_v17 = vadd.f32 %v6284_v18, %v6343_v8  ;;  %v2799_v56 = vld [vmem:[%s6567_s23] sm:$0x3] }
 0x635   : > { %v2444_v41 = vadd.f32 %v2443_v39, %v6246_v55  ;;  %2959 = vmatprep.mubr.f32.mxu1 %v2664_v36  ;;  %v2519_v55 = vadd.f32 %v6254_v59, %v6351_v16  ;;  %v2614_v52 = vmax.f32 %v2521_v19, 0.0  ;;  %v2531_v59 = vadd.f32 %v6269_v53, %v6351_v16 }
 0x636   : > { %2960 = vmatmul.mubr.f32.gmra.mrb[132].mxu1 %v2663_v10  ;;  %v2667_v54 = vmax.f32 %v2442_v50, 0.0  ;;  %v2622_v2 = vmax.f32 %v2533_v57, 0.0  ;;  %v2626_v48 = vmax.f32 %v2539_v0, 0.0  ;;  %v2625_v25 = vmax.f32 %v2537_v3, 0.0 }
 0x637   : > { %v2668_v24 = vmax.f32 %v2444_v41, 0.0  ;;  %4307 = vmatpush1.bf16.msra.mxu1 %v4306_v26  ;;  %v2613_v58 = vmax.f32 %v2519_v55, 0.0  ;;  %v2621_v32 = vmax.f32 %v2531_v59, 0.0  ;;  %v2543_v53 = vadd.f32 %v6281_v34, %v6351_v16 }
 0x638   : > { %4309 = vmatprep.subr.bf16.mxu1 %v4308_v62  ;;  %v2630_v46 = vmax.f32 %v2545_v17, 0.0  ;;  %v2551_v9 = vadd.f32 %v6290_v42, %v6343_v8  ;;  %v2557_v18 = vadd.f32 %v6296_v44, %v6343_v8  ;;  %v2633_v26 = vmax.f32 %v2549_v33, 0.0 }
 0x639   : > { %2965 = vmatprep.mubr.f32.mxu1 %v2668_v24  ;;  %v2629_v36 = vmax.f32 %v2543_v53, 0.0  ;;  %v2555_v34 = vadd.f32 %v6293_v61, %v6351_v16  ;;  %v2563_v42 = vadd.f32 %v6302_v43, %v6343_v8  ;;  %v2561_v21 = vadd.f32 %v6299_v38, %v6351_v16 }
 0x63a   : > { %2966 = vmatmul.mubr.f32.gmra.mrb[134].mxu1 %v2667_v54  ;;  %v2634_v60 = vmax.f32 %v2551_v9, 0.0  ;;  %v2638_v10 = vmax.f32 %v2557_v18, 0.0  ;;  %v2569_v44 = vadd.f32 %v6308_v1, %v6343_v8  ;;  %v2567_v61 = vadd.f32 %v6305_v45, %v6351_v16 }
 0x63b   : > { %4311 = vmatpush1.bf16.msra.mxu1 %v4310_v7  ;;  %3036 = vmatprep.mubr.f32.mxu1 %v2610_v40  ;;  %v2637_v50 = vmax.f32 %v2555_v34, 0.0  ;;  %v2642_v39 = vmax.f32 %v2563_v42, 0.0  ;;  %v2641_v62 = vmax.f32 %v2561_v21, 0.0  ;;  %v2575_v43 = vadd.f32 %v6314_v13, %v6343_v8 }
 0x63c   : > { %v2646_v49 = vmax.f32 %v2569_v44, 0.0  ;;  %v2645_v6 = vmax.f32 %v2567_v61, 0.0  ;;  %v2573_v38 = vadd.f32 %v6311_v12, %v6351_v16  ;;  %v2581_v1 = vadd.f32 %v6320_v15, %v6343_v8 }
 0x63d   : > { %v2650_v4 = vmax.f32 %v2575_v43, 0.0  ;;  %v2579_v45 = vadd.f32 %v6317_v11, %v6351_v16  ;;  %v2587_v13 = vadd.f32 %v6326_v31, %v6343_v8  ;;  %v2585_v12 = vadd.f32 %v6323_v23, %v6351_v16 }
 0x63e   : > { %3037 = vmatmul.mubr.f32.vlgmr.msra.gmra.mrb[104].mxu1 %v2609_v47  ;;  %v2649_v41 = vmax.f32 %v2573_v38, 0.0  ;;  %v2654_v24 = vmax.f32 %v2581_v1, 0.0  ;;  %v2593_v15 = vadd.f32 %v6332_v35, %v6343_v8  ;;  %v2591_v11 = vadd.f32 %v6329_v51, %v6351_v16 }
 0x63f   : > { %3042 = vmatprep.mubr.f32.mxu1 %v2614_v52  ;;  %v2653_v7 = vmax.f32 %v2579_v45, 0.0  ;;  %v2658_v28 = vmax.f32 %v2587_v13, 0.0  ;;  %v2657_v54 = vmax.f32 %v2585_v12, 0.0  ;;  %v2599_v31 = vadd.f32 %v6338_v22, %v6343_v8 }
 0x640   : > { %v2662_v40 = vmax.f32 %v2593_v15, 0.0  ;;  %v2661_v19 = vmax.f32 %v2591_v11, 0.0  ;;  %v2597_v23 = vadd.f32 %v6335_v5, %v6351_v16  ;;  %v2605_v35 = vadd.f32 %v6354_v14, %v6343_v8 }
 0x641   : > { %v2666_v47 = vmax.f32 %v2599_v31, 0.0  ;;  %v2603_v51 = vadd.f32 %v6346_v27, %v6351_v16  ;;  %v6425_v5 = vrot.slane %v2799_v56, %v6562_v37  ;;  %v6428_v8 = vrot.slane %v2799_v56, %v6563_v20 }
 0x642   : > { %3043 = vmatmul.mubr.f32.gmra.mrb[106].mxu1 %v2613_v58  ;;  %v2665_v55 = vmax.f32 %v2597_v23, 0.0  ;;  %v2670_v52 = vmax.f32 %v2605_v35, 0.0 }
 0x643   : > { %3048 = vmatprep.mubr.f32.mxu1 %v2618_v63  ;;  %v2669_v22 = vmax.f32 %v2603_v51, 0.0 }
 0x646   : > { %3049 = vmatmul.mubr.f32.gmra.mrb[108].mxu1 %v2617_v29 }
 0x647   : > { %3054 = vmatprep.mubr.f32.mxu1 %v2622_v2 }
 0x64a   : > { %3055 = vmatmul.mubr.f32.gmra.mrb[110].mxu1 %v2621_v32 }
 0x64b   : > { %3060 = vmatprep.mubr.f32.mxu1 %v2626_v48 }
 0x64e   : > { %3061 = vmatmul.mubr.f32.gmra.mrb[112].mxu1 %v2625_v25 }
 0x64f   : > { %3066 = vmatprep.mubr.f32.mxu1 %v2630_v46 }
 0x652   : > { %3067 = vmatmul.mubr.f32.gmra.mrb[114].mxu1 %v2629_v36 }
 0x653   : > { %3072 = vmatprep.mubr.f32.mxu1 %v2634_v60 }
 0x656   : > { %3073 = vmatmul.mubr.f32.gmra.mrb[116].mxu1 %v2633_v26 }
 0x657   : > { %3078 = vmatprep.mubr.f32.mxu1 %v2638_v10 }
 0x65a   : > { %3079 = vmatmul.mubr.f32.gmra.mrb[118].mxu1 %v2637_v50 }
 0x65b   : > { %3084 = vmatprep.mubr.f32.mxu1 %v2642_v39 }
 0x65e   : > { %3085 = vmatmul.mubr.f32.gmra.mrb[120].mxu1 %v2641_v62 }
 0x65f   : > { %3090 = vmatprep.mubr.f32.mxu1 %v2646_v49 }
 0x662   : > { %3091 = vmatmul.mubr.f32.gmra.mrb[122].mxu1 %v2645_v6 }
 0x663   : > { %3096 = vmatprep.mubr.f32.mxu1 %v2650_v4 }
 0x666   : > { %3097 = vmatmul.mubr.f32.gmra.mrb[124].mxu1 %v2649_v41 }
 0x667   : > { %3102 = vmatprep.mubr.f32.mxu1 %v2654_v24 }
 0x66a   : > { %3103 = vmatmul.mubr.f32.gmra.mrb[126].mxu1 %v2653_v7 }
 0x66b   : > { %3108 = vmatprep.mubr.f32.mxu1 %v2658_v28 }
 0x66e   : > { %3109 = vmatmul.mubr.f32.gmra.mrb[128].mxu1 %v2657_v54 }
 0x66f   : > { %3114 = vmatprep.mubr.f32.mxu1 %v2662_v40 }
 0x672   : > { %3115 = vmatmul.mubr.f32.gmra.mrb[130].mxu1 %v2661_v19 }
 0x673   : > { %3120 = vmatprep.mubr.f32.mxu1 %v2666_v47 }
 0x676   : > { %3121 = vmatmul.mubr.f32.gmra.mrb[132].mxu1 %v2665_v55 }
 0x677   : > { %3126 = vmatprep.mubr.f32.mxu1 %v2670_v52 }
 0x67a   : > { %3127 = vmatmul.mubr.f32.gmra.mrb[134].mxu1 %v2669_v22 }
 0x711   : > { %v3038_v14 = vpop.f32.mrb[104].mxu1 }
 0x712   : > { %v4392_v58 = vadd.f32 %v3038_v14, %v6425_v5  ;;  %v3040_v30 = vpop.f32.mrb[105].mxu1 }
 0x713   : > { %v4393_v27 = vadd.f32 %v3040_v30, %v6428_v8 }
 0x714   : > { %v3133_v57 = vmax.f32 %v4392_v58, 0.0 }
 0x715   : > { %v3134_v16 = vmax.f32 %v4393_v27, 0.0  ;;  %v3044_v63 = vpop.f32.mrb[106].mxu1 }
 0x716   : > { %v4394_v29 = vadd.f32 %v3044_v63, %v6425_v5  ;;  %v3046_v59 = vpop.f32.mrb[107].mxu1 }
 0x717   : > { %v4395_v2 = vadd.f32 %v3046_v59, %v6428_v8  ;;  %3268 = vmatprep.mubr.f32.mxu0 %v3134_v16 }
 0x718   : > { %3269 = vmatmul.mubr.f32.vlgmr.msra.gmra.mrb[104].mxu0 %v3133_v57  ;;  %v3135_v20 = vmax.f32 %v4394_v29, 0.0 }
 0x719   : > { %v3136_v37 = vmax.f32 %v4395_v2, 0.0  ;;  %v3050_v0 = vpop.f32.mrb[108].mxu1 }
 0x71a   : > { %v4396_v32 = vadd.f32 %v3050_v0, %v6425_v5  ;;  %v3052_v3 = vpop.f32.mrb[109].mxu1 }
 0x71b   : > { %v4397_v48 = vadd.f32 %v3052_v3, %v6428_v8  ;;  %3273 = vmatprep.mubr.f32.mxu0 %v3136_v37 }
 0x71c   : > { %3274 = vmatmul.mubr.f32.gmra.mrb[106].mxu0 %v3135_v20  ;;  %v3137_v53 = vmax.f32 %v4396_v32, 0.0 }
 0x71d   : > { %v3138_v17 = vmax.f32 %v4397_v48, 0.0  ;;  %v3056_v25 = vpop.f32.mrb[110].mxu1 }
 0x71e   : > { %v4398_v46 = vadd.f32 %v3056_v25, %v6425_v5  ;;  %v3058_v9 = vpop.f32.mrb[111].mxu1 }
 0x71f   : > { %v4399_v36 = vadd.f32 %v3058_v9, %v6428_v8  ;;  %3278 = vmatprep.mubr.f32.mxu0 %v3138_v17 }
 0x720   : > { %3279 = vmatmul.mubr.f32.gmra.mrb[108].mxu0 %v3137_v53  ;;  %v3139_v18 = vmax.f32 %v4398_v46, 0.0 }
 0x721   : > { %v3140_v33 = vmax.f32 %v4399_v36, 0.0  ;;  %v3062_v60 = vpop.f32.mrb[112].mxu1 }
 0x722   : > { %v4400_v26 = vadd.f32 %v3062_v60, %v6425_v5  ;;  %v3064_v34 = vpop.f32.mrb[113].mxu1 }
 0x723   : > { %v4401_v10 = vadd.f32 %v3064_v34, %v6428_v8  ;;  %3283 = vmatprep.mubr.f32.mxu0 %v3140_v33 }
 0x724   : > { %3284 = vmatmul.mubr.f32.gmra.mrb[110].mxu0 %v3139_v18  ;;  %v3141_v21 = vmax.f32 %v4400_v26, 0.0 }
 0x725   : > { %v3142_v42 = vmax.f32 %v4401_v10, 0.0  ;;  %v3068_v50 = vpop.f32.mrb[114].mxu1 }
 0x726   : > { %v4402_v39 = vadd.f32 %v3068_v50, %v6425_v5  ;;  %v3070_v44 = vpop.f32.mrb[115].mxu1 }
 0x727   : > { %v4403_v62 = vadd.f32 %v3070_v44, %v6428_v8  ;;  %3288 = vmatprep.mubr.f32.mxu0 %v3142_v42 }
 0x728   : > { %3289 = vmatmul.mubr.f32.gmra.mrb[112].mxu0 %v3141_v21  ;;  %v3143_v43 = vmax.f32 %v4402_v39, 0.0 }
 0x729   : > { %v3144_v61 = vmax.f32 %v4403_v62, 0.0  ;;  %v3074_v49 = vpop.f32.mrb[116].mxu1 }
 0x72a   : > { %v4404_v6 = vadd.f32 %v3074_v49, %v6425_v5  ;;  %v3076_v38 = vpop.f32.mrb[117].mxu1  ;;  %v6465_v49 = vld [vmem:[%s6568_s29] ss:$0 sm:$0xff] }
 0x72b   : > { %v4405_v4 = vadd.f32 %v3076_v38, %v6428_v8  ;;  %3293 = vmatprep.mubr.f32.mxu0 %v3144_v61 }
 0x72c   : > { %3294 = vmatmul.mubr.f32.gmra.mrb[114].mxu0 %v3143_v43  ;;  %v3145_v45 = vmax.f32 %v4404_v6, 0.0 }
 0x72d   : > { %v3146_v1 = vmax.f32 %v4405_v4, 0.0  ;;  %v3080_v41 = vpop.f32.mrb[118].mxu1 }
 0x72e   : > { %v4406_v24 = vadd.f32 %v3080_v41, %v6425_v5  ;;  %v3082_v13 = vpop.f32.mrb[119].mxu1 }
 0x72f   : > { %v4407_v7 = vadd.f32 %v3082_v13, %v6428_v8  ;;  %3298 = vmatprep.mubr.f32.mxu0 %v3146_v1 }
 0x730   : > { %3299 = vmatmul.mubr.f32.gmra.mrb[116].mxu0 %v3145_v45  ;;  %v3147_v15 = vmax.f32 %v4406_v24, 0.0 }
 0x731   : > { %v3148_v12 = vmax.f32 %v4407_v7, 0.0  ;;  %v3086_v28 = vpop.f32.mrb[120].mxu1 }
 0x732   : > { %v4408_v54 = vadd.f32 %v3086_v28, %v6425_v5  ;;  %v3088_v11 = vpop.f32.mrb[121].mxu1 }
 0x733   : > { %v4409_v40 = vadd.f32 %v3088_v11, %v6428_v8  ;;  %3303 = vmatprep.mubr.f32.mxu0 %v3148_v12 }
 0x734   : > { %3304 = vmatmul.mubr.f32.gmra.mrb[118].mxu0 %v3147_v15  ;;  %v3149_v23 = vmax.f32 %v4408_v54, 0.0 }
 0x735   : > { %v3150_v31 = vmax.f32 %v4409_v40, 0.0  ;;  %v3092_v19 = vpop.f32.mrb[122].mxu1 }
 0x736   : > { %v4410_v47 = vadd.f32 %v3092_v19, %v6425_v5  ;;  %v3094_v35 = vpop.f32.mrb[123].mxu1 }
 0x737   : > { %v4411_v55 = vadd.f32 %v3094_v35, %v6428_v8  ;;  %3308 = vmatprep.mubr.f32.mxu0 %v3150_v31 }
 0x738   : > { %3309 = vmatmul.mubr.f32.gmra.mrb[120].mxu0 %v3149_v23  ;;  %v3151_v22 = vmax.f32 %v4410_v47, 0.0 }
 0x739   : > { %v3152_v51 = vmax.f32 %v4411_v55, 0.0  ;;  %v3098_v52 = vpop.f32.mrb[124].mxu1 }
 0x73a   : > { %v4412_v56 = vadd.f32 %v3098_v52, %v6425_v5  ;;  %v3100_v14 = vpop.f32.mrb[125].mxu1 }
 0x73b   : > { %v4413_v58 = vadd.f32 %v3100_v14, %v6428_v8  ;;  %3313 = vmatprep.mubr.f32.mxu0 %v3152_v51 }
 0x73c   : > { %3314 = vmatmul.mubr.f32.gmra.mrb[122].mxu0 %v3151_v22  ;;  %v3153_v16 = vmax.f32 %v4412_v56, 0.0 }
 0x73d   : > { %v3154_v30 = vmax.f32 %v4413_v58, 0.0  ;;  %v3104_v27 = vpop.f32.mrb[126].mxu1 }
 0x73e   : > { %v4414_v63 = vadd.f32 %v3104_v27, %v6425_v5  ;;  %v3106_v57 = vpop.f32.mrb[127].mxu1 }
 0x73f   : > { %v4415_v29 = vadd.f32 %v3106_v57, %v6428_v8  ;;  %3318 = vmatprep.mubr.f32.mxu0 %v3154_v30 }
 0x740   : > { %3319 = vmatmul.mubr.f32.gmra.mrb[124].mxu0 %v3153_v16  ;;  %v3155_v37 = vmax.f32 %v4414_v63, 0.0 }
 0x741   : > { %v3156_v59 = vmax.f32 %v4415_v29, 0.0  ;;  %v3110_v2 = vpop.f32.mrb[128].mxu1 }
 0x742   : > { %v4416_v0 = vadd.f32 %v3110_v2, %v6425_v5  ;;  %v3112_v20 = vpop.f32.mrb[129].mxu1 }
 0x743   : > { %v4417_v32 = vadd.f32 %v3112_v20, %v6428_v8  ;;  %3323 = vmatprep.mubr.f32.mxu0 %v3156_v59 }
 0x744   : > { %3324 = vmatmul.mubr.f32.gmra.mrb[126].mxu0 %v3155_v37  ;;  %v3157_v17 = vmax.f32 %v4416_v0, 0.0 }
 0x745   : > { %v3158_v3 = vmax.f32 %v4417_v32, 0.0  ;;  %v3116_v48 = vpop.f32.mrb[130].mxu1 }
 0x746   : > { %v4418_v25 = vadd.f32 %v3116_v48, %v6425_v5  ;;  %v3118_v53 = vpop.f32.mrb[131].mxu1 }
 0x747   : > { %v4419_v46 = vadd.f32 %v3118_v53, %v6428_v8  ;;  %3328 = vmatprep.mubr.f32.mxu0 %v3158_v3 }
 0x748   : > { %3329 = vmatmul.mubr.f32.gmra.mrb[128].mxu0 %v3157_v17  ;;  %v3159_v33 = vmax.f32 %v4418_v25, 0.0 }
 0x749   : > { %v3160_v9 = vmax.f32 %v4419_v46, 0.0  ;;  %v3122_v36 = vpop.f32.mrb[132].mxu1 }
 0x74a   : > { %v4420_v60 = vadd.f32 %v3122_v36, %v6425_v5  ;;  %v3124_v18 = vpop.f32.mrb[133].mxu1 }
 0x74b   : > { %v4421_v26 = vadd.f32 %v3124_v18, %v6428_v8  ;;  %3333 = vmatprep.mubr.f32.mxu0 %v3160_v9 }
 0x74c   : > { %3334 = vmatmul.mubr.f32.gmra.mrb[130].mxu0 %v3159_v33  ;;  %v3161_v42 = vmax.f32 %v4420_v60, 0.0 }
 0x74d   : > { %v3162_v34 = vmax.f32 %v4421_v26, 0.0  ;;  %v3128_v10 = vpop.f32.mrb[134].mxu1 }
 0x74e   : > { %v4422_v50 = vadd.f32 %v3128_v10, %v6425_v5  ;;  %v3130_v21 = vpop.f32.mrb[135].mxu1 }
 0x74f   : > { %v4423_v39 = vadd.f32 %v3130_v21, %v6428_v8  ;;  %3338 = vmatprep.mubr.f32.mxu0 %v3162_v34 }
 0x750   : > { %3339 = vmatmul.mubr.f32.gmra.mrb[132].mxu0 %v3161_v42  ;;  %v3163_v62 = vmax.f32 %v4422_v50, 0.0 }
 0x751   : > { %v3164_v44 = vmax.f32 %v4423_v39, 0.0 }
 0x753   : > { %3343 = vmatprep.mubr.f32.mxu0 %v3164_v44 }
 0x754   : > { %3344 = vmatmul.mubr.f32.gmra.mrb[134].mxu0 %v3163_v62 }
 0x7eb   : > { %v3824_v61 = vpop.f32.mrb[104].mxu0 }
 0x7ec   : > { %v3825_v43 = vpop.f32.mrb[105].mxu0 }
 0x7ed   : > { %v3826_v6 = vadd.f32 %v3825_v43, %v3824_v61 }
 0x7ef   : > { %v3271_v38 = vadd.f32 %v3826_v6, %v6465_v49  ;;  %v3827_v5 = vpop.f32.mrb[106].mxu0 }
 0x7f0   : > { %v3828_v4 = vpop.f32.mrb[107].mxu0 }
 0x7f1   : > { %v3349_v1 = vsub.f32 0.0, %v3271_v38  ;;  %v3829_v8 = vadd.f32 %v3828_v4, %v3827_v5 }
 0x7f3   : > { %v3365_v41 = vmul.f32 1.442695, %v3349_v1  ;;  %v3276_v45 = vadd.f32 %v3829_v8, %v6465_v49  ;;  %v3830_v24 = vpop.f32.mrb[108].mxu0 }
 0x7f4   : > { %v3831_v13 = vpop.f32.mrb[109].mxu0 }
 0x7f5   : > { %4607 = vpow2.f32 %v3365_v41  ;;  %v3350_v7 = vsub.f32 0.0, %v3276_v45  ;;  %v3832_v12 = vadd.f32 %v3831_v13, %v3830_v24 }
 0x7f7   : > { %v3367_v28 = vmul.f32 1.442695, %v3350_v7  ;;  %v3281_v15 = vadd.f32 %v3832_v12, %v6465_v49  ;;  %v3833_v54 = vpop.f32.mrb[110].mxu0 }
 0x7f8   : > { %v3834_v11 = vpop.f32.mrb[111].mxu0 }
 0x7f9   : > { %4609 = vpow2.f32 %v3367_v28  ;;  %v3351_v40 = vsub.f32 0.0, %v3281_v15  ;;  %v3835_v31 = vadd.f32 %v3834_v11, %v3833_v54 }
 0x7fb   : > { %v3369_v19 = vmul.f32 1.442695, %v3351_v40  ;;  %v3286_v23 = vadd.f32 %v3835_v31, %v6465_v49  ;;  %v3836_v47 = vpop.f32.mrb[112].mxu0 }
 0x7fc   : > { %v3837_v35 = vpop.f32.mrb[113].mxu0 }
 0x7fd   : > { %4611 = vpow2.f32 %v3369_v19  ;;  %v3352_v55 = vsub.f32 0.0, %v3286_v23  ;;  %v3838_v51 = vadd.f32 %v3837_v35, %v3836_v47 }
 0x7ff   : > { %v4608_v52 = vpop.eup %4607  ;;  %v3371_v22 = vmul.f32 1.442695, %v3352_v55  ;;  %v3291_v56 = vadd.f32 %v3838_v51, %v6465_v49  ;;  %v3839_v14 = vpop.f32.mrb[114].mxu0 }
 0x800   : > { %v3397_v58 = vadd.f32 1.0, %v4608_v52  ;;  %v3840_v30 = vpop.f32.mrb[115].mxu0 }
 0x801   : > { %4613 = vpow2.f32 %v3371_v22  ;;  %v3353_v27 = vsub.f32 0.0, %v3291_v56  ;;  %v3841_v16 = vadd.f32 %v3840_v30, %v3839_v14 }
 0x802   : > { %4615 = vrcp.f32 %v3397_v58 }
 0x803   : > { %v4610_v63 = vpop.eup %4609  ;;  %v3373_v57 = vmul.f32 1.442695, %v3353_v27  ;;  %v3296_v29 = vadd.f32 %v3841_v16, %v6465_v49  ;;  %v3842_v59 = vpop.f32.mrb[116].mxu0 }
 0x804   : > { %v3398_v2 = vadd.f32 1.0, %v4610_v63  ;;  %v3843_v37 = vpop.f32.mrb[117].mxu0 }
 0x805   : > { %4617 = vpow2.f32 %v3373_v57  ;;  %v3354_v0 = vsub.f32 0.0, %v3296_v29  ;;  %v3844_v20 = vadd.f32 %v3843_v37, %v3842_v59 }
 0x806   : > { %4619 = vrcp.f32 %v3398_v2 }
 0x807   : > { %v4612_v32 = vpop.eup %4611  ;;  %v3375_v3 = vmul.f32 1.442695, %v3354_v0  ;;  %v3301_v48 = vadd.f32 %v3844_v20, %v6465_v49  ;;  %v3845_v17 = vpop.f32.mrb[118].mxu0 }
 0x808   : > { %v3399_v25 = vadd.f32 1.0, %v4612_v32  ;;  %v3846_v53 = vpop.f32.mrb[119].mxu0 }
 0x809   : > { %4621 = vpow2.f32 %v3375_v3  ;;  %v3355_v46 = vsub.f32 0.0, %v3301_v48  ;;  %v3847_v9 = vadd.f32 %v3846_v53, %v3845_v17 }
 0x80a   : > { %4623 = vrcp.f32 %v3399_v25 }
 0x80b   : > { %v4614_v36 = vpop.eup %4613  ;;  %v3377_v33 = vmul.f32 1.442695, %v3355_v46  ;;  %v3306_v60 = vadd.f32 %v3847_v9, %v6465_v49  ;;  %v3848_v18 = vpop.f32.mrb[120].mxu0 }
 0x80c   : > { %v4616_v26 = vpop.eup %4615  ;;  %v3400_v34 = vadd.f32 1.0, %v4614_v36  ;;  %v3849_v10 = vpop.f32.mrb[121].mxu0 }
 0x80d   : > { %3429 = vst [vmem:[%s6478_s1] sm:$0xff] %v4616_v26  ;;  %4625 = vpow2.f32 %v3377_v33  ;;  %v3356_v42 = vsub.f32 0.0, %v3306_v60  ;;  %v3850_v50 = vadd.f32 %v3849_v10, %v3848_v18 }
 0x80e   : > { %4627 = vrcp.f32 %v3400_v34 }
 0x80f   : > { %v4618_v21 = vpop.eup %4617  ;;  %v3379_v39 = vmul.f32 1.442695, %v3356_v42  ;;  %v3311_v44 = vadd.f32 %v3850_v50, %v6465_v49  ;;  %v3851_v62 = vpop.f32.mrb[122].mxu0 }
 0x810   : > { %v4620_v61 = vpop.eup %4619  ;;  %v3401_v43 = vadd.f32 1.0, %v4618_v21  ;;  %v3852_v6 = vpop.f32.mrb[123].mxu0 }
 0x811   : > { %3430 = vst [vmem:[%s6478_s1 + $0x8] sm:$0xff] %v4620_v61  ;;  %4629 = vpow2.f32 %v3379_v39  ;;  %v3357_v38 = vsub.f32 0.0, %v3311_v44  ;;  %v3853_v5 = vadd.f32 %v3852_v6, %v3851_v62 }
 0x812   : > { %4631 = vrcp.f32 %v3401_v43 }
 0x813   : > { %v4622_v4 = vpop.eup %4621  ;;  %v3381_v1 = vmul.f32 1.442695, %v3357_v38  ;;  %v3316_v8 = vadd.f32 %v3853_v5, %v6465_v49  ;;  %v3854_v41 = vpop.f32.mrb[124].mxu0 }
 0x814   : > { %v4624_v45 = vpop.eup %4623  ;;  %v3402_v24 = vadd.f32 1.0, %v4622_v4  ;;  %v3855_v13 = vpop.f32.mrb[125].mxu0 }
 0x815   : > { %3431 = vst [vmem:[%s6478_s1 + $0x10] sm:$0xff] %v4624_v45  ;;  %4633 = vpow2.f32 %v3381_v1  ;;  %v3358_v7 = vsub.f32 0.0, %v3316_v8  ;;  %v3856_v12 = vadd.f32 %v3855_v13, %v3854_v41 }
 0x816   : > { %4635 = vrcp.f32 %v3402_v24 }
 0x817   : > { %v4626_v28 = vpop.eup %4625  ;;  %v3383_v15 = vmul.f32 1.442695, %v3358_v7  ;;  %v3321_v54 = vadd.f32 %v3856_v12, %v6465_v49  ;;  %v3857_v11 = vpop.f32.mrb[126].mxu0 }
 0x818   : > { %v4628_v40 = vpop.eup %4627  ;;  %v3403_v31 = vadd.f32 1.0, %v4626_v28  ;;  %v3858_v19 = vpop.f32.mrb[127].mxu0 }
 0x819   : > { %3432 = vst [vmem:[%s6478_s1 + $0x18] sm:$0xff] %v4628_v40  ;;  %4637 = vpow2.f32 %v3383_v15  ;;  %v3359_v23 = vsub.f32 0.0, %v3321_v54  ;;  %v3859_v47 = vadd.f32 %v3858_v19, %v3857_v11 }
 0x81a   : > { %4639 = vrcp.f32 %v3403_v31 }
 0x81b   : > { %v4630_v35 = vpop.eup %4629  ;;  %v3385_v55 = vmul.f32 1.442695, %v3359_v23  ;;  %v3326_v51 = vadd.f32 %v3859_v47, %v6465_v49  ;;  %v3860_v52 = vpop.f32.mrb[128].mxu0 }
 0x81c   : > { %v4632_v22 = vpop.eup %4631  ;;  %v3404_v56 = vadd.f32 1.0, %v4630_v35  ;;  %v3861_v14 = vpop.f32.mrb[129].mxu0 }
 0x81d   : > { %3433 = vst [vmem:[%s6478_s1 + $0x20] sm:$0xff] %v4632_v22  ;;  %4641 = vpow2.f32 %v3385_v55  ;;  %v3360_v58 = vsub.f32 0.0, %v3326_v51  ;;  %v3862_v30 = vadd.f32 %v3861_v14, %v3860_v52 }
 0x81e   : > { %4643 = vrcp.f32 %v3404_v56 }
 0x81f   : > { %v4634_v27 = vpop.eup %4633  ;;  %v3387_v16 = vmul.f32 1.442695, %v3360_v58  ;;  %v3331_v63 = vadd.f32 %v3862_v30, %v6465_v49  ;;  %v3863_v57 = vpop.f32.mrb[130].mxu0 }
 0x820   : > { %v4636_v29 = vpop.eup %4635  ;;  %v3405_v59 = vadd.f32 1.0, %v4634_v27  ;;  %v3864_v2 = vpop.f32.mrb[131].mxu0 }
 0x821   : > { %3434 = vst [vmem:[%s6478_s1 + $0x28] sm:$0xff] %v4636_v29  ;;  %4645 = vpow2.f32 %v3387_v16  ;;  %v3361_v37 = vsub.f32 0.0, %v3331_v63  ;;  %v3865_v0 = vadd.f32 %v3864_v2, %v3863_v57 }
 0x822   : > { %4647 = vrcp.f32 %v3405_v59 }
 0x823   : > { %v4638_v20 = vpop.eup %4637  ;;  %v3389_v32 = vmul.f32 1.442695, %v3361_v37  ;;  %v3336_v3 = vadd.f32 %v3865_v0, %v6465_v49  ;;  %v3866_v48 = vpop.f32.mrb[132].mxu0 }
 0x824   : > { %v4640_v17 = vpop.eup %4639  ;;  %v3406_v25 = vadd.f32 1.0, %v4638_v20  ;;  %v3867_v53 = vpop.f32.mrb[133].mxu0 }
 0x825   : > { %3435 = vst [vmem:[%s6478_s1 + $0x30] sm:$0xff] %v4640_v17  ;;  %4649 = vpow2.f32 %v3389_v32  ;;  %v3362_v46 = vsub.f32 0.0, %v3336_v3  ;;  %v3868_v9 = vadd.f32 %v3867_v53, %v3866_v48 }
 0x826   : > { %4651 = vrcp.f32 %v3406_v25 }
 0x827   : > { %v4642_v36 = vpop.eup %4641  ;;  %v3391_v33 = vmul.f32 1.442695, %v3362_v46  ;;  %v3341_v60 = vadd.f32 %v3868_v9, %v6465_v49  ;;  %v3869_v18 = vpop.f32.mrb[134].mxu0 }
 0x828   : > { %v4644_v26 = vpop.eup %4643  ;;  %v3407_v34 = vadd.f32 1.0, %v4642_v36  ;;  %v3870_v10 = vpop.f32.mrb[135].mxu0 }
 0x829   : > { %3436 = vst [vmem:[%s6478_s1 + $0x38] sm:$0xff] %v4644_v26  ;;  %4653 = vpow2.f32 %v3391_v33  ;;  %v3363_v42 = vsub.f32 0.0, %v3341_v60  ;;  %v3871_v50 = vadd.f32 %v3870_v10, %v3869_v18 }
 0x82a   : > { %4655 = vrcp.f32 %v3407_v34 }
 0x82b   : > { %v4646_v21 = vpop.eup %4645  ;;  %v3393_v39 = vmul.f32 1.442695, %v3363_v42  ;;  %v3346_v44 = vadd.f32 %v3871_v50, %v6465_v49 }
 0x82c   : > { %v4648_v62 = vpop.eup %4647  ;;  %v3408_v61 = vadd.f32 1.0, %v4646_v21 }
 0x82d   : > { %3437 = vst [vmem:[%s6478_s1 + $0x40] sm:$0xff] %v4648_v62  ;;  %4657 = vpow2.f32 %v3393_v39  ;;  %v3364_v43 = vsub.f32 0.0, %v3346_v44 }
 0x82e   : > { %4659 = vrcp.f32 %v3408_v61 }
 0x82f   : > { %v4650_v6 = vpop.eup %4649  ;;  %v3395_v38 = vmul.f32 1.442695, %v3364_v43 }
 0x830   : > { %v4652_v5 = vpop.eup %4651  ;;  %v3409_v4 = vadd.f32 1.0, %v4650_v6 }
 0x831   : > { %3438 = vst [vmem:[%s6478_s1 + $0x48] sm:$0xff] %v4652_v5  ;;  %4661 = vpow2.f32 %v3395_v38 }
 0x832   : > { %4663 = vrcp.f32 %v3409_v4 }
 0x833   : > { %v4654_v1 = vpop.eup %4653 }
 0x834   : > { %v4656_v8 = vpop.eup %4655  ;;  %v3410_v49 = vadd.f32 1.0, %v4654_v1 }
 0x835   : > { %3439 = vst [vmem:[%s6478_s1 + $0x50] sm:$0xff] %v4656_v8 }
 0x836   : > { %4665 = vrcp.f32 %v3410_v49 }
 0x837   : > { %v4658_v41 = vpop.eup %4657 }
 0x838   : > { %v4660_v45 = vpop.eup %4659  ;;  %v3411_v24 = vadd.f32 1.0, %v4658_v41 }
 0x839   : > { %3440 = vst [vmem:[%s6478_s1 + $0x58] sm:$0xff] %v4660_v45 }
 0x83a   : > { %4667 = vrcp.f32 %v3411_v24 }
 0x83b   : > { %v4662_v13 = vpop.eup %4661 }
 0x83c   : > { %v4664_v7 = vpop.eup %4663  ;;  %v3412_v12 = vadd.f32 1.0, %v4662_v13 }
 0x83d   : > { %3441 = vst [vmem:[%s6478_s1 + $0x60] sm:$0xff] %v4664_v7 }
 0x83e   : > { %4669 = vrcp.f32 %v3412_v12 }
 0x840   : > { %v4666_v28 = vpop.eup %4665 }
 0x841   : > { %3442 = vst [vmem:[%s6478_s1 + $0x68] sm:$0xff] %v4666_v28 }
 0x844   : > { %v4668_v15 = vpop.eup %4667 }
 0x845   : > { %3443 = vst [vmem:[%s6478_s1 + $0x70] sm:$0xff] %v4668_v15 }
 0x848   : > { %v4670_v54 = vpop.eup %4669 }
 0x849   : > { %3444 = vst [vmem:[%s6478_s1 + $0x78] sm:$0xff] %v4670_v54 }
 0x84a PF: > { %s32_s24 = sadd.s32 1, %s4889_s24  }
 0x84b   : > { %p29_p8 = scmp.ge.s32.totalorder %s32_s24, 4  }
 0x84d   :  { %31 = sbr.rel (!%p29_p8) target bundleno = 13 (0xd), region = 158 }
 0x854   :  { %3484 = vsyncpa [#allocation3], 1 }
 0x855   :  { %3486 = vsyncpa [#allocation3 + $0x1], 1 }
 0x856   :  { %3487 = vsyncpa [#allocation5], 1 }
 0x857   :  { %3488 = vsyncpa [#allocation8], 1 }
 0x858   :  { %3489 = vsyncpa [#allocation11], 1 }

</bundles_post_ra>
